<compile_context>
chip_gen: v6e
topology: v6e:2x2x1
jax: 0.10.0
libtpu: 0.0.40
codegen_flags: <defaults>
</compile_context>

<pallas_src>
import functools

import jax
import jax.numpy as jnp
from jax.experimental import pallas as pl
from jax.experimental.pallas import tpu as pltpu


_VMEM_LIMIT = 32 * 1024 * 1024  # explicit scoped-VMEM budget; fits v5e/v6e/v7x


def _round_up(x, m):
    return ((x + m - 1) // m) * m


# ----------------------------------------------------------------------------
# Fused per-point MLP (BN folded) + global max-pool over points
# ----------------------------------------------------------------------------

def _point_mlp_pool_kernel(x_ref, w1_ref, b1_ref, w2_ref, b2_ref,
                           w3_ref, b3_ref, g_ref, *, relu3):
    t = pl.program_id(1)

    x = x_ref[0]               # (tn, Cin)  f32
    w1 = w1_ref[0]             # (Cin, 64)  f32
    cin = w1.shape[0]

    # conv1 (+BN) + ReLU: K == 3, so do it on the VPU (3 FMAs) and keep the
    # MXU free for the wide layers (a K=3 matmul is almost all MXU padding).
    h = b1_ref[...]            # (1, 64) -> broadcasts over rows
    for c in range(cin):       # static, tiny
        h = h + x[:, c:c + 1] * w1[c:c + 1, :]
    h = jnp.maximum(h, 0.0)    # (tn, 64) f32

    # conv2 (+BN) + ReLU: bf16 MXU, f32 accumulation, f32 epilogue.
    h = jnp.dot(h.astype(w2_ref.dtype), w2_ref[...],
                preferred_element_type=jnp.float32) + b2_ref[...]
    h = jnp.maximum(h, 0.0)    # (tn, 128) f32

    # conv3 (+BN) [+ ReLU]: bf16 MXU, f32 accumulation.
    h = jnp.dot(h.astype(w3_ref.dtype), w3_ref[...],
                preferred_element_type=jnp.float32) + b3_ref[...]
    if relu3:
        h = jnp.maximum(h, 0.0)                        # (tn, 1024) f32

    tile_max = jnp.max(h, axis=0)[None, None, :]       # (1, 1, 1024)

    @pl.when(t == 0)
    def _():
        g_ref[...] = tile_max

    @pl.when(t > 0)
    def _():
        g_ref[...] = jnp.maximum(g_ref[...], tile_max)


def point_mlp_maxpool(x, conv1, conv2, conv3, *, relu3, tn=512):
    """max over points of a 3-layer per-point MLP (BN folded into weights).

    x: (B, Np, Cin) f32 with Np % tn == 0 (edge-padded upstream).
    conv1 weight is either (Cin, 64) [shared] or (B, Cin, 64) [per-batch,
    used to fold the T-Net transform into conv1].  Returns (B, Cout) f32.
    """
    B, Np, Cin = x.shape
    w1, b1 = conv1
    w2, b2 = conv2
    w3, b3 = conv3
    if w1.ndim == 2:
        w1 = w1[None]
    per_batch_w1 = w1.shape[0] > 1
    c1 = w1.shape[2]
    cout = w3.shape[1]
    assert Np % tn == 0

    w1_map = (lambda b, t: (b, 0, 0)) if per_batch_w1 else (lambda b, t: (0, 0, 0))

    out = pl.pallas_call(
        functools.partial(_point_mlp_pool_kernel, relu3=relu3),
        out_shape=jax.ShapeDtypeStruct((B, 1, cout), jnp.float32),
        grid_spec=pltpu.PrefetchScalarGridSpec(
            num_scalar_prefetch=0,
            grid=(B, Np // tn),
            in_specs=[
                pl.BlockSpec((1, tn, Cin), lambda b, t: (b, t, 0)),
                pl.BlockSpec((1, Cin, c1), w1_map),
                pl.BlockSpec((1, c1), lambda b, t: (0, 0)),
                pl.BlockSpec(w2.shape, lambda b, t: (0, 0)),
                pl.BlockSpec((1, w2.shape[1]), lambda b, t: (0, 0)),
                pl.BlockSpec(w3.shape, lambda b, t: (0, 0)),
                pl.BlockSpec((1, cout), lambda b, t: (0, 0)),
            ],
            out_specs=pl.BlockSpec((1, 1, cout), lambda b, t: (b, 0, 0)),
        ),
        compiler_params=pltpu.CompilerParams(
            dimension_semantics=("parallel", "arbitrary"),
            vmem_limit_bytes=_VMEM_LIMIT),
    )(x, w1, b1, w2, b2, w3, b3)
    return out.reshape(B, cout)


# ----------------------------------------------------------------------------
# Fused FC head: fc1(+BN)+ReLU -> fc2(+BN)+ReLU -> fc3 [-> log_softmax]
# ----------------------------------------------------------------------------

def _fc_head_kernel(g_ref, w1_ref, b1_ref, w2_ref, b2_ref, w3_ref, b3_ref,
                    o_ref, *, log_sm):
    g = g_ref[...]                                        # (B, 1024) f32
    h = jnp.dot(g.astype(w1_ref.dtype), w1_ref[...],
                preferred_element_type=jnp.float32) + b1_ref[...]
    h = jnp.maximum(h, 0.0)                               # (B, 512) f32
    # TODO(synk): dropout(p=0.3) before bn2 is eval-mode identity here.
    h = jnp.dot(h.astype(w2_ref.dtype), w2_ref[...],
                preferred_element_type=jnp.float32) + b2_ref[...]
    h = jnp.maximum(h, 0.0)                               # (B, 256) f32
    o = jnp.dot(h, w3_ref[...],
                preferred_element_type=jnp.float32) + b3_ref[...]
    if log_sm:
        m = jnp.max(o, axis=1, keepdims=True)
        s = o - m
        o = s - jnp.log(jnp.sum(jnp.exp(s), axis=1, keepdims=True))
    o_ref[...] = o


def fc_head(g, fc1, fc2, fc3, *, log_sm):
    B, cin = g.shape
    w1, b1 = fc1
    w2, b2 = fc2
    w3, b3 = fc3
    cout = w3.shape[1]
    return pl.pallas_call(
        functools.partial(_fc_head_kernel, log_sm=log_sm),
        out_shape=jax.ShapeDtypeStruct((B, cout), jnp.float32),
        grid_spec=pltpu.PrefetchScalarGridSpec(
            num_scalar_prefetch=0,
            grid=(1,),
            in_specs=[
                pl.BlockSpec((B, cin), lambda i: (0, 0)),
                pl.BlockSpec(w1.shape, lambda i: (0, 0)),
                pl.BlockSpec((1, w1.shape[1]), lambda i: (0, 0)),
                pl.BlockSpec(w2.shape, lambda i: (0, 0)),
                pl.BlockSpec((1, w2.shape[1]), lambda i: (0, 0)),
                pl.BlockSpec(w3.shape, lambda i: (0, 0)),
                pl.BlockSpec((1, cout), lambda i: (0, 0)),
            ],
            out_specs=pl.BlockSpec((B, cout), lambda i: (0, 0)),
        ),
        compiler_params=pltpu.CompilerParams(
            dimension_semantics=("arbitrary",),
            vmem_limit_bytes=_VMEM_LIMIT),
    )(g, w1, b1, w2, b2, w3, b3)


# ----------------------------------------------------------------------------
# Deterministic parameter initialization (BN folded; big weights stored bf16)
# ----------------------------------------------------------------------------

def _init_linear(key, cin, cout, std=0.05):
    kw, kb = jax.random.split(key)
    w = std * jax.random.normal(kw, (cin, cout), jnp.float32)
    b = std * jax.random.normal(kb, (cout,), jnp.float32)
    return w, b


def _fold_bn(w, b, gamma, beta, mean, var, eps=1e-5, w_dtype=jnp.float32):
    scale = gamma / jnp.sqrt(var + eps)
    w_f = (w * scale[None, :]).astype(w_dtype)            # fold in f32, then cast
    b_f = ((b - mean) * scale + beta).reshape(1, -1)      # bias stays f32
    return w_f, b_f


def _init_linear_bn(key, cin, cout, w_dtype=jnp.float32):
    kl, kg, kb = jax.random.split(key, 3)
    w, b = _init_linear(kl, cin, cout)
    gamma = 1.0 + 0.05 * jax.random.normal(kg, (cout,), jnp.float32)
    beta = 0.05 * jax.random.normal(kb, (cout,), jnp.float32)
    mean = jnp.zeros((cout,), jnp.float32)   # BatchNorm1d default running stats
    var = jnp.ones((cout,), jnp.float32)
    return _fold_bn(w, b, gamma, beta, mean, var, w_dtype=w_dtype)


def _init_tnet(key, k):
    keys = jax.random.split(key, 6)
    p = {
        "conv1": _init_linear_bn(keys[0], k, 64, w_dtype=jnp.float32),     # VPU path
        "conv2": _init_linear_bn(keys[1], 64, 128, w_dtype=jnp.bfloat16),
        "conv3": _init_linear_bn(keys[2], 128, 1024, w_dtype=jnp.bfloat16),
        "fc1": _init_linear_bn(keys[3], 1024, 512, w_dtype=jnp.bfloat16),
        "fc2": _init_linear_bn(keys[4], 512, 256, w_dtype=jnp.bfloat16),
    }
    w3, _ = _init_linear(keys[5], 256, k * k)
    b3 = jnp.eye(k, dtype=jnp.float32).reshape(1, k * k)   # fc3.bias = eye(k)
    p["fc3"] = (w3, b3)
    return p


def init_params(key, num_classes=2):
    keys = jax.random.split(key, 7)
    w3, b3 = _init_linear(keys[6], 256, num_classes)
    return {
        "tnet1": _init_tnet(keys[0], 3),
        "conv1": _init_linear_bn(keys[1], 3, 64, w_dtype=jnp.float32),      # VPU path
        "conv2": _init_linear_bn(keys[2], 64, 128, w_dtype=jnp.bfloat16),
        "conv3": _init_linear_bn(keys[3], 128, 1024, w_dtype=jnp.bfloat16),  # BN, no ReLU
        "fc1": _init_linear_bn(keys[4], 1024, 512, w_dtype=jnp.bfloat16),    # fc1 + bn1
        "fc2": _init_linear_bn(keys[5], 512, 256, w_dtype=jnp.bfloat16),     # fc2 + (dropout) + bn2
        "fc3": (w3, b3.reshape(1, -1)),
    }


# ----------------------------------------------------------------------------
# Forward pass
# ----------------------------------------------------------------------------

def pointnet_cls_forward(params, x, *, tn=512):
    # x: (B, 3, N)  -- same NCW layout as the PyTorch module input.
    B, _, N = x.shape
    x_bnc = jnp.transpose(x, (0, 2, 1)).astype(jnp.float32)        # (B, N, 3)

    # Pad the point axis ONCE for the whole per-point pipeline.  mode='edge'
    # duplicates an existing point, so the global max-pool is unchanged.
    tn = min(tn, _round_up(N, 8))
    Np = _round_up(N, tn)
    if Np != N:
        x_bnc = jnp.pad(x_bnc, ((0, 0), (0, Np - N), (0, 0)), mode="edge")

    # ---- T-Net (k=3): fused per-point MLP + max-pool, then fused FC head ----
    tp = params["tnet1"]
    g1 = point_mlp_maxpool(x_bnc, tp["conv1"], tp["conv2"], tp["conv3"],
                           relu3=True, tn=tn)                      # (B, 1024)
    trans = fc_head(g1, tp["fc1"], tp["fc2"], tp["fc3"],
                    log_sm=False).reshape(B, 3, 3)                 # (B, 3, 3)

    # ---- Fold the 3x3 transform into conv1:  (x @ T) @ W == x @ (T @ W) ----
    w1, b1 = params["conv1"]
    w1_eff = jnp.einsum("bij,jk->bik", trans, w1)                  # (B, 3, 64), tiny

    # ---- PointNetfeat: fused per-point MLP + global max-pool ----
    g = point_mlp_maxpool(x_bnc, (w1_eff, b1), params["conv2"], params["conv3"],
                          relu3=False, tn=tn)                      # (B, 1024)

    # ---- Classification head (fc1/fc2/fc3 + log_softmax) ----
    logp = fc_head(g, params["fc1"], params["fc2"], params["fc3"],
                   log_sm=True)                                    # (B, num_classes)
    trans_feat = None   # feature_transform=False
    return logp, trans, trans_feat


if __name__ == "__main__":
    key = jax.random.PRNGKey(0)
    pkey, xkey = jax.random.split(key)
    params = init_params(pkey, num_classes=2)
    x = jax.random.normal(xkey, (2, 3, 16), jnp.float32)  # (batch=2, xyz=3, points=16)

    fwd = jax.jit(pointnet_cls_forward)
    logp, trans, trans_feat = fwd(params, x)
    jax.block_until_ready((logp, trans))

    assert logp.shape == (2, 2)
    assert trans.shape == (2, 3, 3)
    assert trans_feat is None
    print("KERNEL_OK")
</pallas_src>

<mosaic_0001>
module attributes {stable_mosaic.version = 11 : i64} {
  func.func @_point_mlp_pool_kernel(%arg0: i32, %arg1: i32, %arg2: memref<1x16x3xf32, #tpu.memory_space<vmem>>, %arg3: memref<1x3x64xf32, #tpu.memory_space<vmem>>, %arg4: memref<1x64xf32, #tpu.memory_space<vmem>>, %arg5: memref<64x128xbf16, #tpu.memory_space<vmem>>, %arg6: memref<1x128xf32, #tpu.memory_space<vmem>>, %arg7: memref<128x1024xbf16, #tpu.memory_space<vmem>>, %arg8: memref<1x1024xf32, #tpu.memory_space<vmem>>, %arg9: memref<1x1x1024xf32, #tpu.memory_space<vmem>>) attributes {dimension_semantics = [#tpu.dimension_semantics<parallel>, #tpu.dimension_semantics<arbitrary>], iteration_bounds = array<i64: 2, 1>, scalar_prefetch = 0 : i64, scratch_operands = 0 : i64, tpu.core_type = #tpu.core_type<tc>, window_params = [{transform_indices = @transform_0, window_bounds = array<i64: 1, 16, 3>}, {pipeline_mode = #tpu.pipeline_mode<synchronous>, transform_indices = @transform_1, window_bounds = array<i64: 1, 3, 64>}, {pipeline_mode = #tpu.pipeline_mode<synchronous>, transform_indices = @transform_2, window_bounds = array<i64: 1, 64>}, {pipeline_mode = #tpu.pipeline_mode<synchronous>, transform_indices = @transform_3, window_bounds = array<i64: 64, 128>}, {pipeline_mode = #tpu.pipeline_mode<synchronous>, transform_indices = @transform_4, window_bounds = array<i64: 1, 128>}, {pipeline_mode = #tpu.pipeline_mode<synchronous>, transform_indices = @transform_5, window_bounds = array<i64: 128, 1024>}, {pipeline_mode = #tpu.pipeline_mode<synchronous>, transform_indices = @transform_6, window_bounds = array<i64: 1, 1024>}, {transform_indices = @transform_7, window_bounds = array<i64: 1, 1, 1024>}]} {
    %c0 = arith.constant 0 : index
    %c0_0 = arith.constant 0 : index
    %c0_1 = arith.constant 0 : index
    %0 = vector.load %arg2[%c0, %c0_0, %c0_1] : memref<1x16x3xf32, #tpu.memory_space<vmem>>, vector<1x16x3xf32>
    %1 = vector.shape_cast %0 : vector<1x16x3xf32> to vector<16x3xf32>
    %c0_2 = arith.constant 0 : index
    %c0_3 = arith.constant 0 : index
    %c0_4 = arith.constant 0 : index
    %2 = vector.load %arg3[%c0_2, %c0_3, %c0_4] : memref<1x3x64xf32, #tpu.memory_space<vmem>>, vector<1x3x64xf32>
    %3 = vector.shape_cast %2 : vector<1x3x64xf32> to vector<3x64xf32>
    %c0_5 = arith.constant 0 : index
    %c0_6 = arith.constant 0 : index
    %4 = vector.load %arg4[%c0_5, %c0_6] : memref<1x64xf32, #tpu.memory_space<vmem>>, vector<1x64xf32>
    %5 = vector.extract_strided_slice %1 {offsets = [0, 0], sizes = [16, 1], strides = [1, 1]} : vector<16x3xf32> to vector<16x1xf32>
    %6 = vector.extract_strided_slice %3 {offsets = [0, 0], sizes = [1, 64], strides = [1, 1]} : vector<3x64xf32> to vector<1x64xf32>
    %7 = vector.broadcast %5 : vector<16x1xf32> to vector<16x64xf32>
    %8 = vector.broadcast %6 : vector<1x64xf32> to vector<16x64xf32>
    %9 = arith.mulf %7, %8 : vector<16x64xf32>
    %10 = vector.broadcast %4 : vector<1x64xf32> to vector<16x64xf32>
    %11 = arith.addf %10, %9 : vector<16x64xf32>
    %12 = vector.extract_strided_slice %1 {offsets = [0, 1], sizes = [16, 1], strides = [1, 1]} : vector<16x3xf32> to vector<16x1xf32>
    %13 = vector.extract_strided_slice %3 {offsets = [1, 0], sizes = [1, 64], strides = [1, 1]} : vector<3x64xf32> to vector<1x64xf32>
    %14 = vector.broadcast %12 : vector<16x1xf32> to vector<16x64xf32>
    %15 = vector.broadcast %13 : vector<1x64xf32> to vector<16x64xf32>
    %16 = arith.mulf %14, %15 : vector<16x64xf32>
    %17 = arith.addf %11, %16 : vector<16x64xf32>
    %18 = vector.extract_strided_slice %1 {offsets = [0, 2], sizes = [16, 1], strides = [1, 1]} : vector<16x3xf32> to vector<16x1xf32>
    %19 = vector.extract_strided_slice %3 {offsets = [2, 0], sizes = [1, 64], strides = [1, 1]} : vector<3x64xf32> to vector<1x64xf32>
    %20 = vector.broadcast %18 : vector<16x1xf32> to vector<16x64xf32>
    %21 = vector.broadcast %19 : vector<1x64xf32> to vector<16x64xf32>
    %22 = arith.mulf %20, %21 : vector<16x64xf32>
    %23 = arith.addf %17, %22 : vector<16x64xf32>
    %cst = arith.constant 0.000000e+00 : f32
    %24 = vector.broadcast %cst : f32 to vector<16x64xf32>
    %25 = arith.maximumf %23, %24 : vector<16x64xf32>
    %26 = arith.truncf %25 : vector<16x64xf32> to vector<16x64xbf16>
    %c0_7 = arith.constant 0 : index
    %c0_8 = arith.constant 0 : index
    %27 = vector.load %arg5[%c0_7, %c0_8] : memref<64x128xbf16, #tpu.memory_space<vmem>>, vector<64x128xbf16>
    %cst_9 = arith.constant dense<0.000000e+00> : vector<16x128xf32>
    %28 = tpu.matmul %26, %27, %cst_9 {dimension_numbers = #tpu.dot_dimension_numbers<[1], [0], [0], [1], [0, 0, 1, 1], [], []>} : vector<16x64xbf16>, vector<64x128xbf16>, vector<16x128xf32> -> vector<16x128xf32>
    %c0_10 = arith.constant 0 : index
    %c0_11 = arith.constant 0 : index
    %29 = vector.load %arg6[%c0_10, %c0_11] : memref<1x128xf32, #tpu.memory_space<vmem>>, vector<1x128xf32>
    %30 = vector.broadcast %29 : vector<1x128xf32> to vector<16x128xf32>
    %31 = arith.addf %28, %30 : vector<16x128xf32>
    %cst_12 = arith.constant 0.000000e+00 : f32
    %32 = vector.broadcast %cst_12 : f32 to vector<16x128xf32>
    %33 = arith.maximumf %31, %32 : vector<16x128xf32>
    %34 = arith.truncf %33 : vector<16x128xf32> to vector<16x128xbf16>
    %c0_13 = arith.constant 0 : index
    %c0_14 = arith.constant 0 : index
    %35 = vector.load %arg7[%c0_13, %c0_14] : memref<128x1024xbf16, #tpu.memory_space<vmem>>, vector<128x1024xbf16>
    %cst_15 = arith.constant dense<0.000000e+00> : vector<16x1024xf32>
    %36 = tpu.matmul %34, %35, %cst_15 {dimension_numbers = #tpu.dot_dimension_numbers<[1], [0], [0], [1], [0, 0, 1, 1], [], []>} : vector<16x128xbf16>, vector<128x1024xbf16>, vector<16x1024xf32> -> vector<16x1024xf32>
    %c0_16 = arith.constant 0 : index
    %c0_17 = arith.constant 0 : index
    %37 = vector.load %arg8[%c0_16, %c0_17] : memref<1x1024xf32, #tpu.memory_space<vmem>>, vector<1x1024xf32>
    %38 = vector.broadcast %37 : vector<1x1024xf32> to vector<16x1024xf32>
    %39 = arith.addf %36, %38 : vector<16x1024xf32>
    %cst_18 = arith.constant 0.000000e+00 : f32
    %40 = vector.broadcast %cst_18 : f32 to vector<16x1024xf32>
    %41 = arith.maximumf %39, %40 : vector<16x1024xf32>
    %cst_19 = arith.constant dense<0xFF800000> : vector<1024xf32>
    %42 = vector.multi_reduction <maximumf>, %41, %cst_19 [0] : vector<16x1024xf32> to vector<1024xf32>
    %43 = vector.shape_cast %42 : vector<1024xf32> to vector<1x1x1024xf32>
    %c0_i32 = arith.constant 0 : i32
    %44 = arith.cmpi eq, %arg1, %c0_i32 : i32
    %45 = arith.extui %44 : i1 to i32
    %c0_i32_20 = arith.constant 0 : i32
    %46 = arith.cmpi ne, %45, %c0_i32_20 : i32
    scf.if %46 {
      %c0_23 = arith.constant 0 : index
      %c0_24 = arith.constant 0 : index
      %c0_25 = arith.constant 0 : index
      %50 = vector.load %arg9[%c0_23, %c0_24, %c0_25] : memref<1x1x1024xf32, #tpu.memory_space<vmem>>, vector<1x1x1024xf32>
      tpu.vector_store %arg9[%c0_23, %c0_24, %c0_25], %43 {strides = array<i32>} : memref<1x1x1024xf32, #tpu.memory_space<vmem>>, vector<1x1x1024xf32>,
    } else {
    }
    %c0_i32_21 = arith.constant 0 : i32
    %47 = arith.cmpi sgt, %arg1, %c0_i32_21 : i32
    %48 = arith.extui %47 : i1 to i32
    %c0_i32_22 = arith.constant 0 : i32
    %49 = arith.cmpi ne, %48, %c0_i32_22 : i32
    scf.if %49 {
      %c0_23 = arith.constant 0 : index
      %c0_24 = arith.constant 0 : index
      %c0_25 = arith.constant 0 : index
      %50 = vector.load %arg9[%c0_23, %c0_24, %c0_25] : memref<1x1x1024xf32, #tpu.memory_space<vmem>>, vector<1x1x1024xf32>
      %51 = arith.maximumf %50, %43 : vector<1x1x1024xf32>
      %c0_26 = arith.constant 0 : index
      %c0_27 = arith.constant 0 : index
      %c0_28 = arith.constant 0 : index
      %52 = vector.load %arg9[%c0_26, %c0_27, %c0_28] : memref<1x1x1024xf32, #tpu.memory_space<vmem>>, vector<1x1x1024xf32>
      tpu.vector_store %arg9[%c0_26, %c0_27, %c0_28], %51 {strides = array<i32>} : memref<1x1x1024xf32, #tpu.memory_space<vmem>>, vector<1x1x1024xf32>,
    } else {
    }
    return
  }
  func.func @transform_0(%arg0: i32, %arg1: i32) -> (i32, i32, i32) {
    %c0_i32 = arith.constant 0 : i32
    %c0_i32_0 = arith.constant 0 : i32
    return %arg0, %arg1, %c0_i32 : i32, i32, i32
  }
  func.func @transform_1(%arg0: i32, %arg1: i32) -> (i32, i32, i32) {
    %c0_i32 = arith.constant 0 : i32
    %c0_i32_0 = arith.constant 0 : i32
    %c0_i32_1 = arith.constant 0 : i32
    %c0_i32_2 = arith.constant 0 : i32
    return %c0_i32, %c0_i32_0, %c0_i32_1 : i32, i32, i32
  }
  func.func @transform_2(%arg0: i32, %arg1: i32) -> (i32, i32) {
    %c0_i32 = arith.constant 0 : i32
    %c0_i32_0 = arith.constant 0 : i32
    %c0_i32_1 = arith.constant 0 : i32
    return %c0_i32, %c0_i32_0 : i32, i32
  }
  func.func @transform_3(%arg0: i32, %arg1: i32) -> (i32, i32) {
    %c0_i32 = arith.constant 0 : i32
    %c0_i32_0 = arith.constant 0 : i32
    %c0_i32_1 = arith.constant 0 : i32
    return %c0_i32, %c0_i32_0 : i32, i32
  }
  func.func @transform_4(%arg0: i32, %arg1: i32) -> (i32, i32) {
    %c0_i32 = arith.constant 0 : i32
    %c0_i32_0 = arith.constant 0 : i32
    %c0_i32_1 = arith.constant 0 : i32
    return %c0_i32, %c0_i32_0 : i32, i32
  }
  func.func @transform_5(%arg0: i32, %arg1: i32) -> (i32, i32) {
    %c0_i32 = arith.constant 0 : i32
    %c0_i32_0 = arith.constant 0 : i32
    %c0_i32_1 = arith.constant 0 : i32
    return %c0_i32, %c0_i32_0 : i32, i32
  }
  func.func @transform_6(%arg0: i32, %arg1: i32) -> (i32, i32) {
    %c0_i32 = arith.constant 0 : i32
    %c0_i32_0 = arith.constant 0 : i32
    %c0_i32_1 = arith.constant 0 : i32
    return %c0_i32, %c0_i32_0 : i32, i32
  }
  func.func @transform_7(%arg0: i32, %arg1: i32) -> (i32, i32, i32) {
    %c0_i32 = arith.constant 0 : i32
    %c0_i32_0 = arith.constant 0 : i32
    %c0_i32_1 = arith.constant 0 : i32
    return %arg0, %c0_i32, %c0_i32_0 : i32, i32, i32
  }
}

module attributes {stable_mosaic.version = 11 : i64} {
  func.func @_fc_head_kernel(%arg0: i32, %arg1: memref<2x1024xf32, #tpu.memory_space<vmem>>, %arg2: memref<1024x512xbf16, #tpu.memory_space<vmem>>, %arg3: memref<1x512xf32, #tpu.memory_space<vmem>>, %arg4: memref<512x256xbf16, #tpu.memory_space<vmem>>, %arg5: memref<1x256xf32, #tpu.memory_space<vmem>>, %arg6: memref<256x9xf32, #tpu.memory_space<vmem>>, %arg7: memref<1x9xf32, #tpu.memory_space<vmem>>, %arg8: memref<2x9xf32, #tpu.memory_space<vmem>>) attributes {dimension_semantics = [#tpu.dimension_semantics<arbitrary>], iteration_bounds = array<i64: 1>, scalar_prefetch = 0 : i64, scratch_operands = 0 : i64, tpu.core_type = #tpu.core_type<tc>, window_params = [{pipeline_mode = #tpu.pipeline_mode<synchronous>, transform_indices = @transform_0, window_bounds = array<i64: 2, 1024>}, {pipeline_mode = #tpu.pipeline_mode<synchronous>, transform_indices = @transform_1, window_bounds = array<i64: 1024, 512>}, {pipeline_mode = #tpu.pipeline_mode<synchronous>, transform_indices = @transform_2, window_bounds = array<i64: 1, 512>}, {pipeline_mode = #tpu.pipeline_mode<synchronous>, transform_indices = @transform_3, window_bounds = array<i64: 512, 256>}, {pipeline_mode = #tpu.pipeline_mode<synchronous>, transform_indices = @transform_4, window_bounds = array<i64: 1, 256>}, {pipeline_mode = #tpu.pipeline_mode<synchronous>, transform_indices = @transform_5, window_bounds = array<i64: 256, 9>}, {pipeline_mode = #tpu.pipeline_mode<synchronous>, transform_indices = @transform_6, window_bounds = array<i64: 1, 9>}, {pipeline_mode = #tpu.pipeline_mode<synchronous>, transform_indices = @transform_7, window_bounds = array<i64: 2, 9>}]} {
    %c0 = arith.constant 0 : index
    %c0_0 = arith.constant 0 : index
    %0 = vector.load %arg1[%c0, %c0_0] : memref<2x1024xf32, #tpu.memory_space<vmem>>, vector<2x1024xf32>
    %1 = arith.truncf %0 : vector<2x1024xf32> to vector<2x1024xbf16>
    %c0_1 = arith.constant 0 : index
    %c0_2 = arith.constant 0 : index
    %2 = vector.load %arg2[%c0_1, %c0_2] : memref<1024x512xbf16, #tpu.memory_space<vmem>>, vector<1024x512xbf16>
    %cst = arith.constant dense<0.000000e+00> : vector<2x512xf32>
    %3 = tpu.matmul %1, %2, %cst {dimension_numbers = #tpu.dot_dimension_numbers<[1], [0], [0], [1], [0, 0, 1, 1], [], []>} : vector<2x1024xbf16>, vector<1024x512xbf16>, vector<2x512xf32> -> vector<2x512xf32>
    %c0_3 = arith.constant 0 : index
    %c0_4 = arith.constant 0 : index
    %4 = vector.load %arg3[%c0_3, %c0_4] : memref<1x512xf32, #tpu.memory_space<vmem>>, vector<1x512xf32>
    %5 = vector.broadcast %4 : vector<1x512xf32> to vector<2x512xf32>
    %6 = arith.addf %3, %5 : vector<2x512xf32>
    %cst_5 = arith.constant 0.000000e+00 : f32
    %7 = vector.broadcast %cst_5 : f32 to vector<2x512xf32>
    %8 = arith.maximumf %6, %7 : vector<2x512xf32>
    %9 = arith.truncf %8 : vector<2x512xf32> to vector<2x512xbf16>
    %c0_6 = arith.constant 0 : index
    %c0_7 = arith.constant 0 : index
    %10 = vector.load %arg4[%c0_6, %c0_7] : memref<512x256xbf16, #tpu.memory_space<vmem>>, vector<512x256xbf16>
    %cst_8 = arith.constant dense<0.000000e+00> : vector<2x256xf32>
    %11 = tpu.matmul %9, %10, %cst_8 {dimension_numbers = #tpu.dot_dimension_numbers<[1], [0], [0], [1], [0, 0, 1, 1], [], []>} : vector<2x512xbf16>, vector<512x256xbf16>, vector<2x256xf32> -> vector<2x256xf32>
    %c0_9 = arith.constant 0 : index
    %c0_10 = arith.constant 0 : index
    %12 = vector.load %arg5[%c0_9, %c0_10] : memref<1x256xf32, #tpu.memory_space<vmem>>, vector<1x256xf32>
    %13 = vector.broadcast %12 : vector<1x256xf32> to vector<2x256xf32>
    %14 = arith.addf %11, %13 : vector<2x256xf32>
    %cst_11 = arith.constant 0.000000e+00 : f32
    %15 = vector.broadcast %cst_11 : f32 to vector<2x256xf32>
    %16 = arith.maximumf %14, %15 : vector<2x256xf32>
    %c0_12 = arith.constant 0 : index
    %c0_13 = arith.constant 0 : index
    %17 = vector.load %arg6[%c0_12, %c0_13] : memref<256x9xf32, #tpu.memory_space<vmem>>, vector<256x9xf32>
    %cst_14 = arith.constant dense<0.000000e+00> : vector<2x9xf32>
    %18 = tpu.matmul %16, %17, %cst_14 {dimension_numbers = #tpu.dot_dimension_numbers<[1], [0], [0], [1], [0, 0, 1, 1], [], []>} : vector<2x256xf32>, vector<256x9xf32>, vector<2x9xf32> -> vector<2x9xf32>
    %c0_15 = arith.constant 0 : index
    %c0_16 = arith.constant 0 : index
    %19 = vector.load %arg7[%c0_15, %c0_16] : memref<1x9xf32, #tpu.memory_space<vmem>>, vector<1x9xf32>
    %20 = vector.broadcast %19 : vector<1x9xf32> to vector<2x9xf32>
    %21 = arith.addf %18, %20 : vector<2x9xf32>
    %c0_17 = arith.constant 0 : index
    %c0_18 = arith.constant 0 : index
    %22 = vector.load %arg8[%c0_17, %c0_18] : memref<2x9xf32, #tpu.memory_space<vmem>>, vector<2x9xf32>
    tpu.vector_store %arg8[%c0_17, %c0_18], %21 {strides = array<i32>} : memref<2x9xf32, #tpu.memory_space<vmem>>, vector<2x9xf32>,
    return
  }
  func.func @transform_0(%arg0: i32) -> (i32, i32) {
    %c0_i32 = arith.constant 0 : i32
    %c0_i32_0 = arith.constant 0 : i32
    %c0_i32_1 = arith.constant 0 : i32
    return %c0_i32, %c0_i32_0 : i32, i32
  }
  func.func @transform_1(%arg0: i32) -> (i32, i32) {
    %c0_i32 = arith.constant 0 : i32
    %c0_i32_0 = arith.constant 0 : i32
    %c0_i32_1 = arith.constant 0 : i32
    return %c0_i32, %c0_i32_0 : i32, i32
  }
  func.func @transform_2(%arg0: i32) -> (i32, i32) {
    %c0_i32 = arith.constant 0 : i32
    %c0_i32_0 = arith.constant 0 : i32
    %c0_i32_1 = arith.constant 0 : i32
    return %c0_i32, %c0_i32_0 : i32, i32
  }
  func.func @transform_3(%arg0: i32) -> (i32, i32) {
    %c0_i32 = arith.constant 0 : i32
    %c0_i32_0 = arith.constant 0 : i32
    %c0_i32_1 = arith.constant 0 : i32
    return %c0_i32, %c0_i32_0 : i32, i32
  }
  func.func @transform_4(%arg0: i32) -> (i32, i32) {
    %c0_i32 = arith.constant 0 : i32
    %c0_i32_0 = arith.constant 0 : i32
    %c0_i32_1 = arith.constant 0 : i32
    return %c0_i32, %c0_i32_0 : i32, i32
  }
  func.func @transform_5(%arg0: i32) -> (i32, i32) {
    %c0_i32 = arith.constant 0 : i32
    %c0_i32_0 = arith.constant 0 : i32
    %c0_i32_1 = arith.constant 0 : i32
    return %c0_i32, %c0_i32_0 : i32, i32
  }
  func.func @transform_6(%arg0: i32) -> (i32, i32) {
    %c0_i32 = arith.constant 0 : i32
    %c0_i32_0 = arith.constant 0 : i32
    %c0_i32_1 = arith.constant 0 : i32
    return %c0_i32, %c0_i32_0 : i32, i32
  }
  func.func @transform_7(%arg0: i32) -> (i32, i32) {
    %c0_i32 = arith.constant 0 : i32
    %c0_i32_0 = arith.constant 0 : i32
    %c0_i32_1 = arith.constant 0 : i32
    return %c0_i32, %c0_i32_0 : i32, i32
  }
}

module attributes {stable_mosaic.version = 11 : i64} {
  func.func @_point_mlp_pool_kernel(%arg0: i32, %arg1: i32, %arg2: memref<1x16x3xf32, #tpu.memory_space<vmem>>, %arg3: memref<1x3x64xf32, #tpu.memory_space<vmem>>, %arg4: memref<1x64xf32, #tpu.memory_space<vmem>>, %arg5: memref<64x128xbf16, #tpu.memory_space<vmem>>, %arg6: memref<1x128xf32, #tpu.memory_space<vmem>>, %arg7: memref<128x1024xbf16, #tpu.memory_space<vmem>>, %arg8: memref<1x1024xf32, #tpu.memory_space<vmem>>, %arg9: memref<1x1x1024xf32, #tpu.memory_space<vmem>>) attributes {dimension_semantics = [#tpu.dimension_semantics<parallel>, #tpu.dimension_semantics<arbitrary>], iteration_bounds = array<i64: 2, 1>, scalar_prefetch = 0 : i64, scratch_operands = 0 : i64, tpu.core_type = #tpu.core_type<tc>, window_params = [{transform_indices = @transform_0, window_bounds = array<i64: 1, 16, 3>}, {transform_indices = @transform_1, window_bounds = array<i64: 1, 3, 64>}, {pipeline_mode = #tpu.pipeline_mode<synchronous>, transform_indices = @transform_2, window_bounds = array<i64: 1, 64>}, {pipeline_mode = #tpu.pipeline_mode<synchronous>, transform_indices = @transform_3, window_bounds = array<i64: 64, 128>}, {pipeline_mode = #tpu.pipeline_mode<synchronous>, transform_indices = @transform_4, window_bounds = array<i64: 1, 128>}, {pipeline_mode = #tpu.pipeline_mode<synchronous>, transform_indices = @transform_5, window_bounds = array<i64: 128, 1024>}, {pipeline_mode = #tpu.pipeline_mode<synchronous>, transform_indices = @transform_6, window_bounds = array<i64: 1, 1024>}, {transform_indices = @transform_7, window_bounds = array<i64: 1, 1, 1024>}]} {
    %c0 = arith.constant 0 : index
    %c0_0 = arith.constant 0 : index
    %c0_1 = arith.constant 0 : index
    %0 = vector.load %arg2[%c0, %c0_0, %c0_1] : memref<1x16x3xf32, #tpu.memory_space<vmem>>, vector<1x16x3xf32>
    %1 = vector.shape_cast %0 : vector<1x16x3xf32> to vector<16x3xf32>
    %c0_2 = arith.constant 0 : index
    %c0_3 = arith.constant 0 : index
    %c0_4 = arith.constant 0 : index
    %2 = vector.load %arg3[%c0_2, %c0_3, %c0_4] : memref<1x3x64xf32, #tpu.memory_space<vmem>>, vector<1x3x64xf32>
    %3 = vector.shape_cast %2 : vector<1x3x64xf32> to vector<3x64xf32>
    %c0_5 = arith.constant 0 : index
    %c0_6 = arith.constant 0 : index
    %4 = vector.load %arg4[%c0_5, %c0_6] : memref<1x64xf32, #tpu.memory_space<vmem>>, vector<1x64xf32>
    %5 = vector.extract_strided_slice %1 {offsets = [0, 0], sizes = [16, 1], strides = [1, 1]} : vector<16x3xf32> to vector<16x1xf32>
    %6 = vector.extract_strided_slice %3 {offsets = [0, 0], sizes = [1, 64], strides = [1, 1]} : vector<3x64xf32> to vector<1x64xf32>
    %7 = vector.broadcast %5 : vector<16x1xf32> to vector<16x64xf32>
    %8 = vector.broadcast %6 : vector<1x64xf32> to vector<16x64xf32>
    %9 = arith.mulf %7, %8 : vector<16x64xf32>
    %10 = vector.broadcast %4 : vector<1x64xf32> to vector<16x64xf32>
    %11 = arith.addf %10, %9 : vector<16x64xf32>
    %12 = vector.extract_strided_slice %1 {offsets = [0, 1], sizes = [16, 1], strides = [1, 1]} : vector<16x3xf32> to vector<16x1xf32>
    %13 = vector.extract_strided_slice %3 {offsets = [1, 0], sizes = [1, 64], strides = [1, 1]} : vector<3x64xf32> to vector<1x64xf32>
    %14 = vector.broadcast %12 : vector<16x1xf32> to vector<16x64xf32>
    %15 = vector.broadcast %13 : vector<1x64xf32> to vector<16x64xf32>
    %16 = arith.mulf %14, %15 : vector<16x64xf32>
    %17 = arith.addf %11, %16 : vector<16x64xf32>
    %18 = vector.extract_strided_slice %1 {offsets = [0, 2], sizes = [16, 1], strides = [1, 1]} : vector<16x3xf32> to vector<16x1xf32>
    %19 = vector.extract_strided_slice %3 {offsets = [2, 0], sizes = [1, 64], strides = [1, 1]} : vector<3x64xf32> to vector<1x64xf32>
    %20 = vector.broadcast %18 : vector<16x1xf32> to vector<16x64xf32>
    %21 = vector.broadcast %19 : vector<1x64xf32> to vector<16x64xf32>
    %22 = arith.mulf %20, %21 : vector<16x64xf32>
    %23 = arith.addf %17, %22 : vector<16x64xf32>
    %cst = arith.constant 0.000000e+00 : f32
    %24 = vector.broadcast %cst : f32 to vector<16x64xf32>
    %25 = arith.maximumf %23, %24 : vector<16x64xf32>
    %26 = arith.truncf %25 : vector<16x64xf32> to vector<16x64xbf16>
    %c0_7 = arith.constant 0 : index
    %c0_8 = arith.constant 0 : index
    %27 = vector.load %arg5[%c0_7, %c0_8] : memref<64x128xbf16, #tpu.memory_space<vmem>>, vector<64x128xbf16>
    %cst_9 = arith.constant dense<0.000000e+00> : vector<16x128xf32>
    %28 = tpu.matmul %26, %27, %cst_9 {dimension_numbers = #tpu.dot_dimension_numbers<[1], [0], [0], [1], [0, 0, 1, 1], [], []>} : vector<16x64xbf16>, vector<64x128xbf16>, vector<16x128xf32> -> vector<16x128xf32>
    %c0_10 = arith.constant 0 : index
    %c0_11 = arith.constant 0 : index
    %29 = vector.load %arg6[%c0_10, %c0_11] : memref<1x128xf32, #tpu.memory_space<vmem>>, vector<1x128xf32>
    %30 = vector.broadcast %29 : vector<1x128xf32> to vector<16x128xf32>
    %31 = arith.addf %28, %30 : vector<16x128xf32>
    %cst_12 = arith.constant 0.000000e+00 : f32
    %32 = vector.broadcast %cst_12 : f32 to vector<16x128xf32>
    %33 = arith.maximumf %31, %32 : vector<16x128xf32>
    %34 = arith.truncf %33 : vector<16x128xf32> to vector<16x128xbf16>
    %c0_13 = arith.constant 0 : index
    %c0_14 = arith.constant 0 : index
    %35 = vector.load %arg7[%c0_13, %c0_14] : memref<128x1024xbf16, #tpu.memory_space<vmem>>, vector<128x1024xbf16>
    %cst_15 = arith.constant dense<0.000000e+00> : vector<16x1024xf32>
    %36 = tpu.matmul %34, %35, %cst_15 {dimension_numbers = #tpu.dot_dimension_numbers<[1], [0], [0], [1], [0, 0, 1, 1], [], []>} : vector<16x128xbf16>, vector<128x1024xbf16>, vector<16x1024xf32> -> vector<16x1024xf32>
    %c0_16 = arith.constant 0 : index
    %c0_17 = arith.constant 0 : index
    %37 = vector.load %arg8[%c0_16, %c0_17] : memref<1x1024xf32, #tpu.memory_space<vmem>>, vector<1x1024xf32>
    %38 = vector.broadcast %37 : vector<1x1024xf32> to vector<16x1024xf32>
    %39 = arith.addf %36, %38 : vector<16x1024xf32>
    %cst_18 = arith.constant dense<0xFF800000> : vector<1024xf32>
    %40 = vector.multi_reduction <maximumf>, %39, %cst_18 [0] : vector<16x1024xf32> to vector<1024xf32>
    %41 = vector.shape_cast %40 : vector<1024xf32> to vector<1x1x1024xf32>
    %c0_i32 = arith.constant 0 : i32
    %42 = arith.cmpi eq, %arg1, %c0_i32 : i32
    %43 = arith.extui %42 : i1 to i32
    %c0_i32_19 = arith.constant 0 : i32
    %44 = arith.cmpi ne, %43, %c0_i32_19 : i32
    scf.if %44 {
      %c0_22 = arith.constant 0 : index
      %c0_23 = arith.constant 0 : index
      %c0_24 = arith.constant 0 : index
      %48 = vector.load %arg9[%c0_22, %c0_23, %c0_24] : memref<1x1x1024xf32, #tpu.memory_space<vmem>>, vector<1x1x1024xf32>
      tpu.vector_store %arg9[%c0_22, %c0_23, %c0_24], %41 {strides = array<i32>} : memref<1x1x1024xf32, #tpu.memory_space<vmem>>, vector<1x1x1024xf32>,
    } else {
    }
    %c0_i32_20 = arith.constant 0 : i32
    %45 = arith.cmpi sgt, %arg1, %c0_i32_20 : i32
    %46 = arith.extui %45 : i1 to i32
    %c0_i32_21 = arith.constant 0 : i32
    %47 = arith.cmpi ne, %46, %c0_i32_21 : i32
    scf.if %47 {
      %c0_22 = arith.constant 0 : index
      %c0_23 = arith.constant 0 : index
      %c0_24 = arith.constant 0 : index
      %48 = vector.load %arg9[%c0_22, %c0_23, %c0_24] : memref<1x1x1024xf32, #tpu.memory_space<vmem>>, vector<1x1x1024xf32>
      %49 = arith.maximumf %48, %41 : vector<1x1x1024xf32>
      %c0_25 = arith.constant 0 : index
      %c0_26 = arith.constant 0 : index
      %c0_27 = arith.constant 0 : index
      %50 = vector.load %arg9[%c0_25, %c0_26, %c0_27] : memref<1x1x1024xf32, #tpu.memory_space<vmem>>, vector<1x1x1024xf32>
      tpu.vector_store %arg9[%c0_25, %c0_26, %c0_27], %49 {strides = array<i32>} : memref<1x1x1024xf32, #tpu.memory_space<vmem>>, vector<1x1x1024xf32>,
    } else {
    }
    return
  }
  func.func @transform_0(%arg0: i32, %arg1: i32) -> (i32, i32, i32) {
    %c0_i32 = arith.constant 0 : i32
    %c0_i32_0 = arith.constant 0 : i32
    return %arg0, %arg1, %c0_i32 : i32, i32, i32
  }
  func.func @transform_1(%arg0: i32, %arg1: i32) -> (i32, i32, i32) {
    %c0_i32 = arith.constant 0 : i32
    %c0_i32_0 = arith.constant 0 : i32
    %c0_i32_1 = arith.constant 0 : i32
    return %arg0, %c0_i32, %c0_i32_0 : i32, i32, i32
  }
  func.func @transform_2(%arg0: i32, %arg1: i32) -> (i32, i32) {
    %c0_i32 = arith.constant 0 : i32
    %c0_i32_0 = arith.constant 0 : i32
    %c0_i32_1 = arith.constant 0 : i32
    return %c0_i32, %c0_i32_0 : i32, i32
  }
  func.func @transform_3(%arg0: i32, %arg1: i32) -> (i32, i32) {
    %c0_i32 = arith.constant 0 : i32
    %c0_i32_0 = arith.constant 0 : i32
    %c0_i32_1 = arith.constant 0 : i32
    return %c0_i32, %c0_i32_0 : i32, i32
  }
  func.func @transform_4(%arg0: i32, %arg1: i32) -> (i32, i32) {
    %c0_i32 = arith.constant 0 : i32
    %c0_i32_0 = arith.constant 0 : i32
    %c0_i32_1 = arith.constant 0 : i32
    return %c0_i32, %c0_i32_0 : i32, i32
  }
  func.func @transform_5(%arg0: i32, %arg1: i32) -> (i32, i32) {
    %c0_i32 = arith.constant 0 : i32
    %c0_i32_0 = arith.constant 0 : i32
    %c0_i32_1 = arith.constant 0 : i32
    return %c0_i32, %c0_i32_0 : i32, i32
  }
  func.func @transform_6(%arg0: i32, %arg1: i32) -> (i32, i32) {
    %c0_i32 = arith.constant 0 : i32
    %c0_i32_0 = arith.constant 0 : i32
    %c0_i32_1 = arith.constant 0 : i32
    return %c0_i32, %c0_i32_0 : i32, i32
  }
  func.func @transform_7(%arg0: i32, %arg1: i32) -> (i32, i32, i32) {
    %c0_i32 = arith.constant 0 : i32
    %c0_i32_0 = arith.constant 0 : i32
    %c0_i32_1 = arith.constant 0 : i32
    return %arg0, %c0_i32, %c0_i32_0 : i32, i32, i32
  }
}

module attributes {stable_mosaic.version = 11 : i64} {
  func.func @_fc_head_kernel(%arg0: i32, %arg1: memref<2x1024xf32, #tpu.memory_space<vmem>>, %arg2: memref<1024x512xbf16, #tpu.memory_space<vmem>>, %arg3: memref<1x512xf32, #tpu.memory_space<vmem>>, %arg4: memref<512x256xbf16, #tpu.memory_space<vmem>>, %arg5: memref<1x256xf32, #tpu.memory_space<vmem>>, %arg6: memref<256x2xf32, #tpu.memory_space<vmem>>, %arg7: memref<1x2xf32, #tpu.memory_space<vmem>>, %arg8: memref<2x2xf32, #tpu.memory_space<vmem>>) attributes {dimension_semantics = [#tpu.dimension_semantics<arbitrary>], iteration_bounds = array<i64: 1>, scalar_prefetch = 0 : i64, scratch_operands = 0 : i64, tpu.core_type = #tpu.core_type<tc>, window_params = [{pipeline_mode = #tpu.pipeline_mode<synchronous>, transform_indices = @transform_0, window_bounds = array<i64: 2, 1024>}, {pipeline_mode = #tpu.pipeline_mode<synchronous>, transform_indices = @transform_1, window_bounds = array<i64: 1024, 512>}, {pipeline_mode = #tpu.pipeline_mode<synchronous>, transform_indices = @transform_2, window_bounds = array<i64: 1, 512>}, {pipeline_mode = #tpu.pipeline_mode<synchronous>, transform_indices = @transform_3, window_bounds = array<i64: 512, 256>}, {pipeline_mode = #tpu.pipeline_mode<synchronous>, transform_indices = @transform_4, window_bounds = array<i64: 1, 256>}, {pipeline_mode = #tpu.pipeline_mode<synchronous>, transform_indices = @transform_5, window_bounds = array<i64: 256, 2>}, {pipeline_mode = #tpu.pipeline_mode<synchronous>, transform_indices = @transform_6, window_bounds = array<i64: 1, 2>}, {pipeline_mode = #tpu.pipeline_mode<synchronous>, transform_indices = @transform_7, window_bounds = array<i64: 2, 2>}]} {
    %c0 = arith.constant 0 : index
    %c0_0 = arith.constant 0 : index
    %0 = vector.load %arg1[%c0, %c0_0] : memref<2x1024xf32, #tpu.memory_space<vmem>>, vector<2x1024xf32>
    %1 = arith.truncf %0 : vector<2x1024xf32> to vector<2x1024xbf16>
    %c0_1 = arith.constant 0 : index
    %c0_2 = arith.constant 0 : index
    %2 = vector.load %arg2[%c0_1, %c0_2] : memref<1024x512xbf16, #tpu.memory_space<vmem>>, vector<1024x512xbf16>
    %cst = arith.constant dense<0.000000e+00> : vector<2x512xf32>
    %3 = tpu.matmul %1, %2, %cst {dimension_numbers = #tpu.dot_dimension_numbers<[1], [0], [0], [1], [0, 0, 1, 1], [], []>} : vector<2x1024xbf16>, vector<1024x512xbf16>, vector<2x512xf32> -> vector<2x512xf32>
    %c0_3 = arith.constant 0 : index
    %c0_4 = arith.constant 0 : index
    %4 = vector.load %arg3[%c0_3, %c0_4] : memref<1x512xf32, #tpu.memory_space<vmem>>, vector<1x512xf32>
    %5 = vector.broadcast %4 : vector<1x512xf32> to vector<2x512xf32>
    %6 = arith.addf %3, %5 : vector<2x512xf32>
    %cst_5 = arith.constant 0.000000e+00 : f32
    %7 = vector.broadcast %cst_5 : f32 to vector<2x512xf32>
    %8 = arith.maximumf %6, %7 : vector<2x512xf32>
    %9 = arith.truncf %8 : vector<2x512xf32> to vector<2x512xbf16>
    %c0_6 = arith.constant 0 : index
    %c0_7 = arith.constant 0 : index
    %10 = vector.load %arg4[%c0_6, %c0_7] : memref<512x256xbf16, #tpu.memory_space<vmem>>, vector<512x256xbf16>
    %cst_8 = arith.constant dense<0.000000e+00> : vector<2x256xf32>
    %11 = tpu.matmul %9, %10, %cst_8 {dimension_numbers = #tpu.dot_dimension_numbers<[1], [0], [0], [1], [0, 0, 1, 1], [], []>} : vector<2x512xbf16>, vector<512x256xbf16>, vector<2x256xf32> -> vector<2x256xf32>
    %c0_9 = arith.constant 0 : index
    %c0_10 = arith.constant 0 : index
    %12 = vector.load %arg5[%c0_9, %c0_10] : memref<1x256xf32, #tpu.memory_space<vmem>>, vector<1x256xf32>
    %13 = vector.broadcast %12 : vector<1x256xf32> to vector<2x256xf32>
    %14 = arith.addf %11, %13 : vector<2x256xf32>
    %cst_11 = arith.constant 0.000000e+00 : f32
    %15 = vector.broadcast %cst_11 : f32 to vector<2x256xf32>
    %16 = arith.maximumf %14, %15 : vector<2x256xf32>
    %c0_12 = arith.constant 0 : index
    %c0_13 = arith.constant 0 : index
    %17 = vector.load %arg6[%c0_12, %c0_13] : memref<256x2xf32, #tpu.memory_space<vmem>>, vector<256x2xf32>
    %cst_14 = arith.constant dense<0.000000e+00> : vector<2x2xf32>
    %18 = tpu.matmul %16, %17, %cst_14 {dimension_numbers = #tpu.dot_dimension_numbers<[1], [0], [0], [1], [0, 0, 1, 1], [], []>} : vector<2x256xf32>, vector<256x2xf32>, vector<2x2xf32> -> vector<2x2xf32>
    %c0_15 = arith.constant 0 : index
    %c0_16 = arith.constant 0 : index
    %19 = vector.load %arg7[%c0_15, %c0_16] : memref<1x2xf32, #tpu.memory_space<vmem>>, vector<1x2xf32>
    %20 = vector.broadcast %19 : vector<1x2xf32> to vector<2x2xf32>
    %21 = arith.addf %18, %20 : vector<2x2xf32>
    %cst_17 = arith.constant dense<0xFF800000> : vector<2xf32>
    %22 = vector.multi_reduction <maximumf>, %21, %cst_17 [1] : vector<2x2xf32> to vector<2xf32>
    %23 = vector.shape_cast %22 : vector<2xf32> to vector<2x1xf32>
    %24 = vector.broadcast %23 : vector<2x1xf32> to vector<2x2xf32>
    %25 = arith.subf %21, %24 : vector<2x2xf32>
    %26 = math.exp %25 : vector<2x2xf32>
    %cst_18 = arith.constant dense<0.000000e+00> : vector<2xf32>
    %27 = vector.multi_reduction <add>, %26, %cst_18 [1] : vector<2x2xf32> to vector<2xf32>
    %28 = vector.shape_cast %27 : vector<2xf32> to vector<2x1xf32>
    %29 = math.log %28 : vector<2x1xf32>
    %30 = vector.broadcast %29 : vector<2x1xf32> to vector<2x2xf32>
    %31 = arith.subf %25, %30 : vector<2x2xf32>
    %c0_19 = arith.constant 0 : index
    %c0_20 = arith.constant 0 : index
    %32 = vector.load %arg8[%c0_19, %c0_20] : memref<2x2xf32, #tpu.memory_space<vmem>>, vector<2x2xf32>
    tpu.vector_store %arg8[%c0_19, %c0_20], %31 {strides = array<i32>} : memref<2x2xf32, #tpu.memory_space<vmem>>, vector<2x2xf32>,
    return
  }
  func.func @transform_0(%arg0: i32) -> (i32, i32) {
    %c0_i32 = arith.constant 0 : i32
    %c0_i32_0 = arith.constant 0 : i32
    %c0_i32_1 = arith.constant 0 : i32
    return %c0_i32, %c0_i32_0 : i32, i32
  }
  func.func @transform_1(%arg0: i32) -> (i32, i32) {
    %c0_i32 = arith.constant 0 : i32
    %c0_i32_0 = arith.constant 0 : i32
    %c0_i32_1 = arith.constant 0 : i32
    return %c0_i32, %c0_i32_0 : i32, i32
  }
  func.func @transform_2(%arg0: i32) -> (i32, i32) {
    %c0_i32 = arith.constant 0 : i32
    %c0_i32_0 = arith.constant 0 : i32
    %c0_i32_1 = arith.constant 0 : i32
    return %c0_i32, %c0_i32_0 : i32, i32
  }
  func.func @transform_3(%arg0: i32) -> (i32, i32) {
    %c0_i32 = arith.constant 0 : i32
    %c0_i32_0 = arith.constant 0 : i32
    %c0_i32_1 = arith.constant 0 : i32
    return %c0_i32, %c0_i32_0 : i32, i32
  }
  func.func @transform_4(%arg0: i32) -> (i32, i32) {
    %c0_i32 = arith.constant 0 : i32
    %c0_i32_0 = arith.constant 0 : i32
    %c0_i32_1 = arith.constant 0 : i32
    return %c0_i32, %c0_i32_0 : i32, i32
  }
  func.func @transform_5(%arg0: i32) -> (i32, i32) {
    %c0_i32 = arith.constant 0 : i32
    %c0_i32_0 = arith.constant 0 : i32
    %c0_i32_1 = arith.constant 0 : i32
    return %c0_i32, %c0_i32_0 : i32, i32
  }
  func.func @transform_6(%arg0: i32) -> (i32, i32) {
    %c0_i32 = arith.constant 0 : i32
    %c0_i32_0 = arith.constant 0 : i32
    %c0_i32_1 = arith.constant 0 : i32
    return %c0_i32, %c0_i32_0 : i32, i32
  }
  func.func @transform_7(%arg0: i32) -> (i32, i32) {
    %c0_i32 = arith.constant 0 : i32
    %c0_i32_0 = arith.constant 0 : i32
    %c0_i32_1 = arith.constant 0 : i32
    return %c0_i32, %c0_i32_0 : i32, i32
  }
}

</mosaic_0001>

<bundles_post_ra>
// kernel: pointnet_cls_forward.4
= control target key start
LH: loop header
LB: loop body
LE: loop exit
PB: predicated region body
PF: predicated region fallthrough
CT: control target
= control target key end

     0   :  { %12 = vsyncpa [#allocation3], 0  ;;  %s1604_s24 = smov 0   ;;  %s1606_s25 = smov 0   ;;  %s1736_s0 = inlined_call_operand.vmem [shape: f32[2,16,3], index: 0, kind: input, shape index: {}]   ;;  %s1737_s1 = inlined_call_operand.vmem [shape: f32[1,3,64], index: 1, kind: input, shape index: {}]   ;;  %s1738_s2 = inlined_call_operand.vmem [shape: f32[1,64], index: 2, kind: input, shape index: {}]   ;;  %s1739_s3 = inlined_call_operand.vmem [shape: bf16[64,128], index: 3, kind: input, shape index: {}]   ;;  %s1740_s4 = inlined_call_operand.vmem [shape: f32[1,128], index: 4, kind: input, shape index: {}]   ;;  %s1741_s5 = inlined_call_operand.hbm [shape: bf16[128,1024], index: 5, kind: input, shape index: {}]   ;;  %s1742_s6 = inlined_call_operand.vmem [shape: f32[1,1024], index: 6, kind: input, shape index: {}]   ;;  %s1743_s7 = inlined_call_operand.vmem [shape: f32[2,1,1024], index: 7, kind: output, shape index: {}]  }
   0x1   :  { %s1608_s26 = smov 0  }
   0x2 LB: > { %s1349_s27 = sadd.s32 4294967295, %s1553_s26   ;;  %s30_s28 = sadd.s32 1, %s1549_s25  ;;  %s1553_s26 = sphi %s1608_s26, %s18_s26   ;;  %s1549_s25 = sphi %s1606_s25, %s1747_s25   ;;  %s1545_s24 = sphi %s1604_s24, %s1746_s24  }
   0x3   : > { %p32_p0 = scmp.ge.s32.totalorder %s30_s28, 2  ;;  %p1351_p1 = scmp.ge.s32.totalorder %s1553_s26, 1 }
   0x4   : > { %p215_p2 = scmp.lt.s32.totalorder %s1553_s26, 3  ;;  %p1629_p4 = scmp.eq.s32.totalorder %s1349_s27, 0 }
   0x5   : > { %s1749_s28 = smov (%p32_p0, %s30_s28), 0  ;;  %s1555_s8 = smov [#allocation2]  }
   0x6   : > { %p1625_p3 = pnand %p1351_p1, %p215_p2  ;;  %s239_s9 = sshll.u32 %s1555_s8, 4  ;;  %s240_s9 = int_to_ptr.vmem [resolvable:$true] %s239_s9 }
   0x7   : > { %s1512_s10 = scalar_lea.vmem %s240_s9, 8192  ;;  %p1520_p11 = scmp.lt.s32.totalorder %s240_s9, %s240_s9 }
   0x8   : > { %p1454_p5 = pneg %p1625_p3  ;;  %p1513_p8 = scmp.ne.s32.totalorder %s240_s9, %s1512_s10 }
   0x9   : > { %p1521_p12 = scmp.lt.s32.totalorder %s1512_s10, %s1512_s10 }
   0xa   : > { %p1455_p6 = pnand %p1629_p4, %p1454_p5 }
   0xb   : > { %p1522_p13 = por %p1521_p12, %p1520_p11 }
   0xc   : > { %p1503_p7 = pneg %p1455_p6 }
   0xe   : > { %p1515_p9 = pnand %p1513_p8, %p1503_p7 }
  0x10   : > { %p1516_p10 = pneg %p1515_p9 }
  0x12   : > { %p1523_p0 = pnand %p1522_p13, %p1516_p10 }
  0x14   : > { %1526 = shalt.err (!%p1523_p0)
}
  0x15   : > { %s1556_s11 = smov 512   ;;  %s1557_s12 = smov 32  }
  0x16   : > { %1457 = dma.hbm_to_vmem [thread:$0]  (!%p1455_p6), %s1741_s5, 8192, %s240_s9, [#allocation3], %s1556_s11, %s1556_s11, %s1557_s12  }
  0x17   : > { %271 = sbr.rel (%p1625_p3) target bundleno = 639 (0x27f), region = 48 }
  0x1c   : > { %1540 = dma.done.wait (%p1629_p4), [#allocation3], 8192  }
  0x1d   : > { %1542 = vsyncadd (%p1629_p4), [#allocation3], 4294959104  ;;  %p307_p1 = scmp.lt.s32.totalorder %s1545_s24, 1  ;;  %v1558_v0 = vmov 1   ;;  %v1559_v1 = vmov 0   ;;  %v1560_v2 = vmov 0.0   ;;  %v335_v38 = vlaneseq }
  0x1e   : > { %1494 = vset.pattern.permute.xlu1 %v1558_v0  ;;  %1493 = vset.pattern.permute.xlu0 %v1559_v1  ;;  %v1497_v5 = vld [vmem:[%s1739_s3 + $0x18] sm:$0xff]   ;;  %v1498_v6 = vld [vmem:[%s1739_s3 + $0x10] sm:$0xff]   ;;  %v1499_v7 = vld [vmem:[%s1739_s3 + $0x8] sm:$0xff]   ;;  %v1561_v8 = vmov 2   ;;  %vm1562_vm0 = vmmov 0   ;;  %vm423_vm1 = vcmask 523264  }
  0x1f   : > { %s1751_s24 = smov (!%p307_p1, %s1545_s24), 1  ;;  %929 = vmatprep.mubr.bf16.mxu1 %v1559_v1  ;;  %1438 = vmatprep.subr.bf16.mxu0 %v1560_v2  ;;  %v1500_v9 = vld [vmem:[%s1739_s3] sm:$0xff]   ;;  %v1668_v12 = vld [vmem:[#allocation2 + $0x1c8] sm:$0xff]  ;;  %v1676_v39 = vshrl.u32 %v335_v38, 7 }
  0x20   : > { %s1432_s15 = sshll.u32 %s1751_s24, 4  ;;  %1439 = vmatpush3.bf16.msra.mxu0 %v1497_v5  ;;  %1446 = vmatprep.mubr.msk.bf16.mxu0 %vm1562_vm0, %v1560_v2  ;;  %v527_v10 = vld [vmem:[#allocation2 + $0x1c0] sm:$0xff]  ;;  %v1670_v14 = vld [vmem:[#allocation2 + $0x1e8] sm:$0xff]  ;;  %s1358_s16 = sshll.u32 %s1751_s24, 3 }
  0x21   : > { %s314_s18 = scalar_lea.vmem %s1736_s0, %s1432_s15  ;;  %1440 = vmatprep.subr.bf16.mxu0 %v1560_v2  ;;  %v531_v11 = vld [vmem:[#allocation2 + $0x1e0] sm:$0xff]  ;;  %v1424_v18 = vcombine.low %v1668_v12, %v1670_v14  ;;  %v1425_v19 = vcombine.high %v1668_v12, %v1670_v14  ;;  %v337_v40 = vsub.s32 0, %v1676_v39  ;;  %v359_v43 = vsub.s32 1, %v1676_v39  ;;  %v492_v12 = vld [vmem:[#allocation2 + $0xa8] sm:$0xff]  ;;  %s319_s19 = scalar_lea.vmem %s1743_s7, %s1358_s16 }
  0x22   : > { %v321_v3 = vld [vmem:[%s314_s18] sm:$0xff]  ;;  %v322_v4 = vld [vmem:[%s314_s18 + $0x8] sm:$0xff]  ;;  %v1423_v13 = vcombine.high %v527_v10, %v531_v11  ;;  %v1422_v15 = vcombine.low %v527_v10, %v531_v11  ;;  %v375_v47 = vsub.s32 2, %v1676_v39 }
  0x23   : > { %350 = vperm.xlu1 %1494, %v321_v3   ;;  %327 = vperm.xlu0 %1493, %v321_v3   ;;  %v519_v16 = vld [vmem:[#allocation2 + $0x180] sm:$0xff]  ;;  %v516_v10 = vld [vmem:[#allocation2 + $0x168] sm:$0xff] }
  0x24   : > { %1441 = vmatpush3.bf16.msra.mxu0 %v1498_v6  ;;  %v523_v17 = vld [vmem:[#allocation2 + $0x1a0] sm:$0xff]  ;;  %897 = vmatprep.subr.bf16.mxu1 %v1423_v13  ;;  %v476_v38 = vld [vmem:[#allocation2 + $0x28] sm:$0xff] }
  0x25   : > { %1442 = vmatprep.subr.bf16.mxu0 %v1560_v2  ;;  %v1415_v20 = vcombine.high %v519_v16, %v523_v17  ;;  %898 = vmatpush1.bf16.msra.mxu1 %v1422_v15  ;;  %v1414_v21 = vcombine.low %v519_v16, %v523_v17  ;;  %v511_v22 = vld [vmem:[#allocation2 + $0x140] sm:$0xff]  ;;  %v504_v15 = vld [vmem:[#allocation2 + $0x108] sm:$0xff] }
  0x26   : > { %v515_v23 = vld [vmem:[#allocation2 + $0x160] sm:$0xff]  ;;  %v508_v16 = vld [vmem:[#allocation2 + $0x128] sm:$0xff] }
  0x27   : > { %354 = vperm.xlu1 %1494, %v322_v4   ;;  %332 = vperm.xlu0 %1493, %v322_v4   ;;  %v1407_v24 = vcombine.high %v511_v22, %v515_v23  ;;  %v1406_v25 = vcombine.low %v511_v22, %v515_v23  ;;  %v503_v26 = vld [vmem:[#allocation2 + $0x100] sm:$0xff]  ;;  %v1400_v22 = vcombine.low %v504_v15, %v508_v16 }
  0x28   : > { %1443 = vmatpush3.bf16.msra.mxu0 %v1499_v7  ;;  %899 = vmatprep.subr.bf16.mxu1 %v1415_v20  ;;  %v507_v27 = vld [vmem:[#allocation2 + $0x120] sm:$0xff]  ;;  %v496_v20 = vld [vmem:[#allocation2 + $0xc8] sm:$0xff] }
  0x29   : > { %1444 = vmatprep.subr.bf16.mxu0 %v1560_v2  ;;  %900 = vmatpush1.bf16.msra.mxu1 %v1414_v21  ;;  %v1399_v28 = vcombine.high %v503_v26, %v507_v27  ;;  %v1398_v29 = vcombine.low %v503_v26, %v507_v27  ;;  %v495_v30 = vld [vmem:[#allocation2 + $0xc0] sm:$0xff]  ;;  %v500_v21 = vld [vmem:[#allocation2 + $0xe8] sm:$0xff] }
  0x2a   : > { %901 = vmatprep.subr.bf16.mxu1 %v1407_v24  ;;  %v499_v31 = vld [vmem:[#allocation2 + $0xe0] sm:$0xff]  ;;  %v1393_v23 = vcombine.high %v496_v20, %v500_v21  ;;  %v488_v24 = vld [vmem:[#allocation2 + $0x88] sm:$0xff]  ;;  %v1392_v14 = vcombine.low %v496_v20, %v500_v21  ;;  %v506_v20 = vld [vmem:[#allocation2 + $0x118] sm:$0xff] }
  0x2b   : > { %1496 = vset.pattern.permute.xlu1 %v1561_v8  ;;  %1495 = vset.pattern.permute.xlu0 %v1561_v8  ;;  %v1391_v32 = vcombine.high %v495_v30, %v499_v31  ;;  %v1390_v33 = vcombine.low %v495_v30, %v499_v31  ;;  %v487_v34 = vld [vmem:[#allocation2 + $0x80] sm:$0xff]  ;;  %v484_v30 = vld [vmem:[#allocation2 + $0x68] sm:$0xff]  ;;  %v510_v21 = vld [vmem:[#allocation2 + $0x138] sm:$0xff] }
  0x2c   : > { %370 = vperm.xlu1 %1496, %v322_v4   ;;  %366 = vperm.xlu0 %1495, %v321_v3   ;;  %v491_v35 = vld [vmem:[#allocation2 + $0xa0] sm:$0xff]  ;;  %v520_v3 = vld [vmem:[#allocation2 + $0x188] sm:$0xff] }
  0x2d   : > { %1445 = vmatpush3.bf16.msra.mxu0 %v1500_v9  ;;  %902 = vmatpush1.bf16.msra.mxu1 %v1406_v25  ;;  %v1383_v36 = vcombine.high %v487_v34, %v491_v35  ;;  %v1382_v37 = vcombine.low %v487_v34, %v491_v35  ;;  %v323_v41 = vld [vmem:[%s1737_s1] sm:$0x7]  ;;  %v524_v4 = vld [vmem:[#allocation2 + $0x1a8] sm:$0xff]  ;;  %v1384_v25 = vcombine.low %v488_v24, %v492_v12 }
  0x2e   : > { %940 = vmatprep.subr.bf16.mxu0 %v1425_v19  ;;  %903 = vmatprep.subr.bf16.mxu1 %v1399_v28  ;;  %v338_v42 = vrot.slane %v323_v41, %v337_v40  ;;  %v1359_v48 = vld [vmem:[%s1738_s2] ss:$0 sm:$0xff]  ;;  %v360_v49 = vrot.slane %v323_v41, %v359_v43  ;;  %v376_v54 = vrot.slane %v323_v41, %v375_v47  ;;  %v512_v9 = vld [vmem:[#allocation2 + $0x148] sm:$0xff] }
  0x2f   : > { %v1417_v8 = vcombine.high %v520_v3, %v524_v4  ;;  %v1416_v11 = vcombine.low %v520_v3, %v524_v4  ;;  %v1409_v13 = vcombine.high %v512_v9, %v516_v10  ;;  %v1408_v17 = vcombine.low %v512_v9, %v516_v10  ;;  %v479_v26 = vld [vmem:[#allocation2 + $0x40] sm:$0xff]  ;;  %v480_v28 = vld [vmem:[#allocation2 + $0x48] sm:$0xff]  ;;  %v514_v9 = vld [vmem:[#allocation2 + $0x158] sm:$0xff] }
  0x30   : > { %v1401_v19 = vcombine.high %v504_v15, %v508_v16  ;;  %v483_v27 = vld [vmem:[#allocation2 + $0x60] sm:$0xff]  ;;  %v1376_v31 = vcombine.low %v480_v28, %v484_v30  ;;  %v518_v10 = vld [vmem:[#allocation2 + $0x178] sm:$0xff] }
  0x31   : > { %904 = vmatpush1.bf16.msra.mxu1 %v1398_v29  ;;  %v1375_v29 = vcombine.high %v479_v26, %v483_v27  ;;  %v471_v34 = vld [vmem:[#allocation2] sm:$0xff]  ;;  %v1413_v16 = vcombine.high %v514_v9, %v518_v10 }
  0x32   : > { %905 = vmatprep.subr.bf16.mxu1 %v1391_v32  ;;  %v1377_v32 = vcombine.high %v480_v28, %v484_v30  ;;  %v475_v35 = vld [vmem:[#allocation2 + $0x20] sm:$0xff]  ;;  %v1404_v28 = vcombine.low %v506_v20, %v510_v21  ;;  %v489_v30 = vld [vmem:[#allocation2 + $0x90] sm:$0xff] }
  0x35   : > { %906 = vmatpush1.bf16.msra.mxu1 %v1390_v33  ;;  %v1374_v33 = vcombine.low %v479_v26, %v483_v27  ;;  %v502_v26 = vld [vmem:[#allocation2 + $0xf8] sm:$0xff] }
  0x36   : > { %907 = vmatprep.subr.bf16.mxu1 %v1383_v36  ;;  %v472_v36 = vld [vmem:[#allocation2 + $0x8] sm:$0xff] }
  0x37   : > { %v1368_v41 = vcombine.low %v472_v36, %v476_v38 }
  0x39   : > { %908 = vmatpush1.bf16.msra.mxu1 %v1382_v37  ;;  %v1367_v37 = vcombine.high %v471_v34, %v475_v35 }
  0x3a   : > { %909 = vmatprep.subr.bf16.mxu1 %v1375_v29 }
  0x3d   : > { %910 = vmatpush1.bf16.msra.mxu1 %v1374_v33  ;;  %v494_v33 = vld [vmem:[#allocation2 + $0xb8] sm:$0xff] }
  0x3e   : > { %911 = vmatprep.subr.bf16.mxu1 %v1367_v37 }
  0x9e   : > { %v351_v44 = vpop.permute.xlu1 %350  ;;  %v328_v45 = vpop.permute.xlu0 %327 }
  0x9f   : > { %v339_v46 = vmul.f32 %v338_v42, %v328_v45  ;;  %v361_v57 = vmul.f32 %v360_v49, %v351_v44  ;;  %v1366_v44 = vcombine.low %v471_v34, %v475_v35  ;;  %v529_v45 = vld [vmem:[#allocation2 + $0x1d0] sm:$0xff] }
  0xa1   : > { %v347_v53 = vadd.f32 %v1359_v48, %v339_v46  ;;  %912 = vmatpush1.bf16.msra.mxu1 %v1366_v44  ;;  %v533_v46 = vld [vmem:[#allocation2 + $0x1f0] sm:$0xff]  ;;  %v486_v44 = vld [vmem:[#allocation2 + $0x78] sm:$0xff] }
  0xa2   : > { %v355_v50 = vpop.permute.xlu1 %354  ;;  %v333_v51 = vpop.permute.xlu0 %332 }
  0xa3   : > { %v340_v52 = vmul.f32 %v338_v42, %v333_v51  ;;  %v362_v55 = vmul.f32 %v360_v49, %v355_v50  ;;  %v363_v62 = vadd.f32 %v361_v57, %v347_v53  ;;  %v1369_v42 = vcombine.high %v472_v36, %v476_v38  ;;  %v534_v50 = vld [vmem:[#allocation2 + $0x1f8] sm:$0xff]  ;;  %v481_v38 = vld [vmem:[#allocation2 + $0x50] sm:$0xff] }
  0xa4   : > { %v1427_v49 = vcombine.high %v529_v45, %v533_v46  ;;  %v1426_v51 = vcombine.low %v529_v45, %v533_v46 }
  0xa5   : > { %v348_v56 = vadd.f32 %v1359_v48, %v340_v52  ;;  %v530_v48 = vld [vmem:[#allocation2 + $0x1d8] sm:$0xff] }
  0xa6   : > { %v1428_v52 = vcombine.low %v530_v48, %v534_v50  ;;  %v1429_v53 = vcombine.high %v530_v48, %v534_v50  ;;  %983 = vmatprep.subr.bf16.mxu1 %v1427_v49  ;;  %v473_v50 = vld [vmem:[#allocation2 + $0x10] sm:$0xff] }
  0xa7   : > { %v371_v58 = vpop.permute.xlu1 %370  ;;  %v364_v59 = vadd.f32 %v362_v55, %v348_v56  ;;  %v367_v60 = vpop.permute.xlu0 %366 }
  0xa8   : > { %v378_v61 = vmul.f32 %v376_v54, %v371_v58  ;;  %v377_v63 = vmul.f32 %v376_v54, %v367_v60  ;;  %v1360_v54 = vld [vmem:[%s1740_s4] ss:$0 sm:$0xff]  ;;  %v521_v60 = vld [vmem:[#allocation2 + $0x190] sm:$0xff] }
  0xaa   : > { %v380_v0 = vadd.f32 %v378_v61, %v364_v59  ;;  %v379_v2 = vadd.f32 %v377_v63, %v363_v62  ;;  %v525_v62 = vld [vmem:[#allocation2 + $0x1b0] sm:$0xff]  ;;  %v522_v63 = vld [vmem:[#allocation2 + $0x198] sm:$0xff] }
  0xac   : > { %v382_v5 = vmax.f32 %v380_v0, 0.0  ;;  %v381_v6 = vmax.f32 %v379_v2, 0.0  ;;  %v526_v0 = vld [vmem:[#allocation2 + $0x1b8] sm:$0xff] }
  0xae   : > { %v383_v7 = vpack.c.bf16 %v382_v5, %v381_v6  ;;  %v1419_v5 = vcombine.high %v521_v60, %v525_v62  ;;  %v1421_v6 = vcombine.high %v522_v63, %v526_v0 }
  0xb0   : > { %1447 = vmatmul.mubr.msk.bf16.vlgmr.msra.gmra.mxu0 %vm423_vm1, %v383_v7  ;;  %v513_v7 = vld [vmem:[#allocation2 + $0x150] sm:$0xff] }
  0xb1   : > { %941 = vmatpush1.bf16.msra.mxu0 %v1424_v18  ;;  %972 = vmatprep.mubr.bf16.mxu0 %v1559_v1  ;;  %v1385_v18 = vcombine.high %v488_v24, %v492_v12  ;;  %v1405_v12 = vcombine.high %v506_v20, %v510_v21 }
  0xb2   : > { %942 = vmatprep.subr.bf16.mxu0 %v1417_v8  ;;  %v517_v8 = vld [vmem:[#allocation2 + $0x170] sm:$0xff] }
  0xb3   : > { %v1411_v15 = vcombine.high %v513_v7, %v517_v8 }
  0xb5   : > { %943 = vmatpush1.bf16.msra.mxu0 %v1416_v11  ;;  %v1418_v11 = vcombine.low %v521_v60, %v525_v62 }
  0xb6   : > { %944 = vmatprep.subr.bf16.mxu0 %v1409_v13  ;;  %v1420_v13 = vcombine.low %v522_v63, %v526_v0 }
  0xb9   : > { %945 = vmatpush1.bf16.msra.mxu0 %v1408_v17  ;;  %v505_v17 = vld [vmem:[#allocation2 + $0x110] sm:$0xff] }
  0xba   : > { %946 = vmatprep.subr.bf16.mxu0 %v1401_v19  ;;  %v509_v19 = vld [vmem:[#allocation2 + $0x130] sm:$0xff] }
  0xbb   : > { %v1403_v24 = vcombine.high %v505_v17, %v509_v19  ;;  %v1402_v27 = vcombine.low %v505_v17, %v509_v19 }
  0xbd   : > { %947 = vmatpush1.bf16.msra.mxu0 %v1400_v22  ;;  %v1410_v22 = vcombine.low %v513_v7, %v517_v8 }
  0xbe   : > { %948 = vmatprep.subr.bf16.mxu0 %v1393_v23  ;;  %v1412_v23 = vcombine.low %v514_v9, %v518_v10 }
  0xc1   : > { %949 = vmatpush1.bf16.msra.mxu0 %v1392_v14  ;;  %v497_v14 = vld [vmem:[#allocation2 + $0xd0] sm:$0xff] }
  0xc2   : > { %950 = vmatprep.subr.bf16.mxu0 %v1385_v18  ;;  %v501_v18 = vld [vmem:[#allocation2 + $0xf0] sm:$0xff] }
  0xc3   : > { %v1395_v29 = vcombine.high %v497_v14, %v501_v18  ;;  %v1394_v34 = vcombine.low %v497_v14, %v501_v18 }
  0xc5   : > { %951 = vmatpush1.bf16.msra.mxu0 %v1384_v25  ;;  %v498_v25 = vld [vmem:[#allocation2 + $0xd8] sm:$0xff] }
  0xc6   : > { %952 = vmatprep.subr.bf16.mxu0 %v1377_v32  ;;  %v490_v32 = vld [vmem:[#allocation2 + $0x98] sm:$0xff]  ;;  %v1396_v35 = vcombine.low %v498_v25, %v502_v26 }
  0xc7   : > { %v1389_v37 = vcombine.high %v490_v32, %v494_v33  ;;  %v1388_v46 = vcombine.low %v490_v32, %v494_v33  ;;  %v559_v33 = vsub.s32 5, %v1676_v39 }
  0xc9   : > { %953 = vmatpush1.bf16.msra.mxu0 %v1376_v31  ;;  %v493_v31 = vld [vmem:[#allocation2 + $0xb0] sm:$0xff] }
  0xca   : > { %954 = vmatprep.subr.bf16.mxu0 %v1369_v42  ;;  %v1387_v36 = vcombine.high %v489_v30, %v493_v31  ;;  %v482_v42 = vld [vmem:[#allocation2 + $0x58] sm:$0xff]  ;;  %v1386_v45 = vcombine.low %v489_v30, %v493_v31  ;;  %v563_v30 = vsub.s32 6, %v1676_v39 }
  0xcb   : > { %v1381_v49 = vcombine.high %v482_v42, %v486_v44 }
  0xcd   : > { %955 = vmatpush1.bf16.msra.mxu0 %v1368_v41  ;;  %v485_v41 = vld [vmem:[#allocation2 + $0x70] sm:$0xff] }
  0xce   : > { %1026 = vmatprep.subr.bf16.mxu0 %v1429_v53  ;;  %v1379_v48 = vcombine.high %v481_v38, %v485_v41  ;;  %v478_v53 = vld [vmem:[#allocation2 + $0x38] sm:$0xff] }
 0x170   : > { %v461_v55 = vpop.f32.mrf.mxu0 }
 0x171   : > { %v462_v57 = vadd.f32 %v1360_v54, %v461_v55  ;;  %v1380_v55 = vcombine.low %v482_v42, %v486_v44 }
 0x172   : > { %v1448_v56 = vpop.f32.mrf.mxu0 }
 0x173   : > { %v468_v2 = vmax.f32 %v462_v57, 0.0 }
 0x174   : > { %v464_v58 = vpop.f32.mrf.mxu0 }
 0x175   : > { %v465_v59 = vadd.f32 %v1360_v54, %v464_v58  ;;  %v1378_v54 = vcombine.low %v481_v38, %v485_v41 }
 0x176   : > { %v1449_v61 = vpop.f32.mrf.mxu0 }
 0x177   : > { %v469_v3 = vmax.f32 %v465_v59, 0.0 }
 0x179   : > { %v1700_v4 = vpack.c.bf16 %v469_v3, %v468_v2  ;;  %v551_v3 = vsub.s32 3, %v1676_v39 }
 0x17b   : > { %930 = vmatmul.mubr.bf16.vlgmr.msra.gmra.mxu1 %v1700_v4  ;;  %973 = vmatmul.mubr.bf16.vlgmr.msra.gmra.mxu0 %v1700_v4 }
 0x17c   : > { %984 = vmatpush1.bf16.msra.mxu1 %v1426_v51  ;;  %1027 = vmatpush1.bf16.msra.mxu0 %v1428_v52  ;;  %v477_v51 = vld [vmem:[#allocation2 + $0x30] sm:$0xff]  ;;  %v474_v52 = vld [vmem:[#allocation2 + $0x18] sm:$0xff] }
 0x17d   : > { %985 = vmatprep.subr.bf16.mxu1 %v1419_v5  ;;  %1028 = vmatprep.subr.bf16.mxu0 %v1421_v6  ;;  %v1371_v56 = vcombine.high %v473_v50, %v477_v51  ;;  %v1373_v57 = vcombine.high %v474_v52, %v478_v53  ;;  %v1370_v58 = vcombine.low %v473_v50, %v477_v51  ;;  %v535_v5 = vld [vmem:[%s1742_s6] sm:$0xff] }
 0x17e   : > { %1015 = vmatprep.mubr.bf16.mxu1 %v1559_v1  ;;  %1058 = vmatprep.mubr.bf16.mxu0 %v1559_v1  ;;  %v1397_v1 = vcombine.high %v498_v25, %v502_v26  ;;  %v1372_v59 = vcombine.low %v474_v52, %v478_v53  ;;  %v544_v8 = vrot.slane %v535_v5, %v359_v43 }
 0x17f   : > { %v552_v9 = vrot.slane %v535_v5, %v551_v3  ;;  %v548_v10 = vrot.slane %v535_v5, %v375_v47  ;;  %v564_v38 = vrot.slane %v535_v5, %v563_v30 }
 0x180   : > { %986 = vmatpush1.bf16.msra.mxu1 %v1418_v11  ;;  %1029 = vmatpush1.bf16.msra.mxu0 %v1420_v13 }
 0x181   : > { %987 = vmatprep.subr.bf16.mxu1 %v1411_v15  ;;  %1030 = vmatprep.subr.bf16.mxu0 %v1413_v16 }
 0x184   : > { %988 = vmatpush1.bf16.msra.mxu1 %v1410_v22  ;;  %1031 = vmatpush1.bf16.msra.mxu0 %v1412_v23 }
 0x185   : > { %989 = vmatprep.subr.bf16.mxu1 %v1403_v24  ;;  %1032 = vmatprep.subr.bf16.mxu0 %v1405_v12 }
 0x188   : > { %990 = vmatpush1.bf16.msra.mxu1 %v1402_v27  ;;  %1033 = vmatpush1.bf16.msra.mxu0 %v1404_v28 }
 0x189   : > { %991 = vmatprep.subr.bf16.mxu1 %v1395_v29  ;;  %1034 = vmatprep.subr.bf16.mxu0 %v1397_v1  ;;  %v555_v1 = vsub.s32 4, %v1676_v39 }
 0x18c   : > { %992 = vmatpush1.bf16.msra.mxu1 %v1394_v34  ;;  %1035 = vmatpush1.bf16.msra.mxu0 %v1396_v35  ;;  %v567_v34 = vsub.s32 7, %v1676_v39 }
 0x18d   : > { %993 = vmatprep.subr.bf16.mxu1 %v1387_v36  ;;  %1036 = vmatprep.subr.bf16.mxu0 %v1389_v37  ;;  %v556_v37 = vrot.slane %v535_v5, %v555_v1 }
 0x190   : > { %994 = vmatpush1.bf16.msra.mxu1 %v1386_v45  ;;  %1037 = vmatpush1.bf16.msra.mxu0 %v1388_v46  ;;  %v560_v46 = vrot.slane %v535_v5, %v559_v33 }
 0x191   : > { %995 = vmatprep.subr.bf16.mxu1 %v1379_v48  ;;  %1038 = vmatprep.subr.bf16.mxu0 %v1381_v49  ;;  %v568_v48 = vrot.slane %v535_v5, %v567_v34 }
 0x194   : > { %996 = vmatpush1.bf16.msra.mxu1 %v1378_v54  ;;  %1039 = vmatpush1.bf16.msra.mxu0 %v1380_v55 }
 0x195   : > { %997 = vmatprep.subr.bf16.mxu1 %v1371_v56  ;;  %1040 = vmatprep.subr.bf16.mxu0 %v1373_v57 }
 0x198   : > { %998 = vmatpush1.bf16.msra.mxu1 %v1370_v58  ;;  %1041 = vmatpush1.bf16.msra.mxu0 %v1372_v59 }
 0x19b   : > { %1016 = vmatmul.mubr.bf16.vlgmr.msra.gmra.mxu1 %v1700_v4  ;;  %1059 = vmatmul.mubr.bf16.vlgmr.msra.gmra.mxu0 %v1700_v4  ;;  %v540_v4 = vrot.slane %v535_v5, %v337_v40 }
 0x23b   : > { %v931_v60 = vpop.f32.mrf.mxu1  ;;  %v974_v61 = vpop.f32.mrf.mxu0 }
 0x23c   : > { %v932_v20 = vadd.f32 %v931_v60, %v540_v4  ;;  %v975_v21 = vadd.f32 %v974_v61, %v548_v10 }
 0x23d   : > { %v933_v62 = vpop.f32.mrf.mxu1  ;;  %v976_v63 = vpop.f32.mrf.mxu0 }
 0x23e   : > { %v934_v15 = vadd.f32 %v933_v62, %v544_v8  ;;  %v977_v16 = vadd.f32 %v976_v63, %v552_v9  ;;  %v1069_v18 = vmax.f32 %v932_v20, 0.0  ;;  %v1071_v25 = vmax.f32 %v975_v21, 0.0 }
 0x23f   : > { %v935_v0 = vpop.f32.mrf.mxu1  ;;  %v978_v2 = vpop.f32.mrf.mxu0 }
 0x240   : > { %v936_v17 = vadd.f32 %v935_v0, %v540_v4  ;;  %v979_v19 = vadd.f32 %v978_v2, %v548_v10  ;;  %v1070_v24 = vmax.f32 %v934_v15, 0.0  ;;  %v1072_v12 = vmax.f32 %v977_v16, 0.0 }
 0x241   : > { %v937_v6 = vpop.f32.mrf.mxu1  ;;  %v980_v7 = vpop.f32.mrf.mxu0 }
 0x242   : > { %v938_v11 = vadd.f32 %v937_v6, %v544_v8  ;;  %v981_v13 = vadd.f32 %v980_v7, %v552_v9  ;;  %v1077_v43 = vmax.f32 %v936_v17, 0.0  ;;  %v1079_v14 = vmax.f32 %v979_v19, 0.0 }
 0x244   : > { %v1078_v22 = vmax.f32 %v938_v11, 0.0  ;;  %v1080_v23 = vmax.f32 %v981_v13, 0.0  ;;  %v1085_v27 = vmax.f32 %v1069_v18, %v1077_v43  ;;  %v1099_v47 = vmax.f32 %v1071_v25, %v1079_v14 }
 0x246   : > { %v1092_v40 = vmax.f32 %v1070_v24, %v1078_v22  ;;  %v1106_v26 = vmax.f32 %v1072_v12, %v1080_v23  ;;  %v1086_v31 = vrot.slane %v1085_v27, 4  ;;  %v1100_v32 = vrot.slane %v1099_v47, 4 }
 0x247   : > { %v1563_v22 = vmov 1966171168  }
 0x248   : > { %v1093_v28 = vrot.slane %v1092_v40, 4  ;;  %v1107_v29 = vrot.slane %v1106_v26, 4  ;;  %v1087_v41 = vmax.f32 %v1085_v27, %v1086_v31  ;;  %v1101_v42 = vmax.f32 %v1099_v47, %v1100_v32 }
 0x249   : > { %v1158_v23 = vunpack.c.l.s4 %v1563_v22 }
 0x24a   : > { %v1094_v35 = vmax.f32 %v1092_v40, %v1093_v28  ;;  %v1108_v36 = vmax.f32 %v1106_v26, %v1107_v29  ;;  %v1088_v55 = vrot.slane %v1087_v41, 2  ;;  %v1102_v56 = vrot.slane %v1101_v42, 2 }
 0x24b   : > { %v1159_v1 = vunpack.c.0.s8 %v1158_v23 }
 0x24c   : > { %v1095_v49 = vrot.slane %v1094_v35, 2  ;;  %v1109_v50 = vrot.slane %v1108_v36, 2  ;;  %v1089_v10 = vmax.f32 %v1087_v41, %v1088_v55  ;;  %v1103_v11 = vmax.f32 %v1101_v42, %v1102_v56 }
 0x24e   : > { %v1096_v63 = vmax.f32 %v1094_v35, %v1095_v49  ;;  %v1110_v0 = vmax.f32 %v1108_v36, %v1109_v50  ;;  %v1090_v25 = vrot.slane %v1089_v10, 1  ;;  %v1104_v40 = vrot.slane %v1103_v11, 1 }
 0x250   : > { %v1097_v21 = vrot.slane %v1096_v63, 1  ;;  %v1111_v24 = vrot.slane %v1110_v0, 1  ;;  %v1091_v35 = vmax.f32 %v1089_v10, %v1090_v25  ;;  %v1105_v36 = vmax.f32 %v1103_v11, %v1104_v40 }
 0x252   : > { %v1098_v29 = vmax.f32 %v1096_v63, %v1097_v21  ;;  %v1112_v30 = vmax.f32 %v1110_v0, %v1111_v24 }
 0x25b   : > { %v1017_v44 = vpop.f32.mrf.mxu1  ;;  %v1060_v45 = vpop.f32.mrf.mxu0 }
 0x25c   : > { %v1018_v51 = vadd.f32 %v1017_v44, %v556_v37  ;;  %v1061_v52 = vadd.f32 %v1060_v45, %v564_v38  ;;  %v1153_v44 = vcombine.low %v1091_v35, %v1098_v29  ;;  %v1162_v45 = vsub.s32 %v1159_v1, %v1676_v39 }
 0x25d   : > { %v1019_v53 = vpop.f32.mrf.mxu1  ;;  %v1062_v54 = vpop.f32.mrf.mxu0 }
 0x25e   : > { %v1020_v57 = vadd.f32 %v1019_v53, %v560_v46  ;;  %v1063_v58 = vadd.f32 %v1062_v54, %v568_v48  ;;  %v1073_v2 = vmax.f32 %v1018_v51, 0.0  ;;  %v1075_v3 = vmax.f32 %v1061_v52, 0.0 }
 0x25f   : > { %v1021_v59 = vpop.f32.mrf.mxu1  ;;  %v1064_v60 = vpop.f32.mrf.mxu0  ;;  %v1163_v54 = vrot.slane %v1153_v44, %v1162_v45 }
 0x260   : > { %v1022_v61 = vadd.f32 %v1021_v59, %v556_v37  ;;  %v1065_v62 = vadd.f32 %v1064_v60, %v564_v38  ;;  %v1074_v13 = vmax.f32 %v1020_v57, 0.0  ;;  %v1076_v15 = vmax.f32 %v1063_v58, 0.0 }
 0x261   : > { %v1023_v6 = vpop.f32.mrf.mxu1  ;;  %v1066_v5 = vpop.f32.mrf.mxu0 }
 0x262   : > { %v1081_v7 = vmax.f32 %v1022_v61, 0.0  ;;  %v1083_v8 = vmax.f32 %v1065_v62, 0.0  ;;  %v1024_v9 = vadd.f32 %v1023_v6, %v560_v46  ;;  %v1067_v4 = vadd.f32 %v1066_v5, %v568_v48 }
 0x263   : > { %v1154_v46 = vcombine.low %v1105_v36, %v1112_v30 }
 0x264   : > { %v1113_v16 = vmax.f32 %v1073_v2, %v1081_v7  ;;  %v1127_v17 = vmax.f32 %v1075_v3, %v1083_v8  ;;  %v1082_v19 = vmax.f32 %v1024_v9, 0.0  ;;  %v1084_v20 = vmax.f32 %v1067_v4, 0.0 }
 0x265   : > { %v1170_v55 = vrot.slane %v1154_v46, %v1162_v45 }
 0x266   : > { %v1114_v12 = vrot.slane %v1113_v16, 4  ;;  %v1128_v43 = vrot.slane %v1127_v17, 4  ;;  %v1120_v14 = vmax.f32 %v1074_v13, %v1082_v19  ;;  %v1134_v18 = vmax.f32 %v1076_v15, %v1084_v20 }
 0x267   : > { %v1185_v62 = vcombine.low %v1163_v54, %v1170_v55 }
 0x268   : > { %v1115_v26 = vmax.f32 %v1113_v16, %v1114_v12  ;;  %v1129_v27 = vmax.f32 %v1127_v17, %v1128_v43  ;;  %v1121_v47 = vrot.slane %v1120_v14, 4  ;;  %v1135_v28 = vrot.slane %v1134_v18, 4 }
 0x269   : > { %v1193_v2 = vrot.slane %v1185_v62, %v1162_v45 }
 0x26a   : > { %v1116_v31 = vrot.slane %v1115_v26, 2  ;;  %v1130_v32 = vrot.slane %v1129_v27, 2  ;;  %v1122_v33 = vmax.f32 %v1120_v14, %v1121_v47  ;;  %v1136_v34 = vmax.f32 %v1134_v18, %v1135_v28 }
 0x26c   : > { %v1117_v37 = vmax.f32 %v1115_v26, %v1116_v31  ;;  %v1131_v38 = vmax.f32 %v1129_v27, %v1130_v32  ;;  %v1123_v41 = vrot.slane %v1122_v33, 2  ;;  %v1137_v42 = vrot.slane %v1136_v34, 2 }
 0x26e   : > { %v1118_v48 = vrot.slane %v1117_v37, 1  ;;  %v1132_v49 = vrot.slane %v1131_v38, 1  ;;  %v1124_v50 = vmax.f32 %v1122_v33, %v1123_v41  ;;  %v1138_v51 = vmax.f32 %v1136_v34, %v1137_v42 }
 0x270   : > { %v1125_v52 = vrot.slane %v1124_v50, 1  ;;  %v1139_v53 = vrot.slane %v1138_v51, 1  ;;  %v1119_v56 = vmax.f32 %v1117_v37, %v1118_v48  ;;  %v1133_v57 = vmax.f32 %v1131_v38, %v1132_v49 }
 0x272   : > { %v1126_v58 = vmax.f32 %v1124_v50, %v1125_v52  ;;  %v1140_v59 = vmax.f32 %v1138_v51, %v1139_v53 }
 0x274   : > { %v1155_v60 = vcombine.low %v1119_v56, %v1126_v58  ;;  %v1156_v61 = vcombine.low %v1133_v57, %v1140_v59 }
 0x276   : > { %v1177_v63 = vrot.slane %v1155_v60, %v1162_v45  ;;  %v1184_v0 = vrot.slane %v1156_v61, %v1162_v45 }
 0x278   : > { %v1186_v39 = vcombine.low %v1177_v63, %v1184_v0 }
 0x27a   : > { %v1200_v3 = vrot.slane %v1186_v39, %v1162_v45 }
 0x27c   : > { %v1201_v6 = vcombine.low %v1193_v2, %v1200_v3 }
 0x27e   : > { %1203 = vst [vmem:[%s319_s19] sm:$0xff] %v1201_v6 }
 0x27f PF: > { %s18_s26 = sadd.s32 1, %s1553_s26   ;;  %s1746_s24 = smov %s1549_s25 }
 0x280   : > { %p15_p2 = scmp.ge.s32.totalorder %s18_s26, 4   ;;  %s1747_s25 = smov %s1749_s28 }
 0x282   :  { %17 = sbr.rel (!%p15_p2) target bundleno = 2 (0x2), region = 91 }
 0x287   :  { %1288 = vsyncpa [#allocation3], 1 }
 0x288   :  { %1290 = vsyncpa [#allocation3 + $0x1], 1 }

// kernel: pointnet_cls_forward.6
= control target key start
LH: loop header
LB: loop body
LE: loop exit
PB: predicated region body
PF: predicated region fallthrough
CT: control target
= control target key end

     0   :  { %s1542_s24 = smov 0   ;;  %s1544_s25 = smov 0   ;;  %s1841_s0 = inlined_call_operand.vmem [shape: f32[2,16,3], index: 0, kind: input, shape index: {}]   ;;  %s1842_s1 = inlined_call_operand.vmem [shape: f32[2,3,64], index: 1, kind: input, shape index: {}]   ;;  %s1843_s2 = inlined_call_operand.vmem [shape: f32[1,64], index: 2, kind: input, shape index: {}]   ;;  %s1844_s3 = inlined_call_operand.vmem [shape: bf16[64,128], index: 3, kind: input, shape index: {}]   ;;  %s1845_s4 = inlined_call_operand.vmem [shape: f32[1,128], index: 4, kind: input, shape index: {}]   ;;  %s1846_s5 = inlined_call_operand.vmem [shape: bf16[128,1024], index: 5, kind: input, shape index: {}]   ;;  %s1847_s6 = inlined_call_operand.vmem [shape: f32[1,1024], index: 6, kind: input, shape index: {}]   ;;  %s1848_s7 = inlined_call_operand.vmem [shape: f32[2,1,1024], index: 7, kind: output, shape index: {}]  }
   0x1   :  { %s1546_s26 = smov 0  }
   0x2 LB: > { %s29_s27 = sadd.s32 1, %s1490_s25  ;;  %p1338_p0 = scmp.ge.s32.totalorder %s1494_s26, 1  ;;  %s1494_s26 = sphi %s1546_s26, %s17_s26   ;;  %s1490_s25 = sphi %s1544_s25, %s1850_s25   ;;  %s1486_s24 = sphi %s1542_s24, %s1849_s24  }
   0x3   : > { %p31_p1 = scmp.ge.s32.totalorder %s29_s27, 2  ;;  %p265_p2 = scmp.lt.s32.totalorder %s1494_s26, 3 }
   0x5   : > { %s1852_s27 = smov (%p31_p1, %s29_s27), 0  ;;  %p266_p3 = pnand %p1338_p0, %p265_p2 }
   0x6   : > { %p305_p4 = scmp.lt.s32.totalorder (!%p266_p3), %s1486_s24, 1 }
   0x7   : > { %269 = sbr.rel (%p266_p3) target bundleno = 619 (0x26b), region = 48 }
   0xc   : > { %v1496_v0 = vmov 1   ;;  %v1497_v1 = vmov 0   ;;  %s1854_s24 = smov (!%p305_p4, %s1486_s24), 1  ;;  %v1468_v2 = vld [vmem:[%s1844_s3 + $0x18] sm:$0xff]   ;;  %v1498_v3 = vmov 0.0   ;;  %v1469_v5 = vld [vmem:[%s1844_s3 + $0x10] sm:$0xff]   ;;  %v337_v38 = vlaneseq }
   0xd   : > { %1465 = vset.pattern.permute.xlu1 %v1496_v0  ;;  %1464 = vset.pattern.permute.xlu0 %v1497_v1  ;;  %s1416_s30 = sshll.u32 %s1854_s24, 4  ;;  %v1470_v7 = vld [vmem:[%s1844_s3 + $0x8] sm:$0xff]   ;;  %v1499_v8 = vmov 2   ;;  %v1471_v9 = vld [vmem:[%s1844_s3] sm:$0xff]   ;;  %vm1500_vm0 = vmmov 0   ;;  %vm425_vm1 = vcmask 523264  }
   0xe   : > { %931 = vmatprep.mubr.bf16.mxu1 %v1497_v1  ;;  %1422 = vmatprep.subr.bf16.mxu0 %v1498_v3  ;;  %s312_s10 = scalar_lea.vmem %s1841_s0, %s1416_s30  ;;  %v529_v10 = vld [vmem:[%s1846_s5 + $0x1c0] sm:$0xff]  ;;  %v1589_v12 = vld [vmem:[%s1846_s5 + $0x1c8] sm:$0xff]  ;;  %s1341_s30 = sshll.u32 %s1854_s24, 2  ;;  %v1631_v39 = vshrl.u32 %v337_v38, 7 }
   0xf   : > { %1423 = vmatpush3.bf16.msra.mxu0 %v1468_v2  ;;  %v323_v4 = vld [vmem:[%s312_s10] sm:$0xff]  ;;  %v324_v6 = vld [vmem:[%s312_s10 + $0x8] sm:$0xff]  ;;  %1430 = vmatprep.mubr.msk.bf16.mxu0 %vm1500_vm0, %v1498_v3  ;;  %s317_s10 = scalar_lea.vmem %s1842_s1, %s1341_s30  ;;  %s1342_s22 = sshll.u32 %s1854_s24, 3 }
  0x10   : > { %1424 = vmatprep.subr.bf16.mxu0 %v1498_v3  ;;  %352 = vperm.xlu1 %1465, %v323_v4   ;;  %v533_v11 = vld [vmem:[%s1846_s5 + $0x1e0] sm:$0xff]  ;;  %v1594_v14 = vld [vmem:[%s1846_s5 + $0x1e8] sm:$0xff]  ;;  %v339_v40 = vsub.s32 0, %v1631_v39  ;;  %v361_v43 = vsub.s32 1, %v1631_v39  ;;  %v377_v47 = vsub.s32 2, %v1631_v39  ;;  %s321_s29 = scalar_lea.vmem %s1848_s7, %s1342_s22 }
  0x11   : > { %329 = vperm.xlu0 %1464, %v323_v4   ;;  %v1407_v13 = vcombine.high %v529_v10, %v533_v11  ;;  %v1406_v15 = vcombine.low %v529_v10, %v533_v11  ;;  %v521_v16 = vld [vmem:[%s1846_s5 + $0x180] sm:$0xff]  ;;  %v1408_v18 = vcombine.low %v1589_v12, %v1594_v14  ;;  %v1409_v19 = vcombine.high %v1589_v12, %v1594_v14  ;;  %v518_v10 = vld [vmem:[%s1846_s5 + $0x168] sm:$0xff] }
  0x12   : > { %v525_v17 = vld [vmem:[%s1846_s5 + $0x1a0] sm:$0xff]  ;;  %v498_v12 = vld [vmem:[%s1846_s5 + $0xc8] sm:$0xff] }
  0x13   : > { %1425 = vmatpush3.bf16.msra.mxu0 %v1469_v5  ;;  %v1399_v20 = vcombine.high %v521_v16, %v525_v17  ;;  %899 = vmatprep.subr.bf16.mxu1 %v1407_v13  ;;  %v1398_v21 = vcombine.low %v521_v16, %v525_v17  ;;  %v513_v22 = vld [vmem:[%s1846_s5 + $0x140] sm:$0xff]  ;;  %v510_v16 = vld [vmem:[%s1846_s5 + $0x128] sm:$0xff] }
  0x14   : > { %1426 = vmatprep.subr.bf16.mxu0 %v1498_v3  ;;  %356 = vperm.xlu1 %1465, %v324_v6   ;;  %v517_v23 = vld [vmem:[%s1846_s5 + $0x160] sm:$0xff]  ;;  %v502_v14 = vld [vmem:[%s1846_s5 + $0xe8] sm:$0xff] }
  0x15   : > { %334 = vperm.xlu0 %1464, %v324_v6   ;;  %900 = vmatpush1.bf16.msra.mxu1 %v1406_v15  ;;  %v1391_v24 = vcombine.high %v513_v22, %v517_v23  ;;  %v1390_v25 = vcombine.low %v513_v22, %v517_v23  ;;  %v505_v26 = vld [vmem:[%s1846_s5 + $0x100] sm:$0xff]  ;;  %v506_v15 = vld [vmem:[%s1846_s5 + $0x108] sm:$0xff]  ;;  %v1376_v23 = vcombine.low %v498_v12, %v502_v14 }
  0x16   : > { %901 = vmatprep.subr.bf16.mxu1 %v1399_v20  ;;  %v509_v27 = vld [vmem:[%s1846_s5 + $0x120] sm:$0xff]  ;;  %v1377_v20 = vcombine.high %v498_v12, %v502_v14  ;;  %v494_v22 = vld [vmem:[%s1846_s5 + $0xa8] sm:$0xff]  ;;  %v508_v12 = vld [vmem:[%s1846_s5 + $0x118] sm:$0xff] }
  0x17   : > { %1427 = vmatpush3.bf16.msra.mxu0 %v1470_v7  ;;  %v1383_v28 = vcombine.high %v505_v26, %v509_v27  ;;  %v1382_v29 = vcombine.low %v505_v26, %v509_v27  ;;  %v497_v30 = vld [vmem:[%s1846_s5 + $0xc0] sm:$0xff]  ;;  %v478_v38 = vld [vmem:[%s1846_s5 + $0x28] sm:$0xff]  ;;  %v512_v14 = vld [vmem:[%s1846_s5 + $0x138] sm:$0xff] }
  0x18   : > { %1428 = vmatprep.subr.bf16.mxu0 %v1498_v3  ;;  %1467 = vset.pattern.permute.xlu1 %v1499_v8  ;;  %v501_v31 = vld [vmem:[%s1846_s5 + $0xe0] sm:$0xff]  ;;  %v522_v3 = vld [vmem:[%s1846_s5 + $0x188] sm:$0xff] }
  0x19   : > { %1466 = vset.pattern.permute.xlu0 %v1499_v8  ;;  %372 = vperm.xlu1 %1467, %v324_v6   ;;  %v1375_v32 = vcombine.high %v497_v30, %v501_v31  ;;  %v1374_v33 = vcombine.low %v497_v30, %v501_v31  ;;  %v489_v34 = vld [vmem:[%s1846_s5 + $0x80] sm:$0xff]  ;;  %v486_v30 = vld [vmem:[%s1846_s5 + $0x68] sm:$0xff] }
  0x1a   : > { %368 = vperm.xlu0 %1466, %v323_v4   ;;  %902 = vmatpush1.bf16.msra.mxu1 %v1398_v21  ;;  %v493_v35 = vld [vmem:[%s1846_s5 + $0xa0] sm:$0xff]  ;;  %v526_v4 = vld [vmem:[%s1846_s5 + $0x1a8] sm:$0xff] }
  0x1b   : > { %1429 = vmatpush3.bf16.msra.mxu0 %v1471_v9  ;;  %903 = vmatprep.subr.bf16.mxu1 %v1391_v24  ;;  %v1367_v36 = vcombine.high %v489_v34, %v493_v35  ;;  %v1366_v37 = vcombine.low %v489_v34, %v493_v35  ;;  %v325_v41 = vld [vmem:[%s317_s10] sm:$0x7]  ;;  %v1401_v8 = vcombine.high %v522_v3, %v526_v4  ;;  %v514_v9 = vld [vmem:[%s1846_s5 + $0x148] sm:$0xff] }
  0x1c   : > { %942 = vmatprep.subr.bf16.mxu0 %v1409_v19  ;;  %v340_v42 = vrot.slane %v325_v41, %v339_v40  ;;  %v1343_v48 = vld [vmem:[%s1843_s2] ss:$0 sm:$0xff]  ;;  %v362_v49 = vrot.slane %v325_v41, %v361_v43  ;;  %v378_v54 = vrot.slane %v325_v41, %v377_v47  ;;  %v1400_v11 = vcombine.low %v522_v3, %v526_v4  ;;  %v490_v21 = vld [vmem:[%s1846_s5 + $0x88] sm:$0xff] }
  0x1d   : > { %v1393_v13 = vcombine.high %v514_v9, %v518_v10  ;;  %v1392_v17 = vcombine.low %v514_v9, %v518_v10  ;;  %v1385_v19 = vcombine.high %v506_v15, %v510_v16  ;;  %v1369_v24 = vcombine.high %v490_v21, %v494_v22  ;;  %v481_v26 = vld [vmem:[%s1846_s5 + $0x40] sm:$0xff]  ;;  %v516_v9 = vld [vmem:[%s1846_s5 + $0x158] sm:$0xff] }
  0x1e   : > { %904 = vmatpush1.bf16.msra.mxu1 %v1390_v25  ;;  %v1368_v25 = vcombine.low %v490_v21, %v494_v22  ;;  %v485_v27 = vld [vmem:[%s1846_s5 + $0x60] sm:$0xff]  ;;  %v520_v10 = vld [vmem:[%s1846_s5 + $0x178] sm:$0xff]  ;;  %v1389_v22 = vcombine.high %v508_v12, %v512_v14 }
  0x1f   : > { %905 = vmatprep.subr.bf16.mxu1 %v1383_v28  ;;  %v482_v28 = vld [vmem:[%s1846_s5 + $0x48] sm:$0xff]  ;;  %v473_v34 = vld [vmem:[%s1846_s5] sm:$0xff] }
  0x20   : > { %v1360_v31 = vcombine.low %v482_v28, %v486_v30  ;;  %v477_v35 = vld [vmem:[%s1846_s5 + $0x20] sm:$0xff] }
  0x22   : > { %906 = vmatpush1.bf16.msra.mxu1 %v1382_v29  ;;  %v1359_v29 = vcombine.high %v481_v26, %v485_v27 }
  0x23   : > { %907 = vmatprep.subr.bf16.mxu1 %v1375_v32  ;;  %v1361_v32 = vcombine.high %v482_v28, %v486_v30  ;;  %v491_v30 = vld [vmem:[%s1846_s5 + $0x90] sm:$0xff] }
  0x26   : > { %908 = vmatpush1.bf16.msra.mxu1 %v1374_v33  ;;  %v1358_v33 = vcombine.low %v481_v26, %v485_v27  ;;  %v1388_v27 = vcombine.low %v508_v12, %v512_v14 }
  0x27   : > { %909 = vmatprep.subr.bf16.mxu1 %v1367_v36  ;;  %v474_v36 = vld [vmem:[%s1846_s5 + $0x8] sm:$0xff] }
  0x28   : > { %v1352_v41 = vcombine.low %v474_v36, %v478_v38 }
  0x2a   : > { %910 = vmatpush1.bf16.msra.mxu1 %v1366_v37  ;;  %v1351_v37 = vcombine.high %v473_v34, %v477_v35 }
  0x2b   : > { %911 = vmatprep.subr.bf16.mxu1 %v1359_v29 }
  0x2e   : > { %912 = vmatpush1.bf16.msra.mxu1 %v1358_v33  ;;  %v496_v33 = vld [vmem:[%s1846_s5 + $0xb8] sm:$0xff] }
  0x2f   : > { %913 = vmatprep.subr.bf16.mxu1 %v1351_v37 }
  0x8b   : > { %v353_v44 = vpop.permute.xlu1 %352 }
  0x8c   : > { %v330_v45 = vpop.permute.xlu0 %329  ;;  %v363_v57 = vmul.f32 %v362_v49, %v353_v44  ;;  %v1350_v44 = vcombine.low %v473_v34, %v477_v35 }
  0x8d   : > { %v341_v46 = vmul.f32 %v340_v42, %v330_v45  ;;  %v531_v45 = vld [vmem:[%s1846_s5 + $0x1d0] sm:$0xff] }
  0x8e   : > { %914 = vmatpush1.bf16.msra.mxu1 %v1350_v44  ;;  %v488_v44 = vld [vmem:[%s1846_s5 + $0x78] sm:$0xff] }
  0x8f   : > { %v357_v50 = vpop.permute.xlu1 %356  ;;  %v349_v53 = vadd.f32 %v1343_v48, %v341_v46  ;;  %v535_v46 = vld [vmem:[%s1846_s5 + $0x1f0] sm:$0xff] }
  0x90   : > { %v335_v51 = vpop.permute.xlu0 %334  ;;  %v364_v55 = vmul.f32 %v362_v49, %v357_v50  ;;  %v1411_v49 = vcombine.high %v531_v45, %v535_v46  ;;  %v536_v50 = vld [vmem:[%s1846_s5 + $0x1f8] sm:$0xff] }
  0x91   : > { %v342_v52 = vmul.f32 %v340_v42, %v335_v51  ;;  %v365_v62 = vadd.f32 %v363_v57, %v349_v53  ;;  %v1353_v42 = vcombine.high %v474_v36, %v478_v38  ;;  %v1410_v51 = vcombine.low %v531_v45, %v535_v46  ;;  %v483_v38 = vld [vmem:[%s1846_s5 + $0x50] sm:$0xff] }
  0x92   : > { %985 = vmatprep.subr.bf16.mxu1 %v1411_v49 }
  0x93   : > { %v350_v56 = vadd.f32 %v1343_v48, %v342_v52  ;;  %v532_v48 = vld [vmem:[%s1846_s5 + $0x1d8] sm:$0xff] }
  0x94   : > { %v373_v58 = vpop.permute.xlu1 %372  ;;  %v1412_v52 = vcombine.low %v532_v48, %v536_v50  ;;  %v1413_v53 = vcombine.high %v532_v48, %v536_v50  ;;  %v475_v50 = vld [vmem:[%s1846_s5 + $0x10] sm:$0xff] }
  0x95   : > { %v366_v59 = vadd.f32 %v364_v55, %v350_v56  ;;  %v369_v60 = vpop.permute.xlu0 %368  ;;  %v380_v61 = vmul.f32 %v378_v54, %v373_v58 }
  0x96   : > { %v379_v63 = vmul.f32 %v378_v54, %v369_v60  ;;  %v1344_v54 = vld [vmem:[%s1845_s4] ss:$0 sm:$0xff]  ;;  %v523_v60 = vld [vmem:[%s1846_s5 + $0x190] sm:$0xff] }
  0x97   : > { %v382_v0 = vadd.f32 %v380_v61, %v366_v59 }
  0x98   : > { %v381_v2 = vadd.f32 %v379_v63, %v365_v62  ;;  %v527_v62 = vld [vmem:[%s1846_s5 + $0x1b0] sm:$0xff]  ;;  %v524_v63 = vld [vmem:[%s1846_s5 + $0x198] sm:$0xff] }
  0x99   : > { %v384_v5 = vmax.f32 %v382_v0, 0.0  ;;  %v528_v0 = vld [vmem:[%s1846_s5 + $0x1b8] sm:$0xff] }
  0x9a   : > { %v383_v6 = vmax.f32 %v381_v2, 0.0 }
  0x9c   : > { %v385_v7 = vpack.c.bf16 %v384_v5, %v383_v6  ;;  %v1403_v5 = vcombine.high %v523_v60, %v527_v62  ;;  %v1405_v6 = vcombine.high %v524_v63, %v528_v0 }
  0x9e   : > { %1431 = vmatmul.mubr.msk.bf16.vlgmr.msra.gmra.mxu0 %vm425_vm1, %v385_v7  ;;  %v515_v7 = vld [vmem:[%s1846_s5 + $0x150] sm:$0xff] }
  0x9f   : > { %943 = vmatpush1.bf16.msra.mxu0 %v1408_v18  ;;  %974 = vmatprep.mubr.bf16.mxu0 %v1497_v1  ;;  %v1384_v18 = vcombine.low %v506_v15, %v510_v16  ;;  %v1397_v16 = vcombine.high %v516_v9, %v520_v10 }
  0xa0   : > { %944 = vmatprep.subr.bf16.mxu0 %v1401_v8  ;;  %v519_v8 = vld [vmem:[%s1846_s5 + $0x170] sm:$0xff] }
  0xa1   : > { %v1395_v15 = vcombine.high %v515_v7, %v519_v8 }
  0xa3   : > { %945 = vmatpush1.bf16.msra.mxu0 %v1400_v11  ;;  %v1402_v11 = vcombine.low %v523_v60, %v527_v62 }
  0xa4   : > { %946 = vmatprep.subr.bf16.mxu0 %v1393_v13  ;;  %v1404_v13 = vcombine.low %v524_v63, %v528_v0 }
  0xa7   : > { %947 = vmatpush1.bf16.msra.mxu0 %v1392_v17  ;;  %v507_v17 = vld [vmem:[%s1846_s5 + $0x110] sm:$0xff] }
  0xa8   : > { %948 = vmatprep.subr.bf16.mxu0 %v1385_v19  ;;  %v511_v19 = vld [vmem:[%s1846_s5 + $0x130] sm:$0xff] }
  0xa9   : > { %v1387_v21 = vcombine.high %v507_v17, %v511_v19  ;;  %v1386_v26 = vcombine.low %v507_v17, %v511_v19 }
  0xab   : > { %949 = vmatpush1.bf16.msra.mxu0 %v1384_v18  ;;  %v1394_v18 = vcombine.low %v515_v7, %v519_v8 }
  0xac   : > { %950 = vmatprep.subr.bf16.mxu0 %v1377_v20  ;;  %v1396_v20 = vcombine.low %v516_v9, %v520_v10 }
  0xaf   : > { %951 = vmatpush1.bf16.msra.mxu0 %v1376_v23  ;;  %v499_v23 = vld [vmem:[%s1846_s5 + $0xd0] sm:$0xff] }
  0xb0   : > { %952 = vmatprep.subr.bf16.mxu0 %v1369_v24  ;;  %v503_v24 = vld [vmem:[%s1846_s5 + $0xf0] sm:$0xff] }
  0xb1   : > { %v1379_v28 = vcombine.high %v499_v23, %v503_v24  ;;  %v1378_v34 = vcombine.low %v499_v23, %v503_v24 }
  0xb3   : > { %953 = vmatpush1.bf16.msra.mxu0 %v1368_v25  ;;  %v504_v25 = vld [vmem:[%s1846_s5 + $0xf8] sm:$0xff] }
  0xb4   : > { %954 = vmatprep.subr.bf16.mxu0 %v1361_v32  ;;  %v492_v32 = vld [vmem:[%s1846_s5 + $0x98] sm:$0xff] }
  0xb5   : > { %v1373_v37 = vcombine.high %v492_v32, %v496_v33  ;;  %v1372_v46 = vcombine.low %v492_v32, %v496_v33 }
  0xb7   : > { %955 = vmatpush1.bf16.msra.mxu0 %v1360_v31  ;;  %v495_v31 = vld [vmem:[%s1846_s5 + $0xb0] sm:$0xff] }
  0xb8   : > { %956 = vmatprep.subr.bf16.mxu0 %v1353_v42  ;;  %v1371_v36 = vcombine.high %v491_v30, %v495_v31  ;;  %v484_v42 = vld [vmem:[%s1846_s5 + $0x58] sm:$0xff]  ;;  %v1370_v45 = vcombine.low %v491_v30, %v495_v31  ;;  %v569_v30 = vsub.s32 7, %v1631_v39 }
  0xb9   : > { %v1365_v49 = vcombine.high %v484_v42, %v488_v44 }
  0xbb   : > { %957 = vmatpush1.bf16.msra.mxu0 %v1352_v41  ;;  %v487_v41 = vld [vmem:[%s1846_s5 + $0x70] sm:$0xff] }
  0xbc   : > { %1028 = vmatprep.subr.bf16.mxu0 %v1413_v53  ;;  %v1363_v48 = vcombine.high %v483_v38, %v487_v41  ;;  %v480_v53 = vld [vmem:[%s1846_s5 + $0x38] sm:$0xff] }
 0x15e   : > { %v463_v55 = vpop.f32.mrf.mxu0 }
 0x15f   : > { %v464_v57 = vadd.f32 %v1344_v54, %v463_v55  ;;  %v1364_v55 = vcombine.low %v484_v42, %v488_v44 }
 0x160   : > { %v1432_v56 = vpop.f32.mrf.mxu0 }
 0x161   : > { %v470_v2 = vmax.f32 %v464_v57, 0.0 }
 0x162   : > { %v466_v58 = vpop.f32.mrf.mxu0 }
 0x163   : > { %v467_v59 = vadd.f32 %v1344_v54, %v466_v58  ;;  %v1362_v54 = vcombine.low %v483_v38, %v487_v41 }
 0x164   : > { %v1433_v61 = vpop.f32.mrf.mxu0 }
 0x165   : > { %v471_v3 = vmax.f32 %v467_v59, 0.0 }
 0x167   : > { %v1733_v4 = vpack.c.bf16 %v471_v3, %v470_v2  ;;  %v553_v3 = vsub.s32 3, %v1631_v39 }
 0x169   : > { %932 = vmatmul.mubr.bf16.vlgmr.msra.gmra.mxu1 %v1733_v4  ;;  %975 = vmatmul.mubr.bf16.vlgmr.msra.gmra.mxu0 %v1733_v4 }
 0x16a   : > { %986 = vmatpush1.bf16.msra.mxu1 %v1410_v51  ;;  %1029 = vmatpush1.bf16.msra.mxu0 %v1412_v52  ;;  %v479_v51 = vld [vmem:[%s1846_s5 + $0x30] sm:$0xff]  ;;  %v476_v52 = vld [vmem:[%s1846_s5 + $0x18] sm:$0xff] }
 0x16b   : > { %987 = vmatprep.subr.bf16.mxu1 %v1403_v5  ;;  %1030 = vmatprep.subr.bf16.mxu0 %v1405_v6  ;;  %v1355_v56 = vcombine.high %v475_v50, %v479_v51  ;;  %v1357_v57 = vcombine.high %v476_v52, %v480_v53  ;;  %v1354_v58 = vcombine.low %v475_v50, %v479_v51  ;;  %v537_v5 = vld [vmem:[%s1847_s6] sm:$0xff] }
 0x16c   : > { %1017 = vmatprep.mubr.bf16.mxu1 %v1497_v1  ;;  %1060 = vmatprep.mubr.bf16.mxu0 %v1497_v1  ;;  %v500_v1 = vld [vmem:[%s1846_s5 + $0xd8] sm:$0xff]  ;;  %v1356_v59 = vcombine.low %v476_v52, %v480_v53  ;;  %v546_v8 = vrot.slane %v537_v5, %v361_v43  ;;  %v554_v9 = vrot.slane %v537_v5, %v553_v3  ;;  %v1501_v3 = vmov 1966171168  }
 0x16d   : > { %v1381_v29 = vcombine.high %v500_v1, %v504_v25  ;;  %v1380_v35 = vcombine.low %v500_v1, %v504_v25  ;;  %v550_v10 = vrot.slane %v537_v5, %v377_v47  ;;  %v557_v47 = vsub.s32 4, %v1631_v39 }
 0x16e   : > { %988 = vmatpush1.bf16.msra.mxu1 %v1402_v11  ;;  %1031 = vmatpush1.bf16.msra.mxu0 %v1404_v13  ;;  %v570_v44 = vrot.slane %v537_v5, %v569_v30 }
 0x16f   : > { %989 = vmatprep.subr.bf16.mxu1 %v1395_v15  ;;  %1032 = vmatprep.subr.bf16.mxu0 %v1397_v16 }
 0x172   : > { %990 = vmatpush1.bf16.msra.mxu1 %v1394_v18  ;;  %1033 = vmatpush1.bf16.msra.mxu0 %v1396_v20 }
 0x173   : > { %991 = vmatprep.subr.bf16.mxu1 %v1387_v21  ;;  %1034 = vmatprep.subr.bf16.mxu0 %v1389_v22 }
 0x176   : > { %992 = vmatpush1.bf16.msra.mxu1 %v1386_v26  ;;  %1035 = vmatpush1.bf16.msra.mxu0 %v1388_v27  ;;  %v565_v26 = vsub.s32 6, %v1631_v39 }
 0x177   : > { %993 = vmatprep.subr.bf16.mxu1 %v1379_v28  ;;  %1036 = vmatprep.subr.bf16.mxu0 %v1381_v29  ;;  %v561_v29 = vsub.s32 5, %v1631_v39 }
 0x179   : > { %v562_v41 = vrot.slane %v537_v5, %v561_v29 }
 0x17a   : > { %994 = vmatpush1.bf16.msra.mxu1 %v1378_v34  ;;  %1037 = vmatpush1.bf16.msra.mxu0 %v1380_v35  ;;  %v558_v35 = vrot.slane %v537_v5, %v557_v47 }
 0x17b   : > { %995 = vmatprep.subr.bf16.mxu1 %v1371_v36  ;;  %1038 = vmatprep.subr.bf16.mxu0 %v1373_v37  ;;  %v566_v36 = vrot.slane %v537_v5, %v565_v26 }
 0x17e   : > { %996 = vmatpush1.bf16.msra.mxu1 %v1370_v45  ;;  %1039 = vmatpush1.bf16.msra.mxu0 %v1372_v46 }
 0x17f   : > { %997 = vmatprep.subr.bf16.mxu1 %v1363_v48  ;;  %1040 = vmatprep.subr.bf16.mxu0 %v1365_v49 }
 0x182   : > { %998 = vmatpush1.bf16.msra.mxu1 %v1362_v54  ;;  %1041 = vmatpush1.bf16.msra.mxu0 %v1364_v55 }
 0x183   : > { %999 = vmatprep.subr.bf16.mxu1 %v1355_v56  ;;  %1042 = vmatprep.subr.bf16.mxu0 %v1357_v57 }
 0x186   : > { %1000 = vmatpush1.bf16.msra.mxu1 %v1354_v58  ;;  %1043 = vmatpush1.bf16.msra.mxu0 %v1356_v59 }
 0x189   : > { %1018 = vmatmul.mubr.bf16.vlgmr.msra.gmra.mxu1 %v1733_v4  ;;  %1061 = vmatmul.mubr.bf16.vlgmr.msra.gmra.mxu0 %v1733_v4  ;;  %v542_v4 = vrot.slane %v537_v5, %v339_v40  ;;  %v1144_v5 = vunpack.c.l.s4 %v1501_v3 }
 0x229   : > { %v933_v60 = vpop.f32.mrf.mxu1  ;;  %v976_v61 = vpop.f32.mrf.mxu0 }
 0x22a   : > { %v934_v12 = vadd.f32 %v933_v60, %v542_v4  ;;  %v977_v14 = vadd.f32 %v976_v61, %v550_v10 }
 0x22b   : > { %v935_v62 = vpop.f32.mrf.mxu1  ;;  %v978_v63 = vpop.f32.mrf.mxu0 }
 0x22c   : > { %v936_v15 = vadd.f32 %v935_v62, %v546_v8  ;;  %v979_v16 = vadd.f32 %v978_v63, %v554_v9 }
 0x22d   : > { %v937_v0 = vpop.f32.mrf.mxu1  ;;  %v980_v2 = vpop.f32.mrf.mxu0 }
 0x22e   : > { %v938_v17 = vadd.f32 %v937_v0, %v542_v4  ;;  %v981_v19 = vadd.f32 %v980_v2, %v550_v10 }
 0x22f   : > { %v939_v6 = vpop.f32.mrf.mxu1  ;;  %v982_v7 = vpop.f32.mrf.mxu0 }
 0x230   : > { %v940_v11 = vadd.f32 %v939_v6, %v546_v8  ;;  %v983_v13 = vadd.f32 %v982_v7, %v554_v9  ;;  %v1071_v21 = vmax.f32 %v934_v12, %v938_v17  ;;  %v1085_v22 = vmax.f32 %v977_v14, %v981_v19 }
 0x231   : > { %v1145_v12 = vunpack.c.0.s8 %v1144_v5 }
 0x232   : > { %v1078_v18 = vmax.f32 %v936_v15, %v940_v11  ;;  %v1092_v20 = vmax.f32 %v979_v16, %v983_v13  ;;  %v1072_v24 = vrot.slane %v1071_v21, 4  ;;  %v1086_v1 = vrot.slane %v1085_v22, 4 }
 0x233   : > { %v1148_v26 = vsub.s32 %v1145_v12, %v1631_v39 }
 0x234   : > { %v1079_v43 = vrot.slane %v1078_v18, 4  ;;  %v1093_v23 = vrot.slane %v1092_v20, 4  ;;  %v1073_v27 = vmax.f32 %v1071_v21, %v1072_v24  ;;  %v1087_v28 = vmax.f32 %v1085_v22, %v1086_v1 }
 0x236   : > { %v1080_v40 = vmax.f32 %v1078_v18, %v1079_v43  ;;  %v1094_v25 = vmax.f32 %v1092_v20, %v1093_v23  ;;  %v1074_v37 = vrot.slane %v1073_v27, 2  ;;  %v1088_v38 = vrot.slane %v1087_v28, 2 }
 0x238   : > { %v1081_v31 = vrot.slane %v1080_v40, 2  ;;  %v1095_v32 = vrot.slane %v1094_v25, 2  ;;  %v1075_v55 = vmax.f32 %v1073_v27, %v1074_v37  ;;  %v1089_v56 = vmax.f32 %v1087_v28, %v1088_v38 }
 0x23a   : > { %v1082_v46 = vmax.f32 %v1080_v40, %v1081_v31  ;;  %v1096_v48 = vmax.f32 %v1094_v25, %v1095_v32  ;;  %v1076_v10 = vrot.slane %v1075_v55, 1  ;;  %v1090_v11 = vrot.slane %v1089_v56, 1 }
 0x23c   : > { %v1083_v2 = vrot.slane %v1082_v46, 1  ;;  %v1097_v6 = vrot.slane %v1096_v48, 1  ;;  %v1077_v43 = vmax.f32 %v1075_v55, %v1076_v10  ;;  %v1091_v23 = vmax.f32 %v1089_v56, %v1090_v11 }
 0x23e   : > { %v1084_v19 = vmax.f32 %v1082_v46, %v1083_v2  ;;  %v1098_v14 = vmax.f32 %v1096_v48, %v1097_v6 }
 0x240   : > { %v1139_v47 = vcombine.low %v1077_v43, %v1084_v19  ;;  %v1140_v27 = vcombine.low %v1091_v23, %v1098_v14 }
 0x249   : > { %v1019_v33 = vpop.f32.mrf.mxu1  ;;  %v1062_v34 = vpop.f32.mrf.mxu0 }
 0x24a   : > { %v1020_v51 = vadd.f32 %v1019_v33, %v558_v35  ;;  %v1063_v52 = vadd.f32 %v1062_v34, %v566_v36  ;;  %v1149_v34 = vrot.slane %v1139_v47, %v1148_v26 }
 0x24b   : > { %v1021_v42 = vpop.f32.mrf.mxu1  ;;  %v1064_v45 = vpop.f32.mrf.mxu0 }
 0x24c   : > { %v1022_v57 = vadd.f32 %v1021_v42, %v562_v41  ;;  %v1065_v58 = vadd.f32 %v1064_v45, %v570_v44 }
 0x24d   : > { %v1023_v49 = vpop.f32.mrf.mxu1  ;;  %v1066_v50 = vpop.f32.mrf.mxu0 }
 0x24e   : > { %v1024_v53 = vadd.f32 %v1023_v49, %v558_v35  ;;  %v1067_v54 = vadd.f32 %v1066_v50, %v566_v36  ;;  %v1156_v35 = vrot.slane %v1140_v27, %v1148_v26 }
 0x24f   : > { %v1025_v59 = vpop.f32.mrf.mxu1  ;;  %v1068_v60 = vpop.f32.mrf.mxu0 }
 0x250   : > { %v1099_v61 = vmax.f32 %v1020_v51, %v1024_v53  ;;  %v1113_v62 = vmax.f32 %v1063_v52, %v1067_v54  ;;  %v1026_v63 = vadd.f32 %v1025_v59, %v562_v41  ;;  %v1069_v0 = vadd.f32 %v1068_v60, %v570_v44 }
 0x251   : > { %v1171_v45 = vcombine.low %v1149_v34, %v1156_v35 }
 0x252   : > { %v1100_v7 = vrot.slane %v1099_v61, 4  ;;  %v1114_v8 = vrot.slane %v1113_v62, 4  ;;  %v1106_v9 = vmax.f32 %v1022_v57, %v1026_v63  ;;  %v1120_v4 = vmax.f32 %v1065_v58, %v1069_v0 }
 0x253   : > { %v1179_v49 = vrot.slane %v1171_v45, %v1148_v26 }
 0x254   : > { %v1101_v13 = vmax.f32 %v1099_v61, %v1100_v7  ;;  %v1115_v15 = vmax.f32 %v1113_v62, %v1114_v8  ;;  %v1107_v16 = vrot.slane %v1106_v9, 4  ;;  %v1121_v17 = vrot.slane %v1120_v4, 4 }
 0x256   : > { %v1102_v18 = vrot.slane %v1101_v13, 2  ;;  %v1116_v20 = vrot.slane %v1115_v15, 2  ;;  %v1108_v21 = vmax.f32 %v1106_v9, %v1107_v16  ;;  %v1122_v22 = vmax.f32 %v1120_v4, %v1121_v17 }
 0x258   : > { %v1103_v24 = vmax.f32 %v1101_v13, %v1102_v18  ;;  %v1117_v1 = vmax.f32 %v1115_v15, %v1116_v20  ;;  %v1109_v40 = vrot.slane %v1108_v21, 2  ;;  %v1123_v25 = vrot.slane %v1122_v22, 2 }
 0x25a   : > { %v1104_v28 = vrot.slane %v1103_v24, 1  ;;  %v1118_v29 = vrot.slane %v1117_v1, 1  ;;  %v1110_v30 = vmax.f32 %v1108_v21, %v1109_v40  ;;  %v1124_v31 = vmax.f32 %v1122_v22, %v1123_v25 }
 0x25c   : > { %v1111_v32 = vrot.slane %v1110_v30, 1  ;;  %v1125_v33 = vrot.slane %v1124_v31, 1  ;;  %v1105_v36 = vmax.f32 %v1103_v24, %v1104_v28  ;;  %v1119_v37 = vmax.f32 %v1117_v1, %v1118_v29 }
 0x25e   : > { %v1112_v38 = vmax.f32 %v1110_v30, %v1111_v32  ;;  %v1126_v41 = vmax.f32 %v1124_v31, %v1125_v33 }
 0x260   : > { %v1141_v42 = vcombine.low %v1105_v36, %v1112_v38  ;;  %v1142_v44 = vcombine.low %v1119_v37, %v1126_v41 }
 0x262   : > { %v1163_v46 = vrot.slane %v1141_v42, %v1148_v26  ;;  %v1170_v48 = vrot.slane %v1142_v44, %v1148_v26 }
 0x264   : > { %v1172_v39 = vcombine.low %v1163_v46, %v1170_v48 }
 0x266   : > { %v1186_v50 = vrot.slane %v1172_v39, %v1148_v26 }
 0x268   : > { %v1187_v51 = vcombine.low %v1179_v49, %v1186_v50 }
 0x26a   : > { %1189 = vst [vmem:[%s321_s29] sm:$0xff] %v1187_v51 }
 0x26b PF: > { %s17_s26 = sadd.s32 1, %s1494_s26   ;;  %s1849_s24 = smov %s1490_s25 }
 0x26c   : > { %p14_p5 = scmp.ge.s32.totalorder %s17_s26, 4   ;;  %s1850_s25 = smov %s1852_s27 }
 0x26e   :  { %16 = sbr.rel (!%p14_p5) target bundleno = 2 (0x2), region = 89 }

// kernel: pointnet_cls_forward.5
= control target key start
LH: loop header
LB: loop body
LE: loop exit
PB: predicated region body
PF: predicated region fallthrough
CT: control target
= control target key end

     0   :  { %12 = vsyncpa [#allocation3], 0  ;;  %s3448_s24 = smov [#allocation2]   ;;  %s3884_s0 = inlined_call_operand.vmem [shape: f32[2,1024], index: 0, kind: input, shape index: {}]   ;;  %s3885_s1 = inlined_call_operand.hbm [shape: bf16[1024,512], index: 1, kind: input, shape index: {}]   ;;  %s3886_s2 = inlined_call_operand.vmem [shape: f32[1,512], index: 2, kind: input, shape index: {}]   ;;  %s3887_s3 = inlined_call_operand.vmem [shape: bf16[512,256], index: 3, kind: input, shape index: {}]   ;;  %s3888_s4 = inlined_call_operand.vmem [shape: f32[1,256], index: 4, kind: input, shape index: {}]   ;;  %s3889_s5 = inlined_call_operand.vmem [shape: f32[256,9], index: 5, kind: input, shape index: {}]   ;;  %s3890_s6 = inlined_call_operand.vmem [shape: f32[1,9], index: 6, kind: input, shape index: {}]   ;;  %s3891_s7 = inlined_call_operand.vmem [shape: f32[2,9], index: 7, kind: output, shape index: {}]  }
   0x1   :  { %s20_s25 = sshll.u32 %s3448_s24, 4  ;;  %s21_s25 = int_to_ptr.vmem [resolvable:$true] %s20_s25 }
   0x2   :  { %s3434_s26 = scalar_lea.vmem %s21_s25, 32768  ;;  %p3439_p1 = scmp.lt.s32.totalorder %s21_s25, %s21_s25 }
   0x3   :  { %p3435_p0 = scmp.ne.s32.totalorder %s21_s25, %s3434_s26  ;;  %p3440_p2 = scmp.lt.s32.totalorder %s3434_s26, %s3434_s26 }
   0x5   :  { %p3441_p3 = por %p3440_p2, %p3439_p1 }
   0x7   :  { %p3442_p4 = pnand %p3441_p3, %p3435_p0 }
   0x9   :  { %3445 = shalt.err (!%p3442_p4)
}
   0xa   :  { %s3449_s27 = smov 256   ;;  %s3450_s28 = smov 16  }
   0xb   :  { %26 = dma.hbm_to_vmem [thread:$0]  %s3885_s1, 32768, %s21_s25, [#allocation3], %s3449_s27, %s3449_s27, %s3450_s28  }
   0xc   :  { %3446 = dma.done.wait [#allocation3], 32768  }
   0xd   :  { %3447 = vsyncadd [#allocation3], 4294934528  ;;  %v2944_v0 = vld [vmem:[#allocation2 + $0xe4] ss:$16 sps:$4 sm:$0xff]   ;;  %v2948_v2 = vld [vmem:[#allocation2 + $0xe0] ss:$16 sps:$4 sm:$0xff]   ;;  %v48_v38 = vlaneseq }
   0xe   :  { %v2946_v1 = vld [vmem:[#allocation2 + $0x2e4] ss:$16 sps:$4 sm:$0xff]   ;;  %1652 = vmatprep.subr.bf16.mxu0 %v2944_v0  ;;  %v2949_v3 = vld [vmem:[#allocation2 + $0x2e0] ss:$16 sps:$4 sm:$0xff]   ;;  %v3451_v36 = vmov 1983009808  }
   0xf   :  { %1693 = vmatprep.subr.bf16.mxu1 %v2946_v1  ;;  %v2950_v4 = vld [vmem:[#allocation2 + $0xc4] ss:$16 sps:$4 sm:$0xff]   ;;  %1653 = vmatpush1.bf16.msra.mxu0 %v2948_v2  ;;  %v2954_v6 = vld [vmem:[#allocation2 + $0xc0] ss:$16 sps:$4 sm:$0xff]   ;;  %v46_v37 = vunpack.c.l.s4 %v3451_v36  ;;  %v3495_v43 = vshrl.u32 %v48_v38, 7  ;;  %vm2577_vm0 = vcmask 66560  }
  0x10   :  { %1694 = vmatpush1.bf16.msra.mxu1 %v2949_v3  ;;  %v2952_v5 = vld [vmem:[#allocation2 + $0x2c4] ss:$16 sps:$4 sm:$0xff]   ;;  %1654 = vmatprep.subr.bf16.mxu0 %v2950_v4  ;;  %v2955_v7 = vld [vmem:[#allocation2 + $0x2c0] ss:$16 sps:$4 sm:$0xff]  }
  0x11   :  { %1695 = vmatprep.subr.bf16.mxu1 %v2952_v5  ;;  %v2956_v8 = vld [vmem:[#allocation2 + $0xa4] ss:$16 sps:$4 sm:$0xff]   ;;  %v2960_v10 = vld [vmem:[#allocation2 + $0xa0] ss:$16 sps:$4 sm:$0xff]   ;;  %v47_v42 = vunpack.c.0.s8 %v46_v37 }
  0x12   :  { %v2958_v9 = vld [vmem:[#allocation2 + $0x2a4] ss:$16 sps:$4 sm:$0xff]   ;;  %v2961_v11 = vld [vmem:[#allocation2 + $0x2a0] ss:$16 sps:$4 sm:$0xff]  }
  0x13   :  { %1655 = vmatpush1.bf16.msra.mxu0 %v2954_v6  ;;  %v2962_v12 = vld [vmem:[#allocation2 + $0x84] ss:$16 sps:$4 sm:$0xff]   ;;  %v2966_v14 = vld [vmem:[#allocation2 + $0x80] ss:$16 sps:$4 sm:$0xff]   ;;  %v3498_v49 = vsub.s32 %v47_v42, %v3495_v43  ;;  %v41_v42 = vld [vmem:[%s3884_s0 + $0x8] sm:$0xff] }
  0x14   :  { %1696 = vmatpush1.bf16.msra.mxu1 %v2955_v7  ;;  %1656 = vmatprep.subr.bf16.mxu0 %v2956_v8  ;;  %v2964_v13 = vld [vmem:[#allocation2 + $0x284] ss:$16 sps:$4 sm:$0xff]   ;;  %v2967_v15 = vld [vmem:[#allocation2 + $0x280] ss:$16 sps:$4 sm:$0xff]  }
  0x15   :  { %1697 = vmatprep.subr.bf16.mxu1 %v2958_v9  ;;  %v2968_v16 = vld [vmem:[#allocation2 + $0x64] ss:$16 sps:$4 sm:$0xff]   ;;  %v2972_v18 = vld [vmem:[#allocation2 + $0x60] ss:$16 sps:$4 sm:$0xff]  }
  0x16   :  { %v2970_v17 = vld [vmem:[#allocation2 + $0x264] ss:$16 sps:$4 sm:$0xff]   ;;  %v2973_v19 = vld [vmem:[#allocation2 + $0x260] ss:$16 sps:$4 sm:$0xff]  }
  0x17   :  { %1657 = vmatpush1.bf16.msra.mxu0 %v2960_v10  ;;  %v2974_v20 = vld [vmem:[#allocation2 + $0x44] ss:$16 sps:$4 sm:$0xff]   ;;  %v2978_v22 = vld [vmem:[#allocation2 + $0x40] ss:$16 sps:$4 sm:$0xff]  }
  0x18   :  { %1698 = vmatpush1.bf16.msra.mxu1 %v2961_v11  ;;  %1658 = vmatprep.subr.bf16.mxu0 %v2962_v12  ;;  %v2976_v21 = vld [vmem:[#allocation2 + $0x244] ss:$16 sps:$4 sm:$0xff]   ;;  %v2979_v23 = vld [vmem:[#allocation2 + $0x240] ss:$16 sps:$4 sm:$0xff]  }
  0x19   :  { %1699 = vmatprep.subr.bf16.mxu1 %v2964_v13  ;;  %v2980_v24 = vld [vmem:[#allocation2 + $0x24] ss:$16 sps:$4 sm:$0xff]   ;;  %v2984_v26 = vld [vmem:[#allocation2 + $0x20] ss:$16 sps:$4 sm:$0xff]  }
  0x1a   :  { %v2982_v25 = vld [vmem:[#allocation2 + $0x224] ss:$16 sps:$4 sm:$0xff]   ;;  %v2985_v27 = vld [vmem:[#allocation2 + $0x220] ss:$16 sps:$4 sm:$0xff]  }
  0x1b   :  { %1659 = vmatpush1.bf16.msra.mxu0 %v2966_v14  ;;  %v2986_v28 = vld [vmem:[#allocation2 + $0x4] ss:$16 sps:$4 sm:$0xff]   ;;  %v2990_v30 = vld [vmem:[#allocation2] ss:$16 sps:$4 sm:$0xff]  }
  0x1c   :  { %1700 = vmatpush1.bf16.msra.mxu1 %v2967_v15  ;;  %1660 = vmatprep.subr.bf16.mxu0 %v2968_v16  ;;  %v2988_v29 = vld [vmem:[#allocation2 + $0x204] ss:$16 sps:$4 sm:$0xff]   ;;  %v2991_v31 = vld [vmem:[#allocation2 + $0x200] ss:$16 sps:$4 sm:$0xff]  }
  0x1d   :  { %1701 = vmatprep.subr.bf16.mxu1 %v2970_v17  ;;  %v2992_v32 = vld [vmem:[#allocation2 + $0x1e4] ss:$16 sps:$4 sm:$0xff]   ;;  %v2996_v34 = vld [vmem:[#allocation2 + $0x1e0] ss:$16 sps:$4 sm:$0xff]  }
  0x1e   :  { %v2994_v33 = vld [vmem:[#allocation2 + $0x3e4] ss:$16 sps:$4 sm:$0xff]   ;;  %v2997_v35 = vld [vmem:[#allocation2 + $0x3e0] ss:$16 sps:$4 sm:$0xff]  }
  0x1f   :  { %1661 = vmatpush1.bf16.msra.mxu0 %v2972_v18  ;;  %v2998_v39 = vld [vmem:[#allocation2 + $0x1c4] ss:$16 sps:$4 sm:$0xff]   ;;  %v3002_v41 = vld [vmem:[#allocation2 + $0x1c0] ss:$16 sps:$4 sm:$0xff]  }
  0x20   :  { %1702 = vmatpush1.bf16.msra.mxu1 %v2973_v19  ;;  %1662 = vmatprep.subr.bf16.mxu0 %v2974_v20  ;;  %v3000_v40 = vld [vmem:[#allocation2 + $0x3c4] ss:$16 sps:$4 sm:$0xff]   ;;  %v3003_v44 = vld [vmem:[#allocation2 + $0x3c0] ss:$16 sps:$4 sm:$0xff]  }
  0x21   :  { %1703 = vmatprep.subr.bf16.mxu1 %v2976_v21  ;;  %v3004_v45 = vld [vmem:[#allocation2 + $0x1a4] ss:$16 sps:$4 sm:$0xff]   ;;  %v3008_v47 = vld [vmem:[#allocation2 + $0x1a0] ss:$16 sps:$4 sm:$0xff]  }
  0x22   :  { %v3006_v46 = vld [vmem:[#allocation2 + $0x3a4] ss:$16 sps:$4 sm:$0xff]   ;;  %v3009_v48 = vld [vmem:[#allocation2 + $0x3a0] ss:$16 sps:$4 sm:$0xff]  }
  0x23   :  { %1663 = vmatpush1.bf16.msra.mxu0 %v2978_v22  ;;  %v3010_v50 = vld [vmem:[#allocation2 + $0x184] ss:$16 sps:$4 sm:$0xff]   ;;  %v3014_v53 = vld [vmem:[#allocation2 + $0x180] ss:$16 sps:$4 sm:$0xff]  }
  0x24   :  { %1704 = vmatpush1.bf16.msra.mxu1 %v2979_v23  ;;  %1664 = vmatprep.subr.bf16.mxu0 %v2980_v24  ;;  %v3012_v51 = vld [vmem:[#allocation2 + $0x384] ss:$16 sps:$4 sm:$0xff]   ;;  %v3015_v56 = vld [vmem:[#allocation2 + $0x380] ss:$16 sps:$4 sm:$0xff]  }
  0x25   :  { %1705 = vmatprep.subr.bf16.mxu1 %v2982_v25  ;;  %v40_v52 = vld [vmem:[%s3884_s0] sm:$0xff] }
  0x26   :  { %v51_v54 = vrot.slane %v40_v52, %v3498_v49  ;;  %v44_v55 = vcombine.high %v40_v52, %v40_v52  ;;  %v3016_v57 = vld [vmem:[#allocation2 + $0x164] ss:$16 sps:$4 sm:$0xff]   ;;  %v3020_v61 = vld [vmem:[#allocation2 + $0x160] ss:$16 sps:$4 sm:$0xff]  }
  0x27   :  { %1665 = vmatpush1.bf16.msra.mxu0 %v2984_v26  ;;  %v3018_v58 = vld [vmem:[#allocation2 + $0x364] ss:$16 sps:$4 sm:$0xff]   ;;  %v3021_v0 = vld [vmem:[#allocation2 + $0x360] ss:$16 sps:$4 sm:$0xff]  }
  0x28   :  { %1706 = vmatpush1.bf16.msra.mxu1 %v2985_v27  ;;  %1666 = vmatprep.subr.bf16.mxu0 %v2986_v28  ;;  %v59_v59 = vcombine.high %v51_v54, %v51_v54  ;;  %v58_v60 = vrot.slane %v44_v55, %v3498_v49  ;;  %v3022_v1 = vld [vmem:[#allocation2 + $0x144] ss:$16 sps:$4 sm:$0xff]   ;;  %v3026_v4 = vld [vmem:[#allocation2 + $0x140] ss:$16 sps:$4 sm:$0xff]   ;;  %v3511_v16 = vpack.c.bf16 %v51_v54, %v51_v54 }
  0x29   :  { %1707 = vmatprep.subr.bf16.mxu1 %v2988_v29  ;;  %v3024_v2 = vld [vmem:[#allocation2 + $0x344] ss:$16 sps:$4 sm:$0xff]   ;;  %v3027_v5 = vld [vmem:[#allocation2 + $0x340] ss:$16 sps:$4 sm:$0xff]  }
  0x2a   :  { %v3505_v62 = vpack.c.bf16 %v59_v59, %v59_v59  ;;  %v60_v63 = vcombine.high %v58_v60, %v58_v60  ;;  %v3028_v6 = vld [vmem:[#allocation2 + $0x124] ss:$16 sps:$4 sm:$0xff]   ;;  %v3032_v8 = vld [vmem:[#allocation2 + $0x120] ss:$16 sps:$4 sm:$0xff]   ;;  %v3513_v17 = vpack.c.bf16 %v58_v60, %v58_v60 }
  0x2b   :  { %1667 = vmatpush1.bf16.msra.mxu0 %v2990_v30  ;;  %v3030_v7 = vld [vmem:[#allocation2 + $0x324] ss:$16 sps:$4 sm:$0xff]   ;;  %v3033_v9 = vld [vmem:[#allocation2 + $0x320] ss:$16 sps:$4 sm:$0xff]  }
  0x2c   :  { %1708 = vmatpush1.bf16.msra.mxu1 %v2991_v31  ;;  %1668 = vmatprep.subr.bf16.mxu0 %v2992_v32  ;;  %v3507_v3 = vpack.c.bf16 %v60_v63, %v60_v63  ;;  %v3034_v10 = vld [vmem:[#allocation2 + $0x104] ss:$16 sps:$4 sm:$0xff]   ;;  %v3038_v12 = vld [vmem:[#allocation2 + $0x100] ss:$16 sps:$4 sm:$0xff]  }
  0x2d   :  { %1709 = vmatprep.subr.bf16.mxu1 %v2994_v33  ;;  %1684 = vmatprep.mubr.bf16.mxu0 %v3505_v62  ;;  %v3036_v11 = vld [vmem:[#allocation2 + $0x304] ss:$16 sps:$4 sm:$0xff]   ;;  %v3039_v13 = vld [vmem:[#allocation2 + $0x300] ss:$16 sps:$4 sm:$0xff]  }
  0x2e   :  { %1725 = vmatprep.mubr.bf16.mxu1 %v3507_v3  ;;  %v3043_v14 = vld [vmem:[#allocation2 + $0x4e4] ss:$16 sps:$4 sm:$0xff]   ;;  %v3041_v18 = vld [vmem:[#allocation2 + $0x4e0] ss:$16 sps:$4 sm:$0xff]  }
  0x2f   :  { %1669 = vmatpush2.bf16.msra.mxu0 %v2996_v34  ;;  %v3046_v15 = vld [vmem:[#allocation2 + $0x6e4] ss:$16 sps:$4 sm:$0xff]   ;;  %v3044_v19 = vld [vmem:[#allocation2 + $0x6e0] ss:$16 sps:$4 sm:$0xff]  }
  0x30   :  { %1710 = vmatpush2.bf16.msra.mxu1 %v2997_v35  ;;  %1670 = vmatprep.subr.bf16.mxu0 %v2998_v39  ;;  %v3049_v20 = vld [vmem:[#allocation2 + $0x4c4] ss:$16 sps:$4 sm:$0xff]   ;;  %v3047_v22 = vld [vmem:[#allocation2 + $0x4c0] ss:$16 sps:$4 sm:$0xff]  }
  0x31   :  { %1711 = vmatprep.subr.bf16.mxu1 %v3000_v40  ;;  %v3052_v21 = vld [vmem:[#allocation2 + $0x6c4] ss:$16 sps:$4 sm:$0xff]   ;;  %v3050_v23 = vld [vmem:[#allocation2 + $0x6c0] ss:$16 sps:$4 sm:$0xff]  }
  0x32   :  { %v3055_v24 = vld [vmem:[#allocation2 + $0x4a4] ss:$16 sps:$4 sm:$0xff]   ;;  %v3053_v26 = vld [vmem:[#allocation2 + $0x4a0] ss:$16 sps:$4 sm:$0xff]  }
  0x33   :  { %1671 = vmatpush2.bf16.msra.mxu0 %v3002_v41  ;;  %v3058_v25 = vld [vmem:[#allocation2 + $0x6a4] ss:$16 sps:$4 sm:$0xff]   ;;  %v3056_v27 = vld [vmem:[#allocation2 + $0x6a0] ss:$16 sps:$4 sm:$0xff]  }
  0x34   :  { %1712 = vmatpush2.bf16.msra.mxu1 %v3003_v44  ;;  %1672 = vmatprep.subr.bf16.mxu0 %v3004_v45  ;;  %v3061_v28 = vld [vmem:[#allocation2 + $0x484] ss:$16 sps:$4 sm:$0xff]   ;;  %v3059_v30 = vld [vmem:[#allocation2 + $0x480] ss:$16 sps:$4 sm:$0xff]   ;;  %v3521_v44 = vrot.slane %v41_v42, %v3498_v49  ;;  %v61_v45 = vcombine.high %v41_v42, %v41_v42  ;;  %v3153_v42 = vld [vmem:[#allocation2 + $0x2a8] ss:$16 sps:$4 sm:$0xff]  }
  0x35   :  { %1713 = vmatprep.subr.bf16.mxu1 %v3006_v46  ;;  %v3064_v29 = vld [vmem:[#allocation2 + $0x684] ss:$16 sps:$4 sm:$0xff]   ;;  %v3062_v31 = vld [vmem:[#allocation2 + $0x680] ss:$16 sps:$4 sm:$0xff]  }
  0x36   :  { %v3067_v32 = vld [vmem:[#allocation2 + $0x464] ss:$16 sps:$4 sm:$0xff]   ;;  %v3065_v34 = vld [vmem:[#allocation2 + $0x460] ss:$16 sps:$4 sm:$0xff]  }
  0x37   :  { %1673 = vmatpush2.bf16.msra.mxu0 %v3008_v47  ;;  %v3070_v33 = vld [vmem:[#allocation2 + $0x664] ss:$16 sps:$4 sm:$0xff]   ;;  %v3068_v35 = vld [vmem:[#allocation2 + $0x660] ss:$16 sps:$4 sm:$0xff]  }
  0x38   :  { %1714 = vmatpush2.bf16.msra.mxu1 %v3009_v48  ;;  %1674 = vmatprep.subr.bf16.mxu0 %v3010_v50  ;;  %v3073_v36 = vld [vmem:[#allocation2 + $0x444] ss:$16 sps:$4 sm:$0xff]   ;;  %v3071_v38 = vld [vmem:[#allocation2 + $0x440] ss:$16 sps:$4 sm:$0xff]   ;;  %v76_v48 = vcombine.high %v3521_v44, %v3521_v44  ;;  %v3526_v50 = vrot.slane %v61_v45, %v3498_v49  ;;  %v3161_v45 = vld [vmem:[#allocation2 + $0x28c] ss:$16 sps:$4 sm:$0xff]  }
  0x39   :  { %1715 = vmatprep.subr.bf16.mxu1 %v3012_v51  ;;  %v3076_v37 = vld [vmem:[#allocation2 + $0x644] ss:$16 sps:$4 sm:$0xff]   ;;  %v3074_v39 = vld [vmem:[#allocation2 + $0x640] ss:$16 sps:$4 sm:$0xff]  }
  0x3a   :  { %v3079_v40 = vld [vmem:[#allocation2 + $0x424] ss:$16 sps:$4 sm:$0xff]   ;;  %v3077_v46 = vld [vmem:[#allocation2 + $0x420] ss:$16 sps:$4 sm:$0xff]   ;;  %v77_v54 = vcombine.high %v3526_v50, %v3526_v50 }
  0x3b   :  { %1675 = vmatpush2.bf16.msra.mxu0 %v3014_v53  ;;  %v3082_v41 = vld [vmem:[#allocation2 + $0x624] ss:$16 sps:$4 sm:$0xff]   ;;  %v3080_v47 = vld [vmem:[#allocation2 + $0x620] ss:$16 sps:$4 sm:$0xff]   ;;  %v3528_v53 = vpack.c.bf16 %v76_v48, %v76_v48  ;;  %v3164_v48 = vld [vmem:[#allocation2 + $0x6c] ss:$16 sps:$4 sm:$0xff]  }
  0x3c   :  { %1716 = vmatpush2.bf16.msra.mxu1 %v3015_v56  ;;  %1676 = vmatprep.subr.bf16.mxu0 %v3016_v57  ;;  %v3085_v51 = vld [vmem:[#allocation2 + $0x404] ss:$16 sps:$4 sm:$0xff]   ;;  %v3083_v55 = vld [vmem:[#allocation2 + $0x400] ss:$16 sps:$4 sm:$0xff]   ;;  %v3532_v57 = vpack.c.bf16 %v77_v54, %v77_v54  ;;  %v3168_v54 = vld [vmem:[#allocation2 + $0x48] ss:$16 sps:$4 sm:$0xff]  }
  0x3d   :  { %1717 = vmatprep.subr.bf16.mxu1 %v3018_v58  ;;  %v3088_v52 = vld [vmem:[#allocation2 + $0x604] ss:$16 sps:$4 sm:$0xff]   ;;  %v3086_v56 = vld [vmem:[#allocation2 + $0x600] ss:$16 sps:$4 sm:$0xff]  }
  0x3e   :  { %v3091_v58 = vld [vmem:[#allocation2 + $0x5e4] ss:$16 sps:$4 sm:$0xff]   ;;  %v3089_v59 = vld [vmem:[#allocation2 + $0x5e0] ss:$16 sps:$4 sm:$0xff]  }
  0x3f   :  { %1677 = vmatpush2.bf16.msra.mxu0 %v3020_v61  ;;  %v3094_v49 = vld [vmem:[#allocation2 + $0x7e4] ss:$16 sps:$4 sm:$0xff]   ;;  %v3092_v60 = vld [vmem:[#allocation2 + $0x7e0] ss:$16 sps:$4 sm:$0xff]  }
  0x40   :  { %1718 = vmatpush2.bf16.msra.mxu1 %v3021_v0  ;;  %1678 = vmatprep.subr.bf16.mxu0 %v3022_v1  ;;  %v3097_v61 = vld [vmem:[#allocation2 + $0x5c4] ss:$16 sps:$4 sm:$0xff]   ;;  %v3095_v0 = vld [vmem:[#allocation2 + $0x5c0] ss:$16 sps:$4 sm:$0xff]  }
  0x41   :  { %1719 = vmatprep.subr.bf16.mxu1 %v3024_v2  ;;  %v3100_v63 = vld [vmem:[#allocation2 + $0x7c4] ss:$16 sps:$4 sm:$0xff]   ;;  %v3098_v1 = vld [vmem:[#allocation2 + $0x7c0] ss:$16 sps:$4 sm:$0xff]  }
  0x42   :  { %v3103_v2 = vld [vmem:[#allocation2 + $0x5a4] ss:$16 sps:$4 sm:$0xff]  }
  0x43   :  { %1679 = vmatpush2.bf16.msra.mxu0 %v3026_v4  ;;  %v3106_v4 = vld [vmem:[#allocation2 + $0x7a4] ss:$16 sps:$4 sm:$0xff]  }
  0x44   :  { %1720 = vmatpush2.bf16.msra.mxu1 %v3027_v5  ;;  %1680 = vmatprep.subr.bf16.mxu0 %v3028_v6  ;;  %v3101_v5 = vld [vmem:[#allocation2 + $0x5a0] ss:$16 sps:$4 sm:$0xff]  }
  0x45   :  { %1721 = vmatprep.subr.bf16.mxu1 %v3030_v7  ;;  %v3104_v6 = vld [vmem:[#allocation2 + $0x7a0] ss:$16 sps:$4 sm:$0xff]   ;;  %v3109_v7 = vld [vmem:[#allocation2 + $0x584] ss:$16 sps:$4 sm:$0xff]  }
  0x47   :  { %1681 = vmatpush2.bf16.msra.mxu0 %v3032_v8  ;;  %v3112_v8 = vld [vmem:[#allocation2 + $0x784] ss:$16 sps:$4 sm:$0xff]  }
  0x48   :  { %1722 = vmatpush2.bf16.msra.mxu1 %v3033_v9  ;;  %1682 = vmatprep.subr.bf16.mxu0 %v3034_v10  ;;  %v3107_v9 = vld [vmem:[#allocation2 + $0x580] ss:$16 sps:$4 sm:$0xff]  }
  0x49   :  { %1723 = vmatprep.subr.bf16.mxu1 %v3036_v11  ;;  %v3110_v10 = vld [vmem:[#allocation2 + $0x780] ss:$16 sps:$4 sm:$0xff]   ;;  %v3115_v11 = vld [vmem:[#allocation2 + $0x564] ss:$16 sps:$4 sm:$0xff]  }
  0x4b   :  { %1683 = vmatpush2.bf16.msra.mxu0 %v3038_v12  ;;  %v3118_v12 = vld [vmem:[#allocation2 + $0x764] ss:$16 sps:$4 sm:$0xff]  }
  0x4c   :  { %1724 = vmatpush2.bf16.msra.mxu1 %v3039_v13  ;;  %1734 = vmatprep.subr.bf16.mxu0 %v3043_v14  ;;  %v3113_v13 = vld [vmem:[#allocation2 + $0x560] ss:$16 sps:$4 sm:$0xff]  }
  0x4d   :  { %1775 = vmatprep.subr.bf16.mxu1 %v3046_v15  ;;  %v3116_v14 = vld [vmem:[#allocation2 + $0x760] ss:$16 sps:$4 sm:$0xff]   ;;  %v3121_v15 = vld [vmem:[#allocation2 + $0x544] ss:$16 sps:$4 sm:$0xff]  }
  0x4e   :  { %1685 = vmatmul.mubr.bf16.vlgmr.msra.gmra.mxu0 %v3511_v16 }
  0x4f   :  { %1726 = vmatmul.mubr.bf16.vlgmr.msra.gmra.mxu1 %v3513_v17  ;;  %1735 = vmatpush1.bf16.msra.mxu0 %v3041_v18  ;;  %v3124_v18 = vld [vmem:[#allocation2 + $0x744] ss:$16 sps:$4 sm:$0xff]  }
  0x50   :  { %1776 = vmatpush1.bf16.msra.mxu1 %v3044_v19  ;;  %1736 = vmatprep.subr.bf16.mxu0 %v3049_v20  ;;  %v3119_v19 = vld [vmem:[#allocation2 + $0x540] ss:$16 sps:$4 sm:$0xff]  }
  0x51   :  { %1777 = vmatprep.subr.bf16.mxu1 %v3052_v21  ;;  %1766 = vmatprep.mubr.bf16.mxu0 %v3528_v53  ;;  %v3122_v20 = vld [vmem:[#allocation2 + $0x740] ss:$16 sps:$4 sm:$0xff]   ;;  %v3127_v21 = vld [vmem:[#allocation2 + $0x524] ss:$16 sps:$4 sm:$0xff]  }
  0x52   :  { %1807 = vmatprep.mubr.bf16.mxu1 %v3532_v57 }
  0x53   :  { %1737 = vmatpush1.bf16.msra.mxu0 %v3047_v22  ;;  %v3130_v22 = vld [vmem:[#allocation2 + $0x724] ss:$16 sps:$4 sm:$0xff]  }
  0x54   :  { %1778 = vmatpush1.bf16.msra.mxu1 %v3050_v23  ;;  %1738 = vmatprep.subr.bf16.mxu0 %v3055_v24  ;;  %v3125_v23 = vld [vmem:[#allocation2 + $0x520] ss:$16 sps:$4 sm:$0xff]  }
  0x55   :  { %1779 = vmatprep.subr.bf16.mxu1 %v3058_v25  ;;  %v3128_v24 = vld [vmem:[#allocation2 + $0x720] ss:$16 sps:$4 sm:$0xff]   ;;  %v3133_v25 = vld [vmem:[#allocation2 + $0x504] ss:$16 sps:$4 sm:$0xff]  }
  0x57   :  { %1739 = vmatpush1.bf16.msra.mxu0 %v3053_v26  ;;  %v3136_v26 = vld [vmem:[#allocation2 + $0x704] ss:$16 sps:$4 sm:$0xff]  }
  0x58   :  { %1780 = vmatpush1.bf16.msra.mxu1 %v3056_v27  ;;  %1740 = vmatprep.subr.bf16.mxu0 %v3061_v28  ;;  %v3131_v27 = vld [vmem:[#allocation2 + $0x500] ss:$16 sps:$4 sm:$0xff]  }
  0x59   :  { %1781 = vmatprep.subr.bf16.mxu1 %v3064_v29  ;;  %v3134_v28 = vld [vmem:[#allocation2 + $0x700] ss:$16 sps:$4 sm:$0xff]   ;;  %v3140_v29 = vld [vmem:[#allocation2 + $0xec] ss:$16 sps:$4 sm:$0xff]  }
  0x5b   :  { %1741 = vmatpush1.bf16.msra.mxu0 %v3059_v30  ;;  %v3143_v30 = vld [vmem:[#allocation2 + $0x2ec] ss:$16 sps:$4 sm:$0xff]  }
  0x5c   :  { %1782 = vmatpush1.bf16.msra.mxu1 %v3062_v31  ;;  %1742 = vmatprep.subr.bf16.mxu0 %v3067_v32  ;;  %v3538_v31 = vpack.c.bf16 %v3521_v44, %v3521_v44  ;;  %v3542_v32 = vpack.c.bf16 %v3526_v50, %v3526_v50  ;;  %v3158_v44 = vld [vmem:[#allocation2 + $0x8c] ss:$16 sps:$4 sm:$0xff]  }
  0x5d   :  { %1783 = vmatprep.subr.bf16.mxu1 %v3070_v33  ;;  %v3138_v33 = vld [vmem:[#allocation2 + $0xe8] ss:$16 sps:$4 sm:$0xff]   ;;  %v3167_v50 = vld [vmem:[#allocation2 + $0x26c] ss:$16 sps:$4 sm:$0xff]  }
  0x5f   :  { %1743 = vmatpush1.bf16.msra.mxu0 %v3065_v34  ;;  %v3141_v34 = vld [vmem:[#allocation2 + $0x2e8] ss:$16 sps:$4 sm:$0xff]  }
  0x60   :  { %1784 = vmatpush1.bf16.msra.mxu1 %v3068_v35  ;;  %1744 = vmatprep.subr.bf16.mxu0 %v3073_v36  ;;  %v3146_v35 = vld [vmem:[#allocation2 + $0xcc] ss:$16 sps:$4 sm:$0xff]  }
  0x61   :  { %1785 = vmatprep.subr.bf16.mxu1 %v3076_v37  ;;  %v3149_v36 = vld [vmem:[#allocation2 + $0x2cc] ss:$16 sps:$4 sm:$0xff]   ;;  %v3144_v37 = vld [vmem:[#allocation2 + $0xc8] ss:$16 sps:$4 sm:$0xff]  }
  0x63   :  { %1745 = vmatpush1.bf16.msra.mxu0 %v3071_v38  ;;  %v3147_v38 = vld [vmem:[#allocation2 + $0x2c8] ss:$16 sps:$4 sm:$0xff]  }
  0x64   :  { %1786 = vmatpush1.bf16.msra.mxu1 %v3074_v39  ;;  %1746 = vmatprep.subr.bf16.mxu0 %v3079_v40  ;;  %v3152_v39 = vld [vmem:[#allocation2 + $0xac] ss:$16 sps:$4 sm:$0xff]  }
  0x65   :  { %1787 = vmatprep.subr.bf16.mxu1 %v3082_v41  ;;  %v3155_v40 = vld [vmem:[#allocation2 + $0x2ac] ss:$16 sps:$4 sm:$0xff]   ;;  %v3150_v41 = vld [vmem:[#allocation2 + $0xa8] ss:$16 sps:$4 sm:$0xff]  }
  0x67   :  { %1747 = vmatpush1.bf16.msra.mxu0 %v3077_v46  ;;  %v3156_v46 = vld [vmem:[#allocation2 + $0x88] ss:$16 sps:$4 sm:$0xff]  }
  0x68   :  { %1788 = vmatpush1.bf16.msra.mxu1 %v3080_v47  ;;  %1748 = vmatprep.subr.bf16.mxu0 %v3085_v51  ;;  %v3159_v47 = vld [vmem:[#allocation2 + $0x288] ss:$16 sps:$4 sm:$0xff]   ;;  %v3170_v51 = vld [vmem:[#allocation2 + $0x4c] ss:$16 sps:$4 sm:$0xff]  }
  0x69   :  { %1789 = vmatprep.subr.bf16.mxu1 %v3088_v52  ;;  %v3173_v52 = vld [vmem:[#allocation2 + $0x24c] ss:$16 sps:$4 sm:$0xff]  }
  0x6b   :  { %1749 = vmatpush1.bf16.msra.mxu0 %v3083_v55  ;;  %v3171_v55 = vld [vmem:[#allocation2 + $0x248] ss:$16 sps:$4 sm:$0xff]  }
  0x6c   :  { %1790 = vmatpush1.bf16.msra.mxu1 %v3086_v56  ;;  %1750 = vmatprep.subr.bf16.mxu0 %v3091_v58  ;;  %v3176_v56 = vld [vmem:[#allocation2 + $0x2c] ss:$16 sps:$4 sm:$0xff]  }
  0x6d   :  { %1791 = vmatprep.subr.bf16.mxu1 %v3094_v49  ;;  %v3179_v58 = vld [vmem:[#allocation2 + $0x22c] ss:$16 sps:$4 sm:$0xff]   ;;  %v3174_v49 = vld [vmem:[#allocation2 + $0x28] ss:$16 sps:$4 sm:$0xff]  }
  0x6f   :  { %1751 = vmatpush2.bf16.msra.mxu0 %v3089_v59  ;;  %v3177_v59 = vld [vmem:[#allocation2 + $0x228] ss:$16 sps:$4 sm:$0xff]  }
  0x70   :  { %1792 = vmatpush2.bf16.msra.mxu1 %v3092_v60  ;;  %1752 = vmatprep.subr.bf16.mxu0 %v3097_v61  ;;  %v3182_v60 = vld [vmem:[#allocation2 + $0xc] ss:$16 sps:$4 sm:$0xff]  }
  0x71   :  { %1793 = vmatprep.subr.bf16.mxu1 %v3100_v63  ;;  %v3185_v61 = vld [vmem:[#allocation2 + $0x20c] ss:$16 sps:$4 sm:$0xff]   ;;  %v3180_v63 = vld [vmem:[#allocation2 + $0x8] ss:$16 sps:$4 sm:$0xff]  }
  0x73   :  { %1753 = vmatpush2.bf16.msra.mxu0 %v3095_v0  ;;  %v3183_v0 = vld [vmem:[#allocation2 + $0x208] ss:$16 sps:$4 sm:$0xff]  }
  0x74   :  { %1794 = vmatpush2.bf16.msra.mxu1 %v3098_v1  ;;  %1754 = vmatprep.subr.bf16.mxu0 %v3103_v2  ;;  %v3188_v1 = vld [vmem:[#allocation2 + $0x1ec] ss:$16 sps:$4 sm:$0xff]  }
  0x75   :  { %1795 = vmatprep.subr.bf16.mxu1 %v3106_v4  ;;  %v3191_v2 = vld [vmem:[#allocation2 + $0x3ec] ss:$16 sps:$4 sm:$0xff]   ;;  %v3186_v4 = vld [vmem:[#allocation2 + $0x1e8] ss:$16 sps:$4 sm:$0xff]  }
  0x77   :  { %1755 = vmatpush2.bf16.msra.mxu0 %v3101_v5  ;;  %v3189_v5 = vld [vmem:[#allocation2 + $0x3e8] ss:$16 sps:$4 sm:$0xff]  }
  0x78   :  { %1796 = vmatpush2.bf16.msra.mxu1 %v3104_v6  ;;  %1756 = vmatprep.subr.bf16.mxu0 %v3109_v7  ;;  %v3194_v6 = vld [vmem:[#allocation2 + $0x1cc] ss:$16 sps:$4 sm:$0xff]  }
  0x79   :  { %1797 = vmatprep.subr.bf16.mxu1 %v3112_v8  ;;  %v3197_v7 = vld [vmem:[#allocation2 + $0x3cc] ss:$16 sps:$4 sm:$0xff]   ;;  %v3192_v8 = vld [vmem:[#allocation2 + $0x1c8] ss:$16 sps:$4 sm:$0xff]  }
  0x7b   :  { %1757 = vmatpush2.bf16.msra.mxu0 %v3107_v9  ;;  %v3195_v9 = vld [vmem:[#allocation2 + $0x3c8] ss:$16 sps:$4 sm:$0xff]  }
  0x7c   :  { %1798 = vmatpush2.bf16.msra.mxu1 %v3110_v10  ;;  %1758 = vmatprep.subr.bf16.mxu0 %v3115_v11  ;;  %v3200_v10 = vld [vmem:[#allocation2 + $0x1ac] ss:$16 sps:$4 sm:$0xff]  }
  0x7d   :  { %1799 = vmatprep.subr.bf16.mxu1 %v3118_v12  ;;  %v3203_v11 = vld [vmem:[#allocation2 + $0x3ac] ss:$16 sps:$4 sm:$0xff]   ;;  %v3198_v12 = vld [vmem:[#allocation2 + $0x1a8] ss:$16 sps:$4 sm:$0xff]  }
  0x7f   :  { %1759 = vmatpush2.bf16.msra.mxu0 %v3113_v13  ;;  %v3201_v13 = vld [vmem:[#allocation2 + $0x3a8] ss:$16 sps:$4 sm:$0xff]  }
  0x80   :  { %1800 = vmatpush2.bf16.msra.mxu1 %v3116_v14  ;;  %1760 = vmatprep.subr.bf16.mxu0 %v3121_v15  ;;  %v3206_v14 = vld [vmem:[#allocation2 + $0x18c] ss:$16 sps:$4 sm:$0xff]  }
  0x81   :  { %1801 = vmatprep.subr.bf16.mxu1 %v3124_v18  ;;  %v3209_v15 = vld [vmem:[#allocation2 + $0x38c] ss:$16 sps:$4 sm:$0xff]   ;;  %v3204_v18 = vld [vmem:[#allocation2 + $0x188] ss:$16 sps:$4 sm:$0xff]  }
  0x83   :  { %1761 = vmatpush2.bf16.msra.mxu0 %v3119_v19  ;;  %v3207_v19 = vld [vmem:[#allocation2 + $0x388] ss:$16 sps:$4 sm:$0xff]  }
  0x84   :  { %1802 = vmatpush2.bf16.msra.mxu1 %v3122_v20  ;;  %1762 = vmatprep.subr.bf16.mxu0 %v3127_v21  ;;  %v3212_v20 = vld [vmem:[#allocation2 + $0x16c] ss:$16 sps:$4 sm:$0xff]  }
  0x85   :  { %1803 = vmatprep.subr.bf16.mxu1 %v3130_v22  ;;  %v3215_v21 = vld [vmem:[#allocation2 + $0x36c] ss:$16 sps:$4 sm:$0xff]   ;;  %v3210_v22 = vld [vmem:[#allocation2 + $0x168] ss:$16 sps:$4 sm:$0xff]  }
  0x87   :  { %1763 = vmatpush2.bf16.msra.mxu0 %v3125_v23  ;;  %v3213_v23 = vld [vmem:[#allocation2 + $0x368] ss:$16 sps:$4 sm:$0xff]  }
  0x88   :  { %1804 = vmatpush2.bf16.msra.mxu1 %v3128_v24  ;;  %1764 = vmatprep.subr.bf16.mxu0 %v3133_v25  ;;  %v3218_v24 = vld [vmem:[#allocation2 + $0x14c] ss:$16 sps:$4 sm:$0xff]  }
  0x89   :  { %1805 = vmatprep.subr.bf16.mxu1 %v3136_v26  ;;  %v3221_v25 = vld [vmem:[#allocation2 + $0x34c] ss:$16 sps:$4 sm:$0xff]   ;;  %v3216_v26 = vld [vmem:[#allocation2 + $0x148] ss:$16 sps:$4 sm:$0xff]  }
  0x8b   :  { %1765 = vmatpush2.bf16.msra.mxu0 %v3131_v27  ;;  %v3219_v27 = vld [vmem:[#allocation2 + $0x348] ss:$16 sps:$4 sm:$0xff]  }
  0x8c   :  { %1806 = vmatpush2.bf16.msra.mxu1 %v3134_v28  ;;  %1816 = vmatprep.subr.bf16.mxu0 %v3140_v29  ;;  %v3224_v28 = vld [vmem:[#allocation2 + $0x12c] ss:$16 sps:$4 sm:$0xff]  }
  0x8d   :  { %1857 = vmatprep.subr.bf16.mxu1 %v3143_v30  ;;  %v3227_v29 = vld [vmem:[#allocation2 + $0x32c] ss:$16 sps:$4 sm:$0xff]   ;;  %v3222_v30 = vld [vmem:[#allocation2 + $0x128] ss:$16 sps:$4 sm:$0xff]  }
  0x8e   :  { %1767 = vmatmul.mubr.bf16.vlgmr.msra.gmra.mxu0 %v3538_v31 }
  0x8f   :  { %1808 = vmatmul.mubr.bf16.vlgmr.msra.gmra.mxu1 %v3542_v32  ;;  %1817 = vmatpush1.bf16.msra.mxu0 %v3138_v33  ;;  %v3225_v33 = vld [vmem:[#allocation2 + $0x328] ss:$16 sps:$4 sm:$0xff]  }
  0x90   :  { %1858 = vmatpush1.bf16.msra.mxu1 %v3141_v34  ;;  %1818 = vmatprep.subr.bf16.mxu0 %v3146_v35  ;;  %v3230_v34 = vld [vmem:[#allocation2 + $0x10c] ss:$16 sps:$4 sm:$0xff]  }
  0x91   :  { %1859 = vmatprep.subr.bf16.mxu1 %v3149_v36  ;;  %1848 = vmatprep.mubr.bf16.mxu0 %v3505_v62  ;;  %v3162_v62 = vld [vmem:[#allocation2 + $0x68] ss:$16 sps:$4 sm:$0xff]   ;;  %v3233_v35 = vld [vmem:[#allocation2 + $0x30c] ss:$16 sps:$4 sm:$0xff]  }
  0x92   :  { %1889 = vmatprep.mubr.bf16.mxu1 %v3507_v3  ;;  %v3165_v3 = vld [vmem:[#allocation2 + $0x268] ss:$16 sps:$4 sm:$0xff]  }
  0x93   :  { %1819 = vmatpush1.bf16.msra.mxu0 %v3144_v37  ;;  %v3228_v36 = vld [vmem:[#allocation2 + $0x108] ss:$16 sps:$4 sm:$0xff]  }
  0x94   :  { %1860 = vmatpush1.bf16.msra.mxu1 %v3147_v38  ;;  %1820 = vmatprep.subr.bf16.mxu0 %v3152_v39  ;;  %v3231_v37 = vld [vmem:[#allocation2 + $0x308] ss:$16 sps:$4 sm:$0xff]   ;;  %v3236_v38 = vld [vmem:[#allocation2 + $0x4ec] ss:$16 sps:$4 sm:$0xff]  }
  0x95   :  { %1861 = vmatprep.subr.bf16.mxu1 %v3155_v40  ;;  %v3239_v39 = vld [vmem:[#allocation2 + $0x6ec] ss:$16 sps:$4 sm:$0xff]   ;;  %v3234_v40 = vld [vmem:[#allocation2 + $0x4e8] ss:$16 sps:$4 sm:$0xff]  }
  0x97   :  { %1821 = vmatpush1.bf16.msra.mxu0 %v3150_v41  ;;  %v3237_v41 = vld [vmem:[#allocation2 + $0x6e8] ss:$16 sps:$4 sm:$0xff]  }
  0x98   :  { %1862 = vmatpush1.bf16.msra.mxu1 %v3153_v42  ;;  %1822 = vmatprep.subr.bf16.mxu0 %v3158_v44  ;;  %v3242_v42 = vld [vmem:[#allocation2 + $0x4cc] ss:$16 sps:$4 sm:$0xff]  }
  0x99   :  { %1863 = vmatprep.subr.bf16.mxu1 %v3161_v45  ;;  %v3245_v44 = vld [vmem:[#allocation2 + $0x6cc] ss:$16 sps:$4 sm:$0xff]   ;;  %v3240_v45 = vld [vmem:[#allocation2 + $0x4c8] ss:$16 sps:$4 sm:$0xff]  }
  0x9b   :  { %1823 = vmatpush1.bf16.msra.mxu0 %v3156_v46  ;;  %v3243_v46 = vld [vmem:[#allocation2 + $0x6c8] ss:$16 sps:$4 sm:$0xff]  }
  0x9c   :  { %1864 = vmatpush1.bf16.msra.mxu1 %v3159_v47  ;;  %1824 = vmatprep.subr.bf16.mxu0 %v3164_v48  ;;  %v3248_v47 = vld [vmem:[#allocation2 + $0x4ac] ss:$16 sps:$4 sm:$0xff]  }
  0x9d   :  { %1865 = vmatprep.subr.bf16.mxu1 %v3167_v50  ;;  %v3251_v48 = vld [vmem:[#allocation2 + $0x6ac] ss:$16 sps:$4 sm:$0xff]   ;;  %v3246_v50 = vld [vmem:[#allocation2 + $0x4a8] ss:$16 sps:$4 sm:$0xff]  }
  0x9f   :  { %1825 = vmatpush1.bf16.msra.mxu0 %v3162_v62  ;;  %v3249_v62 = vld [vmem:[#allocation2 + $0x6a8] ss:$16 sps:$4 sm:$0xff]  }
  0xa0   :  { %1866 = vmatpush1.bf16.msra.mxu1 %v3165_v3  ;;  %1826 = vmatprep.subr.bf16.mxu0 %v3170_v51  ;;  %v3254_v3 = vld [vmem:[#allocation2 + $0x48c] ss:$16 sps:$4 sm:$0xff]   ;;  %v3255_v51 = vld [vmem:[#allocation2 + $0x688] ss:$16 sps:$4 sm:$0xff]  }
  0xa1   :  { %1867 = vmatprep.subr.bf16.mxu1 %v3173_v52  ;;  %v3260_v52 = vld [vmem:[#allocation2 + $0x46c] ss:$16 sps:$4 sm:$0xff]  }
  0xa3   :  { %1827 = vmatpush1.bf16.msra.mxu0 %v3168_v54  ;;  %v3263_v54 = vld [vmem:[#allocation2 + $0x66c] ss:$16 sps:$4 sm:$0xff]  }
  0xa4   :  { %1868 = vmatpush1.bf16.msra.mxu1 %v3171_v55  ;;  %1828 = vmatprep.subr.bf16.mxu0 %v3176_v56  ;;  %v3258_v55 = vld [vmem:[#allocation2 + $0x468] ss:$16 sps:$4 sm:$0xff]   ;;  %v3269_v56 = vld [vmem:[#allocation2 + $0x64c] ss:$16 sps:$4 sm:$0xff]  }
  0xa5   :  { %1869 = vmatprep.subr.bf16.mxu1 %v3179_v58  ;;  %v3264_v58 = vld [vmem:[#allocation2 + $0x448] ss:$16 sps:$4 sm:$0xff]  }
  0xa7   :  { %1829 = vmatpush1.bf16.msra.mxu0 %v3174_v49  ;;  %v3267_v49 = vld [vmem:[#allocation2 + $0x648] ss:$16 sps:$4 sm:$0xff]  }
  0xa8   :  { %1870 = vmatpush1.bf16.msra.mxu1 %v3177_v59  ;;  %1830 = vmatprep.subr.bf16.mxu0 %v3182_v60  ;;  %v3272_v59 = vld [vmem:[#allocation2 + $0x42c] ss:$16 sps:$4 sm:$0xff]  }
  0xa9   :  { %1871 = vmatprep.subr.bf16.mxu1 %v3185_v61  ;;  %v3275_v60 = vld [vmem:[#allocation2 + $0x62c] ss:$16 sps:$4 sm:$0xff]   ;;  %v3270_v61 = vld [vmem:[#allocation2 + $0x428] ss:$16 sps:$4 sm:$0xff]  }
  0xab   :  { %1831 = vmatpush1.bf16.msra.mxu0 %v3180_v63  ;;  %v3273_v63 = vld [vmem:[#allocation2 + $0x628] ss:$16 sps:$4 sm:$0xff]  }
  0xac   :  { %1872 = vmatpush1.bf16.msra.mxu1 %v3183_v0  ;;  %1832 = vmatprep.subr.bf16.mxu0 %v3188_v1  ;;  %v3278_v0 = vld [vmem:[#allocation2 + $0x40c] ss:$16 sps:$4 sm:$0xff]  }
  0xad   :  { %1873 = vmatprep.subr.bf16.mxu1 %v3191_v2  ;;  %v3281_v1 = vld [vmem:[#allocation2 + $0x60c] ss:$16 sps:$4 sm:$0xff]   ;;  %v3276_v2 = vld [vmem:[#allocation2 + $0x408] ss:$16 sps:$4 sm:$0xff]  }
  0xaf   :  { %1833 = vmatpush2.bf16.msra.mxu0 %v3186_v4  ;;  %v3279_v4 = vld [vmem:[#allocation2 + $0x608] ss:$16 sps:$4 sm:$0xff]  }
  0xb0   :  { %1874 = vmatpush2.bf16.msra.mxu1 %v3189_v5  ;;  %1834 = vmatprep.subr.bf16.mxu0 %v3194_v6  ;;  %v3284_v5 = vld [vmem:[#allocation2 + $0x5ec] ss:$16 sps:$4 sm:$0xff]  }
  0xb1   :  { %1875 = vmatprep.subr.bf16.mxu1 %v3197_v7  ;;  %v3287_v6 = vld [vmem:[#allocation2 + $0x7ec] ss:$16 sps:$4 sm:$0xff]   ;;  %v3282_v7 = vld [vmem:[#allocation2 + $0x5e8] ss:$16 sps:$4 sm:$0xff]  }
  0xb3   :  { %1835 = vmatpush2.bf16.msra.mxu0 %v3192_v8  ;;  %v3285_v8 = vld [vmem:[#allocation2 + $0x7e8] ss:$16 sps:$4 sm:$0xff]  }
  0xb4   :  { %1876 = vmatpush2.bf16.msra.mxu1 %v3195_v9  ;;  %1836 = vmatprep.subr.bf16.mxu0 %v3200_v10  ;;  %v3290_v9 = vld [vmem:[#allocation2 + $0x5cc] ss:$16 sps:$4 sm:$0xff]  }
  0xb5   :  { %1877 = vmatprep.subr.bf16.mxu1 %v3203_v11  ;;  %v3293_v10 = vld [vmem:[#allocation2 + $0x7cc] ss:$16 sps:$4 sm:$0xff]   ;;  %v3288_v11 = vld [vmem:[#allocation2 + $0x5c8] ss:$16 sps:$4 sm:$0xff]  }
  0xb7   :  { %1837 = vmatpush2.bf16.msra.mxu0 %v3198_v12  ;;  %v3291_v12 = vld [vmem:[#allocation2 + $0x7c8] ss:$16 sps:$4 sm:$0xff]  }
  0xb8   :  { %1878 = vmatpush2.bf16.msra.mxu1 %v3201_v13  ;;  %1838 = vmatprep.subr.bf16.mxu0 %v3206_v14  ;;  %v3296_v13 = vld [vmem:[#allocation2 + $0x5ac] ss:$16 sps:$4 sm:$0xff]  }
  0xb9   :  { %1879 = vmatprep.subr.bf16.mxu1 %v3209_v15  ;;  %v3299_v14 = vld [vmem:[#allocation2 + $0x7ac] ss:$16 sps:$4 sm:$0xff]   ;;  %v3294_v15 = vld [vmem:[#allocation2 + $0x5a8] ss:$16 sps:$4 sm:$0xff]  }
  0xbb   :  { %1839 = vmatpush2.bf16.msra.mxu0 %v3204_v18  ;;  %v3297_v18 = vld [vmem:[#allocation2 + $0x7a8] ss:$16 sps:$4 sm:$0xff]  }
  0xbc   :  { %1880 = vmatpush2.bf16.msra.mxu1 %v3207_v19  ;;  %1840 = vmatprep.subr.bf16.mxu0 %v3212_v20  ;;  %v3302_v19 = vld [vmem:[#allocation2 + $0x58c] ss:$16 sps:$4 sm:$0xff]  }
  0xbd   :  { %1881 = vmatprep.subr.bf16.mxu1 %v3215_v21  ;;  %v3305_v20 = vld [vmem:[#allocation2 + $0x78c] ss:$16 sps:$4 sm:$0xff]   ;;  %v3300_v21 = vld [vmem:[#allocation2 + $0x588] ss:$16 sps:$4 sm:$0xff]  }
  0xbf   :  { %1841 = vmatpush2.bf16.msra.mxu0 %v3210_v22  ;;  %v3303_v22 = vld [vmem:[#allocation2 + $0x788] ss:$16 sps:$4 sm:$0xff]  }
  0xc0   :  { %1882 = vmatpush2.bf16.msra.mxu1 %v3213_v23  ;;  %1842 = vmatprep.subr.bf16.mxu0 %v3218_v24  ;;  %v3308_v23 = vld [vmem:[#allocation2 + $0x56c] ss:$16 sps:$4 sm:$0xff]  }
  0xc1   :  { %1883 = vmatprep.subr.bf16.mxu1 %v3221_v25  ;;  %v3311_v24 = vld [vmem:[#allocation2 + $0x76c] ss:$16 sps:$4 sm:$0xff]   ;;  %v3306_v25 = vld [vmem:[#allocation2 + $0x568] ss:$16 sps:$4 sm:$0xff]  }
  0xc3   :  { %1843 = vmatpush2.bf16.msra.mxu0 %v3216_v26  ;;  %v3309_v26 = vld [vmem:[#allocation2 + $0x768] ss:$16 sps:$4 sm:$0xff]  }
  0xc4   :  { %1884 = vmatpush2.bf16.msra.mxu1 %v3219_v27  ;;  %1844 = vmatprep.subr.bf16.mxu0 %v3224_v28  ;;  %v3314_v27 = vld [vmem:[#allocation2 + $0x54c] ss:$16 sps:$4 sm:$0xff]  }
  0xc5   :  { %1885 = vmatprep.subr.bf16.mxu1 %v3227_v29  ;;  %v3317_v28 = vld [vmem:[#allocation2 + $0x74c] ss:$16 sps:$4 sm:$0xff]   ;;  %v3312_v29 = vld [vmem:[#allocation2 + $0x548] ss:$16 sps:$4 sm:$0xff]  }
  0xc7   :  { %1845 = vmatpush2.bf16.msra.mxu0 %v3222_v30  ;;  %v3315_v30 = vld [vmem:[#allocation2 + $0x748] ss:$16 sps:$4 sm:$0xff]  }
  0xc8   :  { %1886 = vmatpush2.bf16.msra.mxu1 %v3225_v33  ;;  %1846 = vmatprep.subr.bf16.mxu0 %v3230_v34  ;;  %v3320_v33 = vld [vmem:[#allocation2 + $0x52c] ss:$16 sps:$4 sm:$0xff]  }
  0xc9   :  { %1887 = vmatprep.subr.bf16.mxu1 %v3233_v35  ;;  %v3323_v34 = vld [vmem:[#allocation2 + $0x72c] ss:$16 sps:$4 sm:$0xff]   ;;  %v3318_v35 = vld [vmem:[#allocation2 + $0x528] ss:$16 sps:$4 sm:$0xff]  }
  0xcb   :  { %1847 = vmatpush2.bf16.msra.mxu0 %v3228_v36  ;;  %v3321_v36 = vld [vmem:[#allocation2 + $0x728] ss:$16 sps:$4 sm:$0xff]  }
  0xcc   :  { %1888 = vmatpush2.bf16.msra.mxu1 %v3231_v37  ;;  %1898 = vmatprep.subr.bf16.mxu0 %v3236_v38  ;;  %v3326_v37 = vld [vmem:[#allocation2 + $0x50c] ss:$16 sps:$4 sm:$0xff]  }
  0xcd   :  { %1939 = vmatprep.subr.bf16.mxu1 %v3239_v39  ;;  %v3329_v38 = vld [vmem:[#allocation2 + $0x70c] ss:$16 sps:$4 sm:$0xff]   ;;  %v3324_v39 = vld [vmem:[#allocation2 + $0x508] ss:$16 sps:$4 sm:$0xff]  }
  0xce   :  { %1849 = vmatmul.mubr.bf16.vlgmr.msra.gmra.mxu0 %v3511_v16  ;;  %v3257_v16 = vld [vmem:[#allocation2 + $0x68c] ss:$16 sps:$4 sm:$0xff]  }
  0xcf   :  { %1890 = vmatmul.mubr.bf16.vlgmr.msra.gmra.mxu1 %v3513_v17  ;;  %1899 = vmatpush1.bf16.msra.mxu0 %v3234_v40  ;;  %v3252_v17 = vld [vmem:[#allocation2 + $0x488] ss:$16 sps:$4 sm:$0xff]  }
  0xd0   :  { %1940 = vmatpush1.bf16.msra.mxu1 %v3237_v41  ;;  %1900 = vmatprep.subr.bf16.mxu0 %v3242_v42  ;;  %v3327_v40 = vld [vmem:[#allocation2 + $0x708] ss:$16 sps:$4 sm:$0xff]   ;;  %v3332_v41 = vld [vmem:[%s3887_s3 + $0x74] ss:$8 sps:$4 sm:$0xff]  }
  0xd1   :  { %1941 = vmatprep.subr.bf16.mxu1 %v3245_v44  ;;  %1930 = vmatprep.mubr.bf16.mxu0 %v3528_v53  ;;  %v3261_v53 = vld [vmem:[#allocation2 + $0x668] ss:$16 sps:$4 sm:$0xff]   ;;  %v3335_v44 = vld [vmem:[%s3887_s3 + $0x64] ss:$8 sps:$4 sm:$0xff]  }
  0xd2   :  { %1971 = vmatprep.mubr.bf16.mxu1 %v3532_v57  ;;  %v3266_v57 = vld [vmem:[#allocation2 + $0x44c] ss:$16 sps:$4 sm:$0xff]   ;;  %v3330_v42 = vld [vmem:[%s3887_s3 + $0x70] ss:$8 sps:$4 sm:$0xff]  }
  0xd3   :  { %1901 = vmatpush1.bf16.msra.mxu0 %v3240_v45 }
  0xd4   :  { %1942 = vmatpush1.bf16.msra.mxu1 %v3243_v46  ;;  %1902 = vmatprep.subr.bf16.mxu0 %v3248_v47  ;;  %v3333_v47 = vld [vmem:[%s3887_s3 + $0x60] ss:$8 sps:$4 sm:$0xff]  }
  0xd5   :  { %1943 = vmatprep.subr.bf16.mxu1 %v3251_v48 }
  0xd7   :  { %1903 = vmatpush1.bf16.msra.mxu0 %v3246_v50 }
  0xd8   :  { %1944 = vmatpush1.bf16.msra.mxu1 %v3249_v62  ;;  %1904 = vmatprep.subr.bf16.mxu0 %v3254_v3  ;;  %v3338_v62 = vld [vmem:[%s3887_s3 + $0x54] ss:$8 sps:$4 sm:$0xff]  }
  0xd9   :  { %1945 = vmatprep.subr.bf16.mxu1 %v3257_v16 }
  0xdb   :  { %1905 = vmatpush1.bf16.msra.mxu0 %v3252_v17 }
  0xdc   :  { %1946 = vmatpush1.bf16.msra.mxu1 %v3255_v51  ;;  %1906 = vmatprep.subr.bf16.mxu0 %v3260_v52  ;;  %v3341_v51 = vld [vmem:[%s3887_s3 + $0x44] ss:$8 sps:$4 sm:$0xff]   ;;  %v3378_v52 = vld [vmem:[%s3887_s3 + $0x170] ss:$8 sps:$4 sm:$0xff]  }
  0xdd   :  { %1947 = vmatprep.subr.bf16.mxu1 %v3263_v54  ;;  %v3380_v54 = vld [vmem:[%s3887_s3 + $0x174] ss:$8 sps:$4 sm:$0xff]  }
  0xdf   :  { %1907 = vmatpush1.bf16.msra.mxu0 %v3258_v55  ;;  %v3383_v55 = vld [vmem:[%s3887_s3 + $0x164] ss:$8 sps:$4 sm:$0xff]  }
  0xe0   :  { %1948 = vmatpush1.bf16.msra.mxu1 %v3261_v53  ;;  %1908 = vmatprep.subr.bf16.mxu0 %v3266_v57  ;;  %v3339_v53 = vld [vmem:[%s3887_s3 + $0x40] ss:$8 sps:$4 sm:$0xff]  }
  0xe1   :  { %1949 = vmatprep.subr.bf16.mxu1 %v3269_v56  ;;  %v3381_v57 = vld [vmem:[%s3887_s3 + $0x160] ss:$8 sps:$4 sm:$0xff]   ;;  %v3344_v56 = vld [vmem:[%s3887_s3 + $0x34] ss:$8 sps:$4 sm:$0xff]  }
  0xe3   :  { %1909 = vmatpush1.bf16.msra.mxu0 %v3264_v58  ;;  %v3386_v58 = vld [vmem:[%s3887_s3 + $0x154] ss:$8 sps:$4 sm:$0xff]  }
  0xe4   :  { %1950 = vmatpush1.bf16.msra.mxu1 %v3267_v49  ;;  %1910 = vmatprep.subr.bf16.mxu0 %v3272_v59  ;;  %v3342_v49 = vld [vmem:[%s3887_s3 + $0x30] ss:$8 sps:$4 sm:$0xff]  }
  0xe5   :  { %1951 = vmatprep.subr.bf16.mxu1 %v3275_v60  ;;  %v3384_v59 = vld [vmem:[%s3887_s3 + $0x150] ss:$8 sps:$4 sm:$0xff]   ;;  %v3347_v60 = vld [vmem:[%s3887_s3 + $0x24] ss:$8 sps:$4 sm:$0xff]  }
  0xe7   :  { %1911 = vmatpush1.bf16.msra.mxu0 %v3270_v61  ;;  %v3389_v61 = vld [vmem:[%s3887_s3 + $0x144] ss:$8 sps:$4 sm:$0xff]  }
  0xe8   :  { %1952 = vmatpush1.bf16.msra.mxu1 %v3273_v63  ;;  %1912 = vmatprep.subr.bf16.mxu0 %v3278_v0  ;;  %v3345_v63 = vld [vmem:[%s3887_s3 + $0x20] ss:$8 sps:$4 sm:$0xff]  }
  0xe9   :  { %1953 = vmatprep.subr.bf16.mxu1 %v3281_v1  ;;  %v3387_v0 = vld [vmem:[%s3887_s3 + $0x140] ss:$8 sps:$4 sm:$0xff]   ;;  %v3350_v1 = vld [vmem:[%s3887_s3 + $0x14] ss:$8 sps:$4 sm:$0xff]  }
  0xeb   :  { %1913 = vmatpush1.bf16.msra.mxu0 %v3276_v2  ;;  %v3392_v2 = vld [vmem:[%s3887_s3 + $0x134] ss:$8 sps:$4 sm:$0xff]  }
  0xec   :  { %1954 = vmatpush1.bf16.msra.mxu1 %v3279_v4  ;;  %1914 = vmatprep.subr.bf16.mxu0 %v3284_v5  ;;  %v3348_v4 = vld [vmem:[%s3887_s3 + $0x10] ss:$8 sps:$4 sm:$0xff]  }
  0xed   :  { %1955 = vmatprep.subr.bf16.mxu1 %v3287_v6  ;;  %v3390_v5 = vld [vmem:[%s3887_s3 + $0x130] ss:$8 sps:$4 sm:$0xff]   ;;  %v3353_v6 = vld [vmem:[%s3887_s3 + $0x4] ss:$8 sps:$4 sm:$0xff]  }
  0xef   :  { %1915 = vmatpush2.bf16.msra.mxu0 %v3282_v7  ;;  %v3395_v7 = vld [vmem:[%s3887_s3 + $0x124] ss:$8 sps:$4 sm:$0xff]  }
  0xf0   :  { %1956 = vmatpush2.bf16.msra.mxu1 %v3285_v8  ;;  %1916 = vmatprep.subr.bf16.mxu0 %v3290_v9  ;;  %v3351_v8 = vld [vmem:[%s3887_s3] ss:$8 sps:$4 sm:$0xff]  }
  0xf1   :  { %1957 = vmatprep.subr.bf16.mxu1 %v3293_v10  ;;  %v3393_v9 = vld [vmem:[%s3887_s3 + $0x120] ss:$8 sps:$4 sm:$0xff]   ;;  %v3356_v10 = vld [vmem:[%s3887_s3 + $0xf4] ss:$8 sps:$4 sm:$0xff]  }
  0xf3   :  { %1917 = vmatpush2.bf16.msra.mxu0 %v3288_v11  ;;  %v3398_v11 = vld [vmem:[%s3887_s3 + $0x114] ss:$8 sps:$4 sm:$0xff]  }
  0xf4   :  { %1958 = vmatpush2.bf16.msra.mxu1 %v3291_v12  ;;  %1918 = vmatprep.subr.bf16.mxu0 %v3296_v13  ;;  %v3354_v12 = vld [vmem:[%s3887_s3 + $0xf0] ss:$8 sps:$4 sm:$0xff]  }
  0xf5   :  { %1959 = vmatprep.subr.bf16.mxu1 %v3299_v14  ;;  %v3396_v13 = vld [vmem:[%s3887_s3 + $0x110] ss:$8 sps:$4 sm:$0xff]   ;;  %v3359_v14 = vld [vmem:[%s3887_s3 + $0xe4] ss:$8 sps:$4 sm:$0xff]  }
  0xf7   :  { %1919 = vmatpush2.bf16.msra.mxu0 %v3294_v15  ;;  %v3401_v15 = vld [vmem:[%s3887_s3 + $0x104] ss:$8 sps:$4 sm:$0xff]  }
  0xf8   :  { %1960 = vmatpush2.bf16.msra.mxu1 %v3297_v18  ;;  %1920 = vmatprep.subr.bf16.mxu0 %v3302_v19  ;;  %v3357_v18 = vld [vmem:[%s3887_s3 + $0xe0] ss:$8 sps:$4 sm:$0xff]  }
  0xf9   :  { %1961 = vmatprep.subr.bf16.mxu1 %v3305_v20  ;;  %v3399_v19 = vld [vmem:[%s3887_s3 + $0x100] ss:$8 sps:$4 sm:$0xff]   ;;  %v3362_v20 = vld [vmem:[%s3887_s3 + $0xd4] ss:$8 sps:$4 sm:$0xff]  }
  0xfb   :  { %1921 = vmatpush2.bf16.msra.mxu0 %v3300_v21  ;;  %v3404_v21 = vld [vmem:[%s3887_s3 + $0x1f4] ss:$8 sps:$4 sm:$0xff]  }
  0xfc   :  { %1962 = vmatpush2.bf16.msra.mxu1 %v3303_v22  ;;  %1922 = vmatprep.subr.bf16.mxu0 %v3308_v23  ;;  %v3360_v22 = vld [vmem:[%s3887_s3 + $0xd0] ss:$8 sps:$4 sm:$0xff]  }
  0xfd   :  { %1963 = vmatprep.subr.bf16.mxu1 %v3311_v24  ;;  %v3402_v23 = vld [vmem:[%s3887_s3 + $0x1f0] ss:$8 sps:$4 sm:$0xff]   ;;  %v3365_v24 = vld [vmem:[%s3887_s3 + $0xc4] ss:$8 sps:$4 sm:$0xff]  }
  0xff   :  { %1923 = vmatpush2.bf16.msra.mxu0 %v3306_v25  ;;  %v3407_v25 = vld [vmem:[%s3887_s3 + $0x1e4] ss:$8 sps:$4 sm:$0xff]  }
 0x100   :  { %1964 = vmatpush2.bf16.msra.mxu1 %v3309_v26  ;;  %1924 = vmatprep.subr.bf16.mxu0 %v3314_v27  ;;  %v3363_v26 = vld [vmem:[%s3887_s3 + $0xc0] ss:$8 sps:$4 sm:$0xff]  }
 0x101   :  { %1965 = vmatprep.subr.bf16.mxu1 %v3317_v28  ;;  %v3405_v27 = vld [vmem:[%s3887_s3 + $0x1e0] ss:$8 sps:$4 sm:$0xff]   ;;  %v3368_v28 = vld [vmem:[%s3887_s3 + $0xb4] ss:$8 sps:$4 sm:$0xff]  }
 0x103   :  { %1925 = vmatpush2.bf16.msra.mxu0 %v3312_v29  ;;  %v3410_v29 = vld [vmem:[%s3887_s3 + $0x1d4] ss:$8 sps:$4 sm:$0xff]  }
 0x104   :  { %1966 = vmatpush2.bf16.msra.mxu1 %v3315_v30  ;;  %1926 = vmatprep.subr.bf16.mxu0 %v3320_v33  ;;  %v3366_v30 = vld [vmem:[%s3887_s3 + $0xb0] ss:$8 sps:$4 sm:$0xff]  }
 0x105   :  { %1967 = vmatprep.subr.bf16.mxu1 %v3323_v34  ;;  %v3408_v33 = vld [vmem:[%s3887_s3 + $0x1d0] ss:$8 sps:$4 sm:$0xff]   ;;  %v3371_v34 = vld [vmem:[%s3887_s3 + $0xa4] ss:$8 sps:$4 sm:$0xff]  }
 0x107   :  { %1927 = vmatpush2.bf16.msra.mxu0 %v3318_v35  ;;  %v3413_v35 = vld [vmem:[%s3887_s3 + $0x1c4] ss:$8 sps:$4 sm:$0xff]  }
 0x108   :  { %1968 = vmatpush2.bf16.msra.mxu1 %v3321_v36  ;;  %1928 = vmatprep.subr.bf16.mxu0 %v3326_v37  ;;  %v3369_v36 = vld [vmem:[%s3887_s3 + $0xa0] ss:$8 sps:$4 sm:$0xff]  }
 0x109   :  { %1969 = vmatprep.subr.bf16.mxu1 %v3329_v38  ;;  %v3411_v37 = vld [vmem:[%s3887_s3 + $0x1c0] ss:$8 sps:$4 sm:$0xff]   ;;  %v3374_v38 = vld [vmem:[%s3887_s3 + $0x94] ss:$8 sps:$4 sm:$0xff]  }
 0x10b   :  { %1929 = vmatpush2.bf16.msra.mxu0 %v3324_v39  ;;  %v3416_v39 = vld [vmem:[%s3887_s3 + $0x1b4] ss:$8 sps:$4 sm:$0xff]  }
 0x10c   :  { %1970 = vmatpush2.bf16.msra.mxu1 %v3327_v40  ;;  %2384 = vmatprep.subr.bf16.mxu0 %v3332_v41  ;;  %v354_v40 = vsub.s32 0, %v3495_v43  ;;  %v3728_v41 = vld [vmem:[%s3886_s2] sm:$0xf] }
 0x10d   :  { %2425 = vmatprep.subr.bf16.mxu1 %v3380_v54  ;;  %v3417_v54 = vld [vmem:[%s3887_s3 + $0x1a0] ss:$8 sps:$4 sm:$0xff]  }
 0x10e   :  { %v3561_v45 = vpop.f32.mrf.mxu0  ;;  %1931 = vmatmul.mubr.bf16.vlgmr.msra.gmra.mxu0 %v3538_v31  ;;  %v3336_v31 = vld [vmem:[%s3887_s3 + $0x50] ss:$8 sps:$4 sm:$0xff]  }
 0x10f   :  { %v3563_v46 = vpop.f32.mrf.mxu1  ;;  %1972 = vmatmul.mubr.bf16.vlgmr.msra.gmra.mxu1 %v3542_v32  ;;  %2385 = vmatpush1.bf16.msra.mxu0 %v3330_v42  ;;  %v358_v42 = vsub.s32 1, %v3495_v43 }
 0x110   :  { %v3570_v48 = vpop.f32.mrf.mxu0  ;;  %2386 = vmatprep.subr.bf16.mxu0 %v3335_v44  ;;  %2426 = vmatpush1.bf16.msra.mxu1 %v3378_v52  ;;  %v3372_v44 = vld [vmem:[%s3887_s3 + $0x90] ss:$8 sps:$4 sm:$0xff]  }
 0x111   :  { %v3572_v50 = vpop.f32.mrf.mxu1  ;;  %2427 = vmatprep.subr.bf16.mxu1 %v3383_v55 }
 0x112   :  { %v1690_v3 = vpop.f32.mrf.mxu0 }
 0x113   :  { %v1731_v16 = vpop.f32.mrf.mxu1  ;;  %2387 = vmatpush1.bf16.msra.mxu0 %v3333_v47  ;;  %v3414_v47 = vld [vmem:[%s3887_s3 + $0x1b0] ss:$8 sps:$4 sm:$0xff]   ;;  %v355_v3 = vrot.slane %v3728_v41, %v354_v40 }
 0x114   :  { %v1691_v32 = vpop.f32.mrf.mxu0  ;;  %2388 = vmatprep.subr.bf16.mxu0 %v3338_v62  ;;  %2428 = vmatpush1.bf16.msra.mxu1 %v3381_v57  ;;  %v3377_v62 = vld [vmem:[%s3887_s3 + $0x84] ss:$8 sps:$4 sm:$0xff]   ;;  %v359_v16 = vrot.slane %v3728_v41, %v358_v42 }
 0x115   :  { %v1732_v17 = vpop.f32.mrf.mxu1  ;;  %2429 = vmatprep.subr.bf16.mxu1 %v3386_v58  ;;  %v1687_v32 = vadd.f32 %v3561_v45, %v355_v3  ;;  %v3422_v58 = vld [vmem:[%s3887_s3 + $0x194] ss:$8 sps:$4 sm:$0xff]   ;;  %v2472_v3 = vld [vmem:[%s3889_s5 + $0x20] sm:$0xff] }
 0x116   :  { %v1689_v17 = vadd.f32 %v3570_v48, %v359_v16  ;;  %v362_v16 = vsub.s32 2, %v3495_v43 }
 0x117   :  { %2389 = vmatpush1.bf16.msra.mxu0 %v3336_v31  ;;  %v3375_v31 = vld [vmem:[%s3887_s3 + $0x80] ss:$8 sps:$4 sm:$0xff]   ;;  %v1728_v52 = vadd.f32 %v3563_v46, %v1687_v32  ;;  %v3420_v46 = vld [vmem:[%s3887_s3 + $0x190] ss:$8 sps:$4 sm:$0xff]  }
 0x118   :  { %2390 = vmatprep.subr.bf16.mxu0 %v3341_v51  ;;  %2430 = vmatpush1.bf16.msra.mxu1 %v3384_v59  ;;  %v3419_v51 = vld [vmem:[%s3887_s3 + $0x1a4] ss:$8 sps:$4 sm:$0xff]   ;;  %v1730_v57 = vadd.f32 %v3572_v50, %v1689_v17  ;;  %v363_v32 = vrot.slane %v3728_v41, %v362_v16 }
 0x119   :  { %2431 = vmatprep.subr.bf16.mxu1 %v3389_v61 }
 0x11b   :  { %2391 = vmatpush1.bf16.msra.mxu0 %v3339_v53 }
 0x11c   :  { %2392 = vmatprep.subr.bf16.mxu0 %v3344_v56  ;;  %2432 = vmatpush1.bf16.msra.mxu1 %v3387_v0 }
 0x11d   :  { %2433 = vmatprep.subr.bf16.mxu1 %v3392_v2  ;;  %v3425_v2 = vld [vmem:[%s3887_s3 + $0x184] ss:$8 sps:$4 sm:$0xff]  }
 0x11f   :  { %2393 = vmatpush1.bf16.msra.mxu0 %v3342_v49 }
 0x120   :  { %2394 = vmatprep.subr.bf16.mxu0 %v3347_v60  ;;  %2434 = vmatpush1.bf16.msra.mxu1 %v3390_v5  ;;  %v3423_v5 = vld [vmem:[%s3887_s3 + $0x180] ss:$8 sps:$4 sm:$0xff]  }
 0x121   :  { %2435 = vmatprep.subr.bf16.mxu1 %v3395_v7 }
 0x123   :  { %2395 = vmatpush1.bf16.msra.mxu0 %v3345_v63 }
 0x124   :  { %2396 = vmatprep.subr.bf16.mxu0 %v3350_v1  ;;  %2436 = vmatpush1.bf16.msra.mxu1 %v3393_v9 }
 0x125   :  { %2437 = vmatprep.subr.bf16.mxu1 %v3398_v11 }
 0x127   :  { %2397 = vmatpush1.bf16.msra.mxu0 %v3348_v4 }
 0x128   :  { %2398 = vmatprep.subr.bf16.mxu0 %v3353_v6  ;;  %2438 = vmatpush1.bf16.msra.mxu1 %v3396_v13 }
 0x129   :  { %2439 = vmatprep.subr.bf16.mxu1 %v3401_v15 }
 0x12b   :  { %2399 = vmatpush1.bf16.msra.mxu0 %v3351_v8 }
 0x12c   :  { %2400 = vmatprep.subr.bf16.mxu0 %v3356_v10  ;;  %2440 = vmatpush1.bf16.msra.mxu1 %v3399_v19  ;;  %v2483_v19 = vld [vmem:[%s3889_s5 + $0x78] sm:$0xff] }
 0x12d   :  { %2441 = vmatprep.subr.bf16.mxu1 %v3404_v21  ;;  %v2482_v21 = vld [vmem:[%s3889_s5 + $0x70] sm:$0xff] }
 0x12f   :  { %2401 = vmatpush2.bf16.msra.mxu0 %v3354_v12 }
 0x130   :  { %2402 = vmatprep.subr.bf16.mxu0 %v3359_v14  ;;  %2442 = vmatpush2.bf16.msra.mxu1 %v3402_v23  ;;  %v2481_v23 = vld [vmem:[%s3889_s5 + $0x68] sm:$0xff] }
 0x131   :  { %2443 = vmatprep.subr.bf16.mxu1 %v3407_v25  ;;  %v2480_v25 = vld [vmem:[%s3889_s5 + $0x60] sm:$0xff] }
 0x133   :  { %2403 = vmatpush2.bf16.msra.mxu0 %v3357_v18  ;;  %v2499_v18 = vld [vmem:[%s3889_s5 + $0xf8] sm:$0xff] }
 0x134   :  { %2404 = vmatprep.subr.bf16.mxu0 %v3362_v20  ;;  %2444 = vmatpush2.bf16.msra.mxu1 %v3405_v27  ;;  %v2498_v20 = vld [vmem:[%s3889_s5 + $0xf0] sm:$0xff]  ;;  %v2479_v27 = vld [vmem:[%s3889_s5 + $0x58] sm:$0xff] }
 0x135   :  { %2445 = vmatprep.subr.bf16.mxu1 %v3410_v29  ;;  %v2478_v29 = vld [vmem:[%s3889_s5 + $0x50] sm:$0xff] }
 0x137   :  { %2405 = vmatpush2.bf16.msra.mxu0 %v3360_v22  ;;  %v2497_v22 = vld [vmem:[%s3889_s5 + $0xe8] sm:$0xff] }
 0x138   :  { %2406 = vmatprep.subr.bf16.mxu0 %v3365_v24  ;;  %2446 = vmatpush2.bf16.msra.mxu1 %v3408_v33  ;;  %v2496_v24 = vld [vmem:[%s3889_s5 + $0xe0] sm:$0xff]  ;;  %v2477_v33 = vld [vmem:[%s3889_s5 + $0x48] sm:$0xff] }
 0x139   :  { %2447 = vmatprep.subr.bf16.mxu1 %v3413_v35  ;;  %v2476_v35 = vld [vmem:[%s3889_s5 + $0x40] sm:$0xff] }
 0x13b   :  { %2407 = vmatpush2.bf16.msra.mxu0 %v3363_v26  ;;  %v2495_v26 = vld [vmem:[%s3889_s5 + $0xd8] sm:$0xff] }
 0x13c   :  { %2408 = vmatprep.subr.bf16.mxu0 %v3368_v28  ;;  %2448 = vmatpush2.bf16.msra.mxu1 %v3411_v37  ;;  %v2494_v28 = vld [vmem:[%s3889_s5 + $0xd0] sm:$0xff]  ;;  %v2475_v37 = vld [vmem:[%s3889_s5 + $0x38] sm:$0xff] }
 0x13d   :  { %2449 = vmatprep.subr.bf16.mxu1 %v3416_v39  ;;  %v2474_v39 = vld [vmem:[%s3889_s5 + $0x30] sm:$0xff] }
 0x13f   :  { %2409 = vmatpush2.bf16.msra.mxu0 %v3366_v30  ;;  %v2493_v30 = vld [vmem:[%s3889_s5 + $0xc8] sm:$0xff] }
 0x140   :  { %2410 = vmatprep.subr.bf16.mxu0 %v3371_v34  ;;  %2450 = vmatpush2.bf16.msra.mxu1 %v3414_v47  ;;  %v2492_v34 = vld [vmem:[%s3889_s5 + $0xc0] sm:$0xff]  ;;  %v2473_v47 = vld [vmem:[%s3889_s5 + $0x28] sm:$0xff] }
 0x141   :  { %2451 = vmatprep.subr.bf16.mxu1 %v3419_v51 }
 0x143   :  { %2411 = vmatpush2.bf16.msra.mxu0 %v3369_v36  ;;  %v2491_v36 = vld [vmem:[%s3889_s5 + $0xb8] sm:$0xff] }
 0x144   :  { %2412 = vmatprep.subr.bf16.mxu0 %v3374_v38  ;;  %2452 = vmatpush2.bf16.msra.mxu1 %v3417_v54  ;;  %v2490_v38 = vld [vmem:[%s3889_s5 + $0xb0] sm:$0xff] }
 0x145   :  { %2453 = vmatprep.subr.bf16.mxu1 %v3422_v58 }
 0x147   :  { %2413 = vmatpush2.bf16.msra.mxu0 %v3372_v44  ;;  %v2489_v44 = vld [vmem:[%s3889_s5 + $0xa8] sm:$0xff] }
 0x148   :  { %2414 = vmatprep.subr.bf16.mxu0 %v3377_v62  ;;  %2454 = vmatpush2.bf16.msra.mxu1 %v3420_v46  ;;  %v2488_v62 = vld [vmem:[%s3889_s5 + $0xa0] sm:$0xff] }
 0x149   :  { %2455 = vmatprep.subr.bf16.mxu1 %v3425_v2  ;;  %v2487_v2 = vld [vmem:[%s3889_s5 + $0x98] sm:$0xff] }
 0x14b   :  { %2415 = vmatpush2.bf16.msra.mxu0 %v3375_v31  ;;  %v366_v31 = vsub.s32 3, %v3495_v43 }
 0x14c   :  { %2456 = vmatpush2.bf16.msra.mxu1 %v3423_v5  ;;  %2905 = vmatprep.subr.mxu0 %v2499_v18  ;;  %v2471_v5 = vld [vmem:[%s3889_s5 + $0x18] sm:$0xff] }
 0x14d   :  { %v367_v17 = vrot.slane %v3728_v41, %v366_v31 }
 0x14e   :  { %v1768_v55 = vpop.f32.mrf.mxu0 }
 0x14f   :  { %v1809_v53 = vpop.f32.mrf.mxu1  ;;  %v1769_v56 = vadd.f32 %v1768_v55, %v1728_v52 }
 0x150   :  { %v1770_v45 = vpop.f32.mrf.mxu0 }
 0x151   :  { %v1811_v48 = vpop.f32.mrf.mxu1  ;;  %v1810_v49 = vadd.f32 %v1809_v53, %v1769_v56  ;;  %v1771_v59 = vadd.f32 %v1770_v45, %v1730_v57 }
 0x152   :  { %v1772_v60 = vpop.f32.mrf.mxu0 }
 0x153   :  { %v1813_v61 = vpop.f32.mrf.mxu1  ;;  %v1812_v63 = vadd.f32 %v1811_v48, %v1771_v59  ;;  %v1980_v50 = vmax.f32 %v1810_v49, 0.0 }
 0x154   :  { %v1773_v0 = vpop.f32.mrf.mxu0 }
 0x155   :  { %v1814_v1 = vpop.f32.mrf.mxu1  ;;  %v1981_v4 = vmax.f32 %v1812_v63, 0.0  ;;  %v1984_v7 = vpack.c.bf16 %v1980_v50, %v1980_v50 }
 0x157   :  { %v1985_v6 = vpack.c.bf16 %v1981_v4, %v1981_v4 }
 0x159   :  { %2416 = vmatprep.mubr.bf16.mxu0 %v1985_v6  ;;  %v2486_v6 = vld [vmem:[%s3889_s5 + $0x90] sm:$0xff] }
 0x15a   :  { %2417 = vmatmul.mubr.bf16.vlgmr.msra.gmra.mxu0 %v1984_v7 }
 0x15b   :  { %2906 = vmatpush3.msra.mxu0 %v2483_v19 }
 0x15c   :  { %2907 = vmatprep.subr.mxu0 %v2498_v20 }
 0x15d   :  { %2908 = vmatpush3.msra.mxu0 %v2482_v21 }
 0x15e   :  { %2909 = vmatprep.subr.mxu0 %v2497_v22 }
 0x15f   :  { %2910 = vmatpush3.msra.mxu0 %v2481_v23 }
 0x160   :  { %2911 = vmatprep.subr.mxu0 %v2496_v24 }
 0x161   :  { %2912 = vmatpush3.msra.mxu0 %v2480_v25 }
 0x162   :  { %2913 = vmatprep.subr.mxu0 %v2495_v26 }
 0x163   :  { %2914 = vmatpush3.msra.mxu0 %v2479_v27 }
 0x164   :  { %2915 = vmatprep.subr.mxu0 %v2494_v28 }
 0x165   :  { %2916 = vmatpush3.msra.mxu0 %v2478_v29 }
 0x166   :  { %2917 = vmatprep.subr.mxu0 %v2493_v30 }
 0x167   :  { %2918 = vmatpush3.msra.mxu0 %v2477_v33 }
 0x168   :  { %2919 = vmatprep.subr.mxu0 %v2492_v34 }
 0x169   :  { %2920 = vmatpush3.msra.mxu0 %v2476_v35 }
 0x16a   :  { %2921 = vmatprep.subr.mxu0 %v2491_v36 }
 0x16b   :  { %2922 = vmatpush3.msra.mxu0 %v2475_v37 }
 0x16c   :  { %2923 = vmatprep.subr.mxu0 %v2490_v38 }
 0x16d   :  { %2924 = vmatpush3.msra.mxu0 %v2474_v39 }
 0x16e   :  { %2925 = vmatprep.subr.mxu0 %v2489_v44 }
 0x16f   :  { %2926 = vmatpush3.msra.mxu0 %v2473_v47 }
 0x170   :  { %2927 = vmatprep.subr.mxu0 %v2488_v62 }
 0x171   :  { %2928 = vmatpush3.msra.mxu0 %v2472_v3 }
 0x172   :  { %2929 = vmatprep.subr.mxu0 %v2487_v2 }
 0x173   :  { %2930 = vmatpush3.msra.mxu0 %v2471_v5 }
 0x174   :  { %2931 = vmatprep.subr.mxu0 %v2486_v6 }
 0x18e   :  { %v1850_v8 = vpop.f32.mrf.mxu0 }
 0x18f   :  { %v1891_v9 = vpop.f32.mrf.mxu1  ;;  %v1851_v51 = vadd.f32 %v1850_v8, %v363_v32  ;;  %v2470_v8 = vld [vmem:[%s3889_s5 + $0x10] sm:$0xff] }
 0x190   :  { %v1852_v10 = vpop.f32.mrf.mxu0  ;;  %2932 = vmatpush3.msra.mxu0 %v2470_v8 }
 0x191   :  { %v1893_v11 = vpop.f32.mrf.mxu1  ;;  %v1853_v52 = vadd.f32 %v1852_v10, %v367_v17  ;;  %v1892_v54 = vadd.f32 %v1891_v9, %v1851_v51  ;;  %v2485_v9 = vld [vmem:[%s3889_s5 + $0x88] sm:$0xff] }
 0x192   :  { %v1854_v12 = vpop.f32.mrf.mxu0  ;;  %2933 = vmatprep.subr.mxu0 %v2485_v9 }
 0x193   :  { %v1895_v13 = vpop.f32.mrf.mxu1  ;;  %v1894_v57 = vadd.f32 %v1893_v11, %v1853_v52  ;;  %v2469_v11 = vld [vmem:[%s3889_s5 + $0x8] sm:$0xff]  ;;  %v2484_v12 = vld [vmem:[%s3889_s5 + $0x80] sm:$0xff] }
 0x194   :  { %v1855_v14 = vpop.f32.mrf.mxu0  ;;  %2934 = vmatpush3.msra.mxu0 %v2469_v11 }
 0x195   :  { %v1896_v15 = vpop.f32.mrf.mxu1  ;;  %2935 = vmatprep.subr.mxu0 %v2484_v12  ;;  %v2468_v14 = vld [vmem:[%s3889_s5] sm:$0xff] }
 0x196   :  { %2936 = vmatpush3.msra.mxu0 %v2468_v14  ;;  %v2052_v15 = vld [vmem:[%s3888_s4] sm:$0x3] }
 0x197   :  { %v2057_v18 = vrot.slane %v2052_v15, %v354_v40  ;;  %v2061_v19 = vrot.slane %v2052_v15, %v358_v42  ;;  %v2904_v40 = vld [vmem:[%s3890_s6] ss:$0 sm:$0xff] }
 0x1ce   :  { %v1932_v55 = vpop.f32.mrf.mxu0 }
 0x1cf   :  { %v1973_v53 = vpop.f32.mrf.mxu1  ;;  %v1933_v56 = vadd.f32 %v1932_v55, %v1892_v54 }
 0x1d0   :  { %v1934_v45 = vpop.f32.mrf.mxu0 }
 0x1d1   :  { %v1975_v48 = vpop.f32.mrf.mxu1  ;;  %v1974_v58 = vadd.f32 %v1973_v53, %v1933_v56  ;;  %v1935_v49 = vadd.f32 %v1934_v45, %v1894_v57 }
 0x1d2   :  { %v1936_v59 = vpop.f32.mrf.mxu0 }
 0x1d3   :  { %v1977_v46 = vpop.f32.mrf.mxu1  ;;  %v1976_v60 = vadd.f32 %v1975_v48, %v1935_v49  ;;  %v1982_v61 = vmax.f32 %v1974_v58, 0.0 }
 0x1d4   :  { %v1937_v63 = vpop.f32.mrf.mxu0 }
 0x1d5   :  { %v1978_v50 = vpop.f32.mrf.mxu1  ;;  %v1983_v0 = vmax.f32 %v1976_v60, 0.0  ;;  %v1986_v41 = vpack.c.bf16 %v1982_v61, %v1982_v61 }
 0x1d7   :  { %v1987_v1 = vpack.c.bf16 %v1983_v0, %v1983_v0 }
 0x1d9   :  { %2457 = vmatprep.mubr.bf16.mxu1 %v1987_v1 }
 0x1da   :  { %2458 = vmatmul.mubr.bf16.vlgmr.msra.gmra.mxu1 %v1986_v41 }
 0x21a   :  { %v2418_v4 = vpop.f32.mrf.mxu0 }
 0x21b   :  { %v2419_v20 = vadd.f32 %v2418_v4, %v2057_v18 }
 0x21c   :  { %v2420_v7 = vpop.f32.mrf.mxu0 }
 0x21d   :  { %v2421_v22 = vadd.f32 %v2420_v7, %v2061_v19 }
 0x21e   :  { %v2422_v10 = vpop.f32.mrf.mxu0 }
 0x220   :  { %v2423_v13 = vpop.f32.mrf.mxu0 }
 0x29a   :  { %v2459_v21 = vpop.f32.mrf.mxu1 }
 0x29b   :  { %v2460_v23 = vadd.f32 %v2459_v21, %v2419_v20 }
 0x29c   :  { %v2461_v24 = vpop.f32.mrf.mxu1 }
 0x29d   :  { %v2462_v25 = vadd.f32 %v2461_v24, %v2421_v22  ;;  %v2466_v28 = vmax.f32 %v2460_v23, 0.0 }
 0x29e   :  { %v2463_v26 = vpop.f32.mrf.mxu1 }
 0x29f   :  { %v2467_v27 = vmax.f32 %v2462_v25, 0.0 }
 0x2a0   :  { %v2464_v29 = vpop.f32.mrf.mxu1 }
 0x2a1   :  { %2571 = vmatprep.mubr.f32.mxu0 %v2467_v27 }
 0x2a2   :  { %2572 = vmatmul.mubr.f32.vlgmr.msra.gmra.mxu0 %v2466_v28 }
 0x362   :  { %v2937_v30 = vpop.f32.mrf.mxu0 }
 0x364   :  { %v2938_v33 = vpop.f32.mrf.mxu0 }
 0x365   :  { %v2939_v43 = vadd.f32 %v2938_v33, %v2937_v30 }
 0x367   :  { %v2574_v42 = vadd.f32 %v2939_v43, %v2904_v40 }
 0x369   :  { %2578 = vst.msk [vmem:[%s3891_s7] sm:$0x3] %vm2577_vm0, %v2574_v42 }
 0x36a   :  { %2583 = vsyncpa [#allocation3], 1 }

// kernel: pointnet_cls_forward.7
= control target key start
LH: loop header
LB: loop body
LE: loop exit
PB: predicated region body
PF: predicated region fallthrough
CT: control target
= control target key end

     0   :  { %v3458_v36 = vmov 1983009808   ;;  %v35_v38 = vlaneseq  ;;  %s4660_s0 = inlined_call_operand.vmem [shape: f32[2,1024], index: 0, kind: input, shape index: {}]   ;;  %s4661_s1 = inlined_call_operand.vmem [shape: bf16[1024,512], index: 1, kind: input, shape index: {}]   ;;  %s4662_s2 = inlined_call_operand.vmem [shape: f32[1,512], index: 2, kind: input, shape index: {}]   ;;  %s4663_s3 = inlined_call_operand.vmem [shape: bf16[512,256], index: 3, kind: input, shape index: {}]   ;;  %s4664_s4 = inlined_call_operand.vmem [shape: f32[1,256], index: 4, kind: input, shape index: {}]   ;;  %s4665_s5 = inlined_call_operand.vmem [shape: f32[256,2], index: 5, kind: input, shape index: {}]   ;;  %s4666_s6 = inlined_call_operand.vmem [shape: f32[1,2], index: 6, kind: input, shape index: {}]   ;;  %s4667_s7 = inlined_call_operand.hbm [shape: f32[2,2], index: 7, kind: output, shape index: {}]  }
   0x1   :  { %v2950_v0 = vld [vmem:[%s4661_s1 + $0xe4] ss:$16 sps:$4 sm:$0xff]   ;;  %v2954_v2 = vld [vmem:[%s4661_s1 + $0xe0] ss:$16 sps:$4 sm:$0xff]   ;;  %v33_v37 = vunpack.c.l.s4 %v3458_v36 }
   0x2   :  { %v2952_v1 = vld [vmem:[%s4661_s1 + $0x2e4] ss:$16 sps:$4 sm:$0xff]   ;;  %1639 = vmatprep.subr.bf16.mxu0 %v2950_v0  ;;  %v2955_v3 = vld [vmem:[%s4661_s1 + $0x2e0] ss:$16 sps:$4 sm:$0xff]   ;;  %v3617_v43 = vshrl.u32 %v35_v38, 7 }
   0x3   :  { %1680 = vmatprep.subr.bf16.mxu1 %v2952_v1  ;;  %v2956_v4 = vld [vmem:[%s4661_s1 + $0xc4] ss:$16 sps:$4 sm:$0xff]   ;;  %1640 = vmatpush1.bf16.msra.mxu0 %v2954_v2  ;;  %v2960_v6 = vld [vmem:[%s4661_s1 + $0xc0] ss:$16 sps:$4 sm:$0xff]   ;;  %v34_v42 = vunpack.c.0.s8 %v33_v37 }
   0x4   :  { %1681 = vmatpush1.bf16.msra.mxu1 %v2955_v3  ;;  %v2958_v5 = vld [vmem:[%s4661_s1 + $0x2c4] ss:$16 sps:$4 sm:$0xff]   ;;  %1641 = vmatprep.subr.bf16.mxu0 %v2956_v4  ;;  %v2961_v7 = vld [vmem:[%s4661_s1 + $0x2c0] ss:$16 sps:$4 sm:$0xff]  }
   0x5   :  { %1682 = vmatprep.subr.bf16.mxu1 %v2958_v5  ;;  %v2962_v8 = vld [vmem:[%s4661_s1 + $0xa4] ss:$16 sps:$4 sm:$0xff]   ;;  %v2966_v10 = vld [vmem:[%s4661_s1 + $0xa0] ss:$16 sps:$4 sm:$0xff]   ;;  %v3635_v49 = vsub.s32 %v34_v42, %v3617_v43  ;;  %v28_v42 = vld [vmem:[%s4660_s0 + $0x8] sm:$0xff] }
   0x6   :  { %v2964_v9 = vld [vmem:[%s4661_s1 + $0x2a4] ss:$16 sps:$4 sm:$0xff]   ;;  %v2967_v11 = vld [vmem:[%s4661_s1 + $0x2a0] ss:$16 sps:$4 sm:$0xff]  }
   0x7   :  { %1642 = vmatpush1.bf16.msra.mxu0 %v2960_v6  ;;  %v2968_v12 = vld [vmem:[%s4661_s1 + $0x84] ss:$16 sps:$4 sm:$0xff]   ;;  %v2972_v14 = vld [vmem:[%s4661_s1 + $0x80] ss:$16 sps:$4 sm:$0xff]  }
   0x8   :  { %1683 = vmatpush1.bf16.msra.mxu1 %v2961_v7  ;;  %1643 = vmatprep.subr.bf16.mxu0 %v2962_v8  ;;  %v2970_v13 = vld [vmem:[%s4661_s1 + $0x284] ss:$16 sps:$4 sm:$0xff]   ;;  %v2973_v15 = vld [vmem:[%s4661_s1 + $0x280] ss:$16 sps:$4 sm:$0xff]  }
   0x9   :  { %1684 = vmatprep.subr.bf16.mxu1 %v2964_v9  ;;  %v2974_v16 = vld [vmem:[%s4661_s1 + $0x64] ss:$16 sps:$4 sm:$0xff]   ;;  %v2978_v18 = vld [vmem:[%s4661_s1 + $0x60] ss:$16 sps:$4 sm:$0xff]  }
   0xa   :  { %v2976_v17 = vld [vmem:[%s4661_s1 + $0x264] ss:$16 sps:$4 sm:$0xff]   ;;  %v2979_v19 = vld [vmem:[%s4661_s1 + $0x260] ss:$16 sps:$4 sm:$0xff]  }
   0xb   :  { %1644 = vmatpush1.bf16.msra.mxu0 %v2966_v10  ;;  %v2980_v20 = vld [vmem:[%s4661_s1 + $0x44] ss:$16 sps:$4 sm:$0xff]   ;;  %v2984_v22 = vld [vmem:[%s4661_s1 + $0x40] ss:$16 sps:$4 sm:$0xff]  }
   0xc   :  { %1685 = vmatpush1.bf16.msra.mxu1 %v2967_v11  ;;  %1645 = vmatprep.subr.bf16.mxu0 %v2968_v12  ;;  %v2982_v21 = vld [vmem:[%s4661_s1 + $0x244] ss:$16 sps:$4 sm:$0xff]   ;;  %v2985_v23 = vld [vmem:[%s4661_s1 + $0x240] ss:$16 sps:$4 sm:$0xff]  }
   0xd   :  { %1686 = vmatprep.subr.bf16.mxu1 %v2970_v13  ;;  %v2986_v24 = vld [vmem:[%s4661_s1 + $0x24] ss:$16 sps:$4 sm:$0xff]   ;;  %v2990_v26 = vld [vmem:[%s4661_s1 + $0x20] ss:$16 sps:$4 sm:$0xff]  }
   0xe   :  { %v2988_v25 = vld [vmem:[%s4661_s1 + $0x224] ss:$16 sps:$4 sm:$0xff]   ;;  %v2991_v27 = vld [vmem:[%s4661_s1 + $0x220] ss:$16 sps:$4 sm:$0xff]  }
   0xf   :  { %1646 = vmatpush1.bf16.msra.mxu0 %v2972_v14  ;;  %v2992_v28 = vld [vmem:[%s4661_s1 + $0x4] ss:$16 sps:$4 sm:$0xff]   ;;  %v2996_v30 = vld [vmem:[%s4661_s1] ss:$16 sps:$4 sm:$0xff]  }
  0x10   :  { %1687 = vmatpush1.bf16.msra.mxu1 %v2973_v15  ;;  %1647 = vmatprep.subr.bf16.mxu0 %v2974_v16  ;;  %v2994_v29 = vld [vmem:[%s4661_s1 + $0x204] ss:$16 sps:$4 sm:$0xff]   ;;  %v2997_v31 = vld [vmem:[%s4661_s1 + $0x200] ss:$16 sps:$4 sm:$0xff]  }
  0x11   :  { %1688 = vmatprep.subr.bf16.mxu1 %v2976_v17  ;;  %v2998_v32 = vld [vmem:[%s4661_s1 + $0x1e4] ss:$16 sps:$4 sm:$0xff]   ;;  %v3002_v34 = vld [vmem:[%s4661_s1 + $0x1e0] ss:$16 sps:$4 sm:$0xff]  }
  0x12   :  { %v3000_v33 = vld [vmem:[%s4661_s1 + $0x3e4] ss:$16 sps:$4 sm:$0xff]   ;;  %v3003_v35 = vld [vmem:[%s4661_s1 + $0x3e0] ss:$16 sps:$4 sm:$0xff]  }
  0x13   :  { %1648 = vmatpush1.bf16.msra.mxu0 %v2978_v18  ;;  %v3004_v39 = vld [vmem:[%s4661_s1 + $0x1c4] ss:$16 sps:$4 sm:$0xff]   ;;  %v3008_v41 = vld [vmem:[%s4661_s1 + $0x1c0] ss:$16 sps:$4 sm:$0xff]  }
  0x14   :  { %1689 = vmatpush1.bf16.msra.mxu1 %v2979_v19  ;;  %1649 = vmatprep.subr.bf16.mxu0 %v2980_v20  ;;  %v3006_v40 = vld [vmem:[%s4661_s1 + $0x3c4] ss:$16 sps:$4 sm:$0xff]   ;;  %v3009_v44 = vld [vmem:[%s4661_s1 + $0x3c0] ss:$16 sps:$4 sm:$0xff]  }
  0x15   :  { %1690 = vmatprep.subr.bf16.mxu1 %v2982_v21  ;;  %v3010_v45 = vld [vmem:[%s4661_s1 + $0x1a4] ss:$16 sps:$4 sm:$0xff]   ;;  %v3014_v47 = vld [vmem:[%s4661_s1 + $0x1a0] ss:$16 sps:$4 sm:$0xff]  }
  0x16   :  { %v3012_v46 = vld [vmem:[%s4661_s1 + $0x3a4] ss:$16 sps:$4 sm:$0xff]   ;;  %v3015_v48 = vld [vmem:[%s4661_s1 + $0x3a0] ss:$16 sps:$4 sm:$0xff]  }
  0x17   :  { %1650 = vmatpush1.bf16.msra.mxu0 %v2984_v22  ;;  %v3016_v50 = vld [vmem:[%s4661_s1 + $0x184] ss:$16 sps:$4 sm:$0xff]   ;;  %v3020_v53 = vld [vmem:[%s4661_s1 + $0x180] ss:$16 sps:$4 sm:$0xff]  }
  0x18   :  { %1691 = vmatpush1.bf16.msra.mxu1 %v2985_v23  ;;  %1651 = vmatprep.subr.bf16.mxu0 %v2986_v24  ;;  %v3018_v51 = vld [vmem:[%s4661_s1 + $0x384] ss:$16 sps:$4 sm:$0xff]   ;;  %v3021_v56 = vld [vmem:[%s4661_s1 + $0x380] ss:$16 sps:$4 sm:$0xff]  }
  0x19   :  { %1692 = vmatprep.subr.bf16.mxu1 %v2988_v25  ;;  %v27_v52 = vld [vmem:[%s4660_s0] sm:$0xff] }
  0x1a   :  { %v38_v54 = vrot.slane %v27_v52, %v3635_v49  ;;  %v31_v55 = vcombine.high %v27_v52, %v27_v52  ;;  %v3022_v57 = vld [vmem:[%s4661_s1 + $0x164] ss:$16 sps:$4 sm:$0xff]   ;;  %v3026_v61 = vld [vmem:[%s4661_s1 + $0x160] ss:$16 sps:$4 sm:$0xff]  }
  0x1b   :  { %1652 = vmatpush1.bf16.msra.mxu0 %v2990_v26  ;;  %v3024_v58 = vld [vmem:[%s4661_s1 + $0x364] ss:$16 sps:$4 sm:$0xff]   ;;  %v3027_v0 = vld [vmem:[%s4661_s1 + $0x360] ss:$16 sps:$4 sm:$0xff]  }
  0x1c   :  { %1693 = vmatpush1.bf16.msra.mxu1 %v2991_v27  ;;  %1653 = vmatprep.subr.bf16.mxu0 %v2992_v28  ;;  %v46_v59 = vcombine.high %v38_v54, %v38_v54  ;;  %v45_v60 = vrot.slane %v31_v55, %v3635_v49  ;;  %v3028_v1 = vld [vmem:[%s4661_s1 + $0x144] ss:$16 sps:$4 sm:$0xff]   ;;  %v3032_v4 = vld [vmem:[%s4661_s1 + $0x140] ss:$16 sps:$4 sm:$0xff]   ;;  %v3714_v16 = vpack.c.bf16 %v38_v54, %v38_v54 }
  0x1d   :  { %1694 = vmatprep.subr.bf16.mxu1 %v2994_v29  ;;  %v3030_v2 = vld [vmem:[%s4661_s1 + $0x344] ss:$16 sps:$4 sm:$0xff]   ;;  %v3033_v5 = vld [vmem:[%s4661_s1 + $0x340] ss:$16 sps:$4 sm:$0xff]  }
  0x1e   :  { %v3663_v62 = vpack.c.bf16 %v46_v59, %v46_v59  ;;  %v47_v63 = vcombine.high %v45_v60, %v45_v60  ;;  %v3034_v6 = vld [vmem:[%s4661_s1 + $0x124] ss:$16 sps:$4 sm:$0xff]   ;;  %v3038_v8 = vld [vmem:[%s4661_s1 + $0x120] ss:$16 sps:$4 sm:$0xff]   ;;  %v3716_v17 = vpack.c.bf16 %v45_v60, %v45_v60 }
  0x1f   :  { %1654 = vmatpush1.bf16.msra.mxu0 %v2996_v30  ;;  %v3036_v7 = vld [vmem:[%s4661_s1 + $0x324] ss:$16 sps:$4 sm:$0xff]   ;;  %v3039_v9 = vld [vmem:[%s4661_s1 + $0x320] ss:$16 sps:$4 sm:$0xff]  }
  0x20   :  { %1695 = vmatpush1.bf16.msra.mxu1 %v2997_v31  ;;  %1655 = vmatprep.subr.bf16.mxu0 %v2998_v32  ;;  %v3674_v3 = vpack.c.bf16 %v47_v63, %v47_v63  ;;  %v3040_v10 = vld [vmem:[%s4661_s1 + $0x104] ss:$16 sps:$4 sm:$0xff]   ;;  %v3044_v12 = vld [vmem:[%s4661_s1 + $0x100] ss:$16 sps:$4 sm:$0xff]  }
  0x21   :  { %1696 = vmatprep.subr.bf16.mxu1 %v3000_v33  ;;  %1671 = vmatprep.mubr.bf16.mxu0 %v3663_v62  ;;  %v3042_v11 = vld [vmem:[%s4661_s1 + $0x304] ss:$16 sps:$4 sm:$0xff]   ;;  %v3045_v13 = vld [vmem:[%s4661_s1 + $0x300] ss:$16 sps:$4 sm:$0xff]  }
  0x22   :  { %1712 = vmatprep.mubr.bf16.mxu1 %v3674_v3  ;;  %v3049_v14 = vld [vmem:[%s4661_s1 + $0x4e4] ss:$16 sps:$4 sm:$0xff]   ;;  %v3047_v18 = vld [vmem:[%s4661_s1 + $0x4e0] ss:$16 sps:$4 sm:$0xff]  }
  0x23   :  { %1656 = vmatpush2.bf16.msra.mxu0 %v3002_v34  ;;  %v3052_v15 = vld [vmem:[%s4661_s1 + $0x6e4] ss:$16 sps:$4 sm:$0xff]   ;;  %v3050_v19 = vld [vmem:[%s4661_s1 + $0x6e0] ss:$16 sps:$4 sm:$0xff]  }
  0x24   :  { %1697 = vmatpush2.bf16.msra.mxu1 %v3003_v35  ;;  %1657 = vmatprep.subr.bf16.mxu0 %v3004_v39  ;;  %v3055_v20 = vld [vmem:[%s4661_s1 + $0x4c4] ss:$16 sps:$4 sm:$0xff]   ;;  %v3053_v22 = vld [vmem:[%s4661_s1 + $0x4c0] ss:$16 sps:$4 sm:$0xff]  }
  0x25   :  { %1698 = vmatprep.subr.bf16.mxu1 %v3006_v40  ;;  %v3058_v21 = vld [vmem:[%s4661_s1 + $0x6c4] ss:$16 sps:$4 sm:$0xff]   ;;  %v3056_v23 = vld [vmem:[%s4661_s1 + $0x6c0] ss:$16 sps:$4 sm:$0xff]  }
  0x26   :  { %v3061_v24 = vld [vmem:[%s4661_s1 + $0x4a4] ss:$16 sps:$4 sm:$0xff]   ;;  %v3059_v26 = vld [vmem:[%s4661_s1 + $0x4a0] ss:$16 sps:$4 sm:$0xff]  }
  0x27   :  { %1658 = vmatpush2.bf16.msra.mxu0 %v3008_v41  ;;  %v3064_v25 = vld [vmem:[%s4661_s1 + $0x6a4] ss:$16 sps:$4 sm:$0xff]   ;;  %v3062_v27 = vld [vmem:[%s4661_s1 + $0x6a0] ss:$16 sps:$4 sm:$0xff]  }
  0x28   :  { %1699 = vmatpush2.bf16.msra.mxu1 %v3009_v44  ;;  %1659 = vmatprep.subr.bf16.mxu0 %v3010_v45  ;;  %v3067_v28 = vld [vmem:[%s4661_s1 + $0x484] ss:$16 sps:$4 sm:$0xff]   ;;  %v3065_v30 = vld [vmem:[%s4661_s1 + $0x480] ss:$16 sps:$4 sm:$0xff]   ;;  %v3796_v44 = vrot.slane %v28_v42, %v3635_v49  ;;  %v48_v45 = vcombine.high %v28_v42, %v28_v42  ;;  %v3159_v42 = vld [vmem:[%s4661_s1 + $0x2a8] ss:$16 sps:$4 sm:$0xff]  }
  0x29   :  { %1700 = vmatprep.subr.bf16.mxu1 %v3012_v46  ;;  %v3070_v29 = vld [vmem:[%s4661_s1 + $0x684] ss:$16 sps:$4 sm:$0xff]   ;;  %v3068_v31 = vld [vmem:[%s4661_s1 + $0x680] ss:$16 sps:$4 sm:$0xff]  }
  0x2a   :  { %v3073_v32 = vld [vmem:[%s4661_s1 + $0x464] ss:$16 sps:$4 sm:$0xff]   ;;  %v3071_v34 = vld [vmem:[%s4661_s1 + $0x460] ss:$16 sps:$4 sm:$0xff]  }
  0x2b   :  { %1660 = vmatpush2.bf16.msra.mxu0 %v3014_v47  ;;  %v3076_v33 = vld [vmem:[%s4661_s1 + $0x664] ss:$16 sps:$4 sm:$0xff]   ;;  %v3074_v35 = vld [vmem:[%s4661_s1 + $0x660] ss:$16 sps:$4 sm:$0xff]  }
  0x2c   :  { %1701 = vmatpush2.bf16.msra.mxu1 %v3015_v48  ;;  %1661 = vmatprep.subr.bf16.mxu0 %v3016_v50  ;;  %v3079_v36 = vld [vmem:[%s4661_s1 + $0x444] ss:$16 sps:$4 sm:$0xff]   ;;  %v3077_v38 = vld [vmem:[%s4661_s1 + $0x440] ss:$16 sps:$4 sm:$0xff]   ;;  %v63_v48 = vcombine.high %v3796_v44, %v3796_v44  ;;  %v3807_v50 = vrot.slane %v48_v45, %v3635_v49  ;;  %v3165_v45 = vld [vmem:[%s4661_s1 + $0x288] ss:$16 sps:$4 sm:$0xff]  }
  0x2d   :  { %1702 = vmatprep.subr.bf16.mxu1 %v3018_v51  ;;  %v3082_v37 = vld [vmem:[%s4661_s1 + $0x644] ss:$16 sps:$4 sm:$0xff]   ;;  %v3080_v39 = vld [vmem:[%s4661_s1 + $0x640] ss:$16 sps:$4 sm:$0xff]  }
  0x2e   :  { %v3085_v40 = vld [vmem:[%s4661_s1 + $0x424] ss:$16 sps:$4 sm:$0xff]   ;;  %v3083_v46 = vld [vmem:[%s4661_s1 + $0x420] ss:$16 sps:$4 sm:$0xff]   ;;  %v64_v54 = vcombine.high %v3807_v50, %v3807_v50 }
  0x2f   :  { %1662 = vmatpush2.bf16.msra.mxu0 %v3020_v53  ;;  %v3088_v41 = vld [vmem:[%s4661_s1 + $0x624] ss:$16 sps:$4 sm:$0xff]   ;;  %v3086_v47 = vld [vmem:[%s4661_s1 + $0x620] ss:$16 sps:$4 sm:$0xff]   ;;  %v3815_v53 = vpack.c.bf16 %v63_v48, %v63_v48  ;;  %v3168_v48 = vld [vmem:[%s4661_s1 + $0x68] ss:$16 sps:$4 sm:$0xff]  }
  0x30   :  { %1703 = vmatpush2.bf16.msra.mxu1 %v3021_v56  ;;  %1663 = vmatprep.subr.bf16.mxu0 %v3022_v57  ;;  %v3091_v51 = vld [vmem:[%s4661_s1 + $0x404] ss:$16 sps:$4 sm:$0xff]   ;;  %v3089_v49 = vld [vmem:[%s4661_s1 + $0x400] ss:$16 sps:$4 sm:$0xff]   ;;  %v3825_v56 = vpack.c.bf16 %v64_v54, %v64_v54  ;;  %v3174_v54 = vld [vmem:[%s4661_s1 + $0x48] ss:$16 sps:$4 sm:$0xff]  }
  0x31   :  { %1704 = vmatprep.subr.bf16.mxu1 %v3024_v58  ;;  %v3094_v52 = vld [vmem:[%s4661_s1 + $0x604] ss:$16 sps:$4 sm:$0xff]   ;;  %v3092_v55 = vld [vmem:[%s4661_s1 + $0x600] ss:$16 sps:$4 sm:$0xff]  }
  0x32   :  { %v3097_v57 = vld [vmem:[%s4661_s1 + $0x5e4] ss:$16 sps:$4 sm:$0xff]   ;;  %v3095_v59 = vld [vmem:[%s4661_s1 + $0x5e0] ss:$16 sps:$4 sm:$0xff]  }
  0x33   :  { %1664 = vmatpush2.bf16.msra.mxu0 %v3026_v61  ;;  %v3100_v58 = vld [vmem:[%s4661_s1 + $0x7e4] ss:$16 sps:$4 sm:$0xff]   ;;  %v3098_v60 = vld [vmem:[%s4661_s1 + $0x7e0] ss:$16 sps:$4 sm:$0xff]  }
  0x34   :  { %1705 = vmatpush2.bf16.msra.mxu1 %v3027_v0  ;;  %1665 = vmatprep.subr.bf16.mxu0 %v3028_v1  ;;  %v3103_v61 = vld [vmem:[%s4661_s1 + $0x5c4] ss:$16 sps:$4 sm:$0xff]   ;;  %v3101_v0 = vld [vmem:[%s4661_s1 + $0x5c0] ss:$16 sps:$4 sm:$0xff]  }
  0x35   :  { %1706 = vmatprep.subr.bf16.mxu1 %v3030_v2  ;;  %v3106_v63 = vld [vmem:[%s4661_s1 + $0x7c4] ss:$16 sps:$4 sm:$0xff]   ;;  %v3104_v1 = vld [vmem:[%s4661_s1 + $0x7c0] ss:$16 sps:$4 sm:$0xff]  }
  0x36   :  { %v3109_v2 = vld [vmem:[%s4661_s1 + $0x5a4] ss:$16 sps:$4 sm:$0xff]  }
  0x37   :  { %1666 = vmatpush2.bf16.msra.mxu0 %v3032_v4  ;;  %v3112_v4 = vld [vmem:[%s4661_s1 + $0x7a4] ss:$16 sps:$4 sm:$0xff]  }
  0x38   :  { %1707 = vmatpush2.bf16.msra.mxu1 %v3033_v5  ;;  %1667 = vmatprep.subr.bf16.mxu0 %v3034_v6  ;;  %v3107_v5 = vld [vmem:[%s4661_s1 + $0x5a0] ss:$16 sps:$4 sm:$0xff]  }
  0x39   :  { %1708 = vmatprep.subr.bf16.mxu1 %v3036_v7  ;;  %v3110_v6 = vld [vmem:[%s4661_s1 + $0x7a0] ss:$16 sps:$4 sm:$0xff]   ;;  %v3115_v7 = vld [vmem:[%s4661_s1 + $0x584] ss:$16 sps:$4 sm:$0xff]  }
  0x3b   :  { %1668 = vmatpush2.bf16.msra.mxu0 %v3038_v8  ;;  %v3118_v8 = vld [vmem:[%s4661_s1 + $0x784] ss:$16 sps:$4 sm:$0xff]  }
  0x3c   :  { %1709 = vmatpush2.bf16.msra.mxu1 %v3039_v9  ;;  %1669 = vmatprep.subr.bf16.mxu0 %v3040_v10  ;;  %v3113_v9 = vld [vmem:[%s4661_s1 + $0x580] ss:$16 sps:$4 sm:$0xff]  }
  0x3d   :  { %1710 = vmatprep.subr.bf16.mxu1 %v3042_v11  ;;  %v3116_v10 = vld [vmem:[%s4661_s1 + $0x780] ss:$16 sps:$4 sm:$0xff]   ;;  %v3121_v11 = vld [vmem:[%s4661_s1 + $0x564] ss:$16 sps:$4 sm:$0xff]  }
  0x3f   :  { %1670 = vmatpush2.bf16.msra.mxu0 %v3044_v12  ;;  %v3124_v12 = vld [vmem:[%s4661_s1 + $0x764] ss:$16 sps:$4 sm:$0xff]  }
  0x40   :  { %1711 = vmatpush2.bf16.msra.mxu1 %v3045_v13  ;;  %1721 = vmatprep.subr.bf16.mxu0 %v3049_v14  ;;  %v3119_v13 = vld [vmem:[%s4661_s1 + $0x560] ss:$16 sps:$4 sm:$0xff]  }
  0x41   :  { %1762 = vmatprep.subr.bf16.mxu1 %v3052_v15  ;;  %v3122_v14 = vld [vmem:[%s4661_s1 + $0x760] ss:$16 sps:$4 sm:$0xff]   ;;  %v3127_v15 = vld [vmem:[%s4661_s1 + $0x544] ss:$16 sps:$4 sm:$0xff]  }
  0x42   :  { %1672 = vmatmul.mubr.bf16.vlgmr.msra.gmra.mxu0 %v3714_v16 }
  0x43   :  { %1713 = vmatmul.mubr.bf16.vlgmr.msra.gmra.mxu1 %v3716_v17  ;;  %1722 = vmatpush1.bf16.msra.mxu0 %v3047_v18  ;;  %v3130_v18 = vld [vmem:[%s4661_s1 + $0x744] ss:$16 sps:$4 sm:$0xff]  }
  0x44   :  { %1763 = vmatpush1.bf16.msra.mxu1 %v3050_v19  ;;  %1723 = vmatprep.subr.bf16.mxu0 %v3055_v20  ;;  %v3125_v19 = vld [vmem:[%s4661_s1 + $0x540] ss:$16 sps:$4 sm:$0xff]  }
  0x45   :  { %1764 = vmatprep.subr.bf16.mxu1 %v3058_v21  ;;  %1753 = vmatprep.mubr.bf16.mxu0 %v3815_v53  ;;  %v3128_v20 = vld [vmem:[%s4661_s1 + $0x740] ss:$16 sps:$4 sm:$0xff]   ;;  %v3133_v21 = vld [vmem:[%s4661_s1 + $0x524] ss:$16 sps:$4 sm:$0xff]  }
  0x46   :  { %1794 = vmatprep.mubr.bf16.mxu1 %v3825_v56 }
  0x47   :  { %1724 = vmatpush1.bf16.msra.mxu0 %v3053_v22  ;;  %v3136_v22 = vld [vmem:[%s4661_s1 + $0x724] ss:$16 sps:$4 sm:$0xff]  }
  0x48   :  { %1765 = vmatpush1.bf16.msra.mxu1 %v3056_v23  ;;  %1725 = vmatprep.subr.bf16.mxu0 %v3061_v24  ;;  %v3131_v23 = vld [vmem:[%s4661_s1 + $0x520] ss:$16 sps:$4 sm:$0xff]  }
  0x49   :  { %1766 = vmatprep.subr.bf16.mxu1 %v3064_v25  ;;  %v3134_v24 = vld [vmem:[%s4661_s1 + $0x720] ss:$16 sps:$4 sm:$0xff]   ;;  %v3139_v25 = vld [vmem:[%s4661_s1 + $0x504] ss:$16 sps:$4 sm:$0xff]  }
  0x4b   :  { %1726 = vmatpush1.bf16.msra.mxu0 %v3059_v26  ;;  %v3142_v26 = vld [vmem:[%s4661_s1 + $0x704] ss:$16 sps:$4 sm:$0xff]  }
  0x4c   :  { %1767 = vmatpush1.bf16.msra.mxu1 %v3062_v27  ;;  %1727 = vmatprep.subr.bf16.mxu0 %v3067_v28  ;;  %v3137_v27 = vld [vmem:[%s4661_s1 + $0x500] ss:$16 sps:$4 sm:$0xff]  }
  0x4d   :  { %1768 = vmatprep.subr.bf16.mxu1 %v3070_v29  ;;  %v3140_v28 = vld [vmem:[%s4661_s1 + $0x700] ss:$16 sps:$4 sm:$0xff]   ;;  %v3146_v29 = vld [vmem:[%s4661_s1 + $0xec] ss:$16 sps:$4 sm:$0xff]  }
  0x4f   :  { %1728 = vmatpush1.bf16.msra.mxu0 %v3065_v30  ;;  %v3149_v30 = vld [vmem:[%s4661_s1 + $0x2ec] ss:$16 sps:$4 sm:$0xff]  }
  0x50   :  { %1769 = vmatpush1.bf16.msra.mxu1 %v3068_v31  ;;  %1729 = vmatprep.subr.bf16.mxu0 %v3073_v32  ;;  %v3933_v31 = vpack.c.bf16 %v3796_v44, %v3796_v44  ;;  %v3937_v32 = vpack.c.bf16 %v3807_v50, %v3807_v50  ;;  %v3164_v44 = vld [vmem:[%s4661_s1 + $0x8c] ss:$16 sps:$4 sm:$0xff]   ;;  %v3171_v50 = vld [vmem:[%s4661_s1 + $0x268] ss:$16 sps:$4 sm:$0xff]  }
  0x51   :  { %1770 = vmatprep.subr.bf16.mxu1 %v3076_v33  ;;  %v3144_v33 = vld [vmem:[%s4661_s1 + $0xe8] ss:$16 sps:$4 sm:$0xff]  }
  0x53   :  { %1730 = vmatpush1.bf16.msra.mxu0 %v3071_v34  ;;  %v3147_v34 = vld [vmem:[%s4661_s1 + $0x2e8] ss:$16 sps:$4 sm:$0xff]  }
  0x54   :  { %1771 = vmatpush1.bf16.msra.mxu1 %v3074_v35  ;;  %1731 = vmatprep.subr.bf16.mxu0 %v3079_v36  ;;  %v3152_v35 = vld [vmem:[%s4661_s1 + $0xcc] ss:$16 sps:$4 sm:$0xff]  }
  0x55   :  { %1772 = vmatprep.subr.bf16.mxu1 %v3082_v37  ;;  %v3155_v36 = vld [vmem:[%s4661_s1 + $0x2cc] ss:$16 sps:$4 sm:$0xff]   ;;  %v3150_v37 = vld [vmem:[%s4661_s1 + $0xc8] ss:$16 sps:$4 sm:$0xff]  }
  0x57   :  { %1732 = vmatpush1.bf16.msra.mxu0 %v3077_v38  ;;  %v3153_v38 = vld [vmem:[%s4661_s1 + $0x2c8] ss:$16 sps:$4 sm:$0xff]  }
  0x58   :  { %1773 = vmatpush1.bf16.msra.mxu1 %v3080_v39  ;;  %1733 = vmatprep.subr.bf16.mxu0 %v3085_v40  ;;  %v3158_v39 = vld [vmem:[%s4661_s1 + $0xac] ss:$16 sps:$4 sm:$0xff]  }
  0x59   :  { %1774 = vmatprep.subr.bf16.mxu1 %v3088_v41  ;;  %v3161_v40 = vld [vmem:[%s4661_s1 + $0x2ac] ss:$16 sps:$4 sm:$0xff]   ;;  %v3156_v41 = vld [vmem:[%s4661_s1 + $0xa8] ss:$16 sps:$4 sm:$0xff]  }
  0x5b   :  { %1734 = vmatpush1.bf16.msra.mxu0 %v3083_v46  ;;  %v3170_v46 = vld [vmem:[%s4661_s1 + $0x6c] ss:$16 sps:$4 sm:$0xff]  }
  0x5c   :  { %1775 = vmatpush1.bf16.msra.mxu1 %v3086_v47  ;;  %1735 = vmatprep.subr.bf16.mxu0 %v3091_v51  ;;  %v3173_v47 = vld [vmem:[%s4661_s1 + $0x26c] ss:$16 sps:$4 sm:$0xff]  }
  0x5d   :  { %1776 = vmatprep.subr.bf16.mxu1 %v3094_v52  ;;  %v3176_v51 = vld [vmem:[%s4661_s1 + $0x4c] ss:$16 sps:$4 sm:$0xff]  }
  0x5e   :  { %v3179_v52 = vld [vmem:[%s4661_s1 + $0x24c] ss:$16 sps:$4 sm:$0xff]  }
  0x5f   :  { %1736 = vmatpush1.bf16.msra.mxu0 %v3089_v49  ;;  %v3177_v49 = vld [vmem:[%s4661_s1 + $0x248] ss:$16 sps:$4 sm:$0xff]  }
  0x60   :  { %1777 = vmatpush1.bf16.msra.mxu1 %v3092_v55  ;;  %1737 = vmatprep.subr.bf16.mxu0 %v3097_v57  ;;  %v3182_v55 = vld [vmem:[%s4661_s1 + $0x2c] ss:$16 sps:$4 sm:$0xff]  }
  0x61   :  { %1778 = vmatprep.subr.bf16.mxu1 %v3100_v58  ;;  %v3185_v57 = vld [vmem:[%s4661_s1 + $0x22c] ss:$16 sps:$4 sm:$0xff]   ;;  %v3180_v58 = vld [vmem:[%s4661_s1 + $0x28] ss:$16 sps:$4 sm:$0xff]  }
  0x63   :  { %1738 = vmatpush2.bf16.msra.mxu0 %v3095_v59  ;;  %v3183_v59 = vld [vmem:[%s4661_s1 + $0x228] ss:$16 sps:$4 sm:$0xff]  }
  0x64   :  { %1779 = vmatpush2.bf16.msra.mxu1 %v3098_v60  ;;  %1739 = vmatprep.subr.bf16.mxu0 %v3103_v61  ;;  %v3188_v60 = vld [vmem:[%s4661_s1 + $0xc] ss:$16 sps:$4 sm:$0xff]  }
  0x65   :  { %1780 = vmatprep.subr.bf16.mxu1 %v3106_v63  ;;  %v3191_v61 = vld [vmem:[%s4661_s1 + $0x20c] ss:$16 sps:$4 sm:$0xff]   ;;  %v3186_v63 = vld [vmem:[%s4661_s1 + $0x8] ss:$16 sps:$4 sm:$0xff]  }
  0x67   :  { %1740 = vmatpush2.bf16.msra.mxu0 %v3101_v0  ;;  %v3189_v0 = vld [vmem:[%s4661_s1 + $0x208] ss:$16 sps:$4 sm:$0xff]  }
  0x68   :  { %1781 = vmatpush2.bf16.msra.mxu1 %v3104_v1  ;;  %1741 = vmatprep.subr.bf16.mxu0 %v3109_v2  ;;  %v3194_v1 = vld [vmem:[%s4661_s1 + $0x1ec] ss:$16 sps:$4 sm:$0xff]  }
  0x69   :  { %1782 = vmatprep.subr.bf16.mxu1 %v3112_v4  ;;  %v3197_v2 = vld [vmem:[%s4661_s1 + $0x3ec] ss:$16 sps:$4 sm:$0xff]   ;;  %v3192_v4 = vld [vmem:[%s4661_s1 + $0x1e8] ss:$16 sps:$4 sm:$0xff]  }
  0x6b   :  { %1742 = vmatpush2.bf16.msra.mxu0 %v3107_v5  ;;  %v3195_v5 = vld [vmem:[%s4661_s1 + $0x3e8] ss:$16 sps:$4 sm:$0xff]  }
  0x6c   :  { %1783 = vmatpush2.bf16.msra.mxu1 %v3110_v6  ;;  %1743 = vmatprep.subr.bf16.mxu0 %v3115_v7  ;;  %v3200_v6 = vld [vmem:[%s4661_s1 + $0x1cc] ss:$16 sps:$4 sm:$0xff]  }
  0x6d   :  { %1784 = vmatprep.subr.bf16.mxu1 %v3118_v8  ;;  %v3203_v7 = vld [vmem:[%s4661_s1 + $0x3cc] ss:$16 sps:$4 sm:$0xff]   ;;  %v3198_v8 = vld [vmem:[%s4661_s1 + $0x1c8] ss:$16 sps:$4 sm:$0xff]  }
  0x6f   :  { %1744 = vmatpush2.bf16.msra.mxu0 %v3113_v9  ;;  %v3201_v9 = vld [vmem:[%s4661_s1 + $0x3c8] ss:$16 sps:$4 sm:$0xff]  }
  0x70   :  { %1785 = vmatpush2.bf16.msra.mxu1 %v3116_v10  ;;  %1745 = vmatprep.subr.bf16.mxu0 %v3121_v11  ;;  %v3206_v10 = vld [vmem:[%s4661_s1 + $0x1ac] ss:$16 sps:$4 sm:$0xff]  }
  0x71   :  { %1786 = vmatprep.subr.bf16.mxu1 %v3124_v12  ;;  %v3209_v11 = vld [vmem:[%s4661_s1 + $0x3ac] ss:$16 sps:$4 sm:$0xff]   ;;  %v3204_v12 = vld [vmem:[%s4661_s1 + $0x1a8] ss:$16 sps:$4 sm:$0xff]  }
  0x73   :  { %1746 = vmatpush2.bf16.msra.mxu0 %v3119_v13  ;;  %v3207_v13 = vld [vmem:[%s4661_s1 + $0x3a8] ss:$16 sps:$4 sm:$0xff]  }
  0x74   :  { %1787 = vmatpush2.bf16.msra.mxu1 %v3122_v14  ;;  %1747 = vmatprep.subr.bf16.mxu0 %v3127_v15  ;;  %v3212_v14 = vld [vmem:[%s4661_s1 + $0x18c] ss:$16 sps:$4 sm:$0xff]  }
  0x75   :  { %1788 = vmatprep.subr.bf16.mxu1 %v3130_v18  ;;  %v3215_v15 = vld [vmem:[%s4661_s1 + $0x38c] ss:$16 sps:$4 sm:$0xff]   ;;  %v3210_v18 = vld [vmem:[%s4661_s1 + $0x188] ss:$16 sps:$4 sm:$0xff]  }
  0x77   :  { %1748 = vmatpush2.bf16.msra.mxu0 %v3125_v19  ;;  %v3213_v19 = vld [vmem:[%s4661_s1 + $0x388] ss:$16 sps:$4 sm:$0xff]  }
  0x78   :  { %1789 = vmatpush2.bf16.msra.mxu1 %v3128_v20  ;;  %1749 = vmatprep.subr.bf16.mxu0 %v3133_v21  ;;  %v3218_v20 = vld [vmem:[%s4661_s1 + $0x16c] ss:$16 sps:$4 sm:$0xff]  }
  0x79   :  { %1790 = vmatprep.subr.bf16.mxu1 %v3136_v22  ;;  %v3221_v21 = vld [vmem:[%s4661_s1 + $0x36c] ss:$16 sps:$4 sm:$0xff]   ;;  %v3216_v22 = vld [vmem:[%s4661_s1 + $0x168] ss:$16 sps:$4 sm:$0xff]  }
  0x7b   :  { %1750 = vmatpush2.bf16.msra.mxu0 %v3131_v23  ;;  %v3219_v23 = vld [vmem:[%s4661_s1 + $0x368] ss:$16 sps:$4 sm:$0xff]  }
  0x7c   :  { %1791 = vmatpush2.bf16.msra.mxu1 %v3134_v24  ;;  %1751 = vmatprep.subr.bf16.mxu0 %v3139_v25  ;;  %v3224_v24 = vld [vmem:[%s4661_s1 + $0x14c] ss:$16 sps:$4 sm:$0xff]  }
  0x7d   :  { %1792 = vmatprep.subr.bf16.mxu1 %v3142_v26  ;;  %v3227_v25 = vld [vmem:[%s4661_s1 + $0x34c] ss:$16 sps:$4 sm:$0xff]   ;;  %v3222_v26 = vld [vmem:[%s4661_s1 + $0x148] ss:$16 sps:$4 sm:$0xff]  }
  0x7f   :  { %1752 = vmatpush2.bf16.msra.mxu0 %v3137_v27  ;;  %v3225_v27 = vld [vmem:[%s4661_s1 + $0x348] ss:$16 sps:$4 sm:$0xff]  }
  0x80   :  { %1793 = vmatpush2.bf16.msra.mxu1 %v3140_v28  ;;  %1803 = vmatprep.subr.bf16.mxu0 %v3146_v29  ;;  %v3230_v28 = vld [vmem:[%s4661_s1 + $0x12c] ss:$16 sps:$4 sm:$0xff]  }
  0x81   :  { %1844 = vmatprep.subr.bf16.mxu1 %v3149_v30  ;;  %v3233_v29 = vld [vmem:[%s4661_s1 + $0x32c] ss:$16 sps:$4 sm:$0xff]   ;;  %v3228_v30 = vld [vmem:[%s4661_s1 + $0x128] ss:$16 sps:$4 sm:$0xff]  }
  0x82   :  { %1754 = vmatmul.mubr.bf16.vlgmr.msra.gmra.mxu0 %v3933_v31 }
  0x83   :  { %1795 = vmatmul.mubr.bf16.vlgmr.msra.gmra.mxu1 %v3937_v32  ;;  %1804 = vmatpush1.bf16.msra.mxu0 %v3144_v33  ;;  %v3231_v33 = vld [vmem:[%s4661_s1 + $0x328] ss:$16 sps:$4 sm:$0xff]  }
  0x84   :  { %1845 = vmatpush1.bf16.msra.mxu1 %v3147_v34  ;;  %1805 = vmatprep.subr.bf16.mxu0 %v3152_v35  ;;  %v3236_v34 = vld [vmem:[%s4661_s1 + $0x10c] ss:$16 sps:$4 sm:$0xff]  }
  0x85   :  { %1846 = vmatprep.subr.bf16.mxu1 %v3155_v36  ;;  %1835 = vmatprep.mubr.bf16.mxu0 %v3663_v62  ;;  %v3167_v62 = vld [vmem:[%s4661_s1 + $0x28c] ss:$16 sps:$4 sm:$0xff]   ;;  %v3234_v36 = vld [vmem:[%s4661_s1 + $0x108] ss:$16 sps:$4 sm:$0xff]  }
  0x86   :  { %1876 = vmatprep.mubr.bf16.mxu1 %v3674_v3  ;;  %v3162_v3 = vld [vmem:[%s4661_s1 + $0x88] ss:$16 sps:$4 sm:$0xff]   ;;  %v3239_v35 = vld [vmem:[%s4661_s1 + $0x30c] ss:$16 sps:$4 sm:$0xff]  }
  0x87   :  { %1806 = vmatpush1.bf16.msra.mxu0 %v3150_v37  ;;  %v3237_v37 = vld [vmem:[%s4661_s1 + $0x308] ss:$16 sps:$4 sm:$0xff]  }
  0x88   :  { %1847 = vmatpush1.bf16.msra.mxu1 %v3153_v38  ;;  %1807 = vmatprep.subr.bf16.mxu0 %v3158_v39  ;;  %v3242_v38 = vld [vmem:[%s4661_s1 + $0x4ec] ss:$16 sps:$4 sm:$0xff]  }
  0x89   :  { %1848 = vmatprep.subr.bf16.mxu1 %v3161_v40  ;;  %v3245_v39 = vld [vmem:[%s4661_s1 + $0x6ec] ss:$16 sps:$4 sm:$0xff]   ;;  %v3240_v40 = vld [vmem:[%s4661_s1 + $0x4e8] ss:$16 sps:$4 sm:$0xff]  }
  0x8b   :  { %1808 = vmatpush1.bf16.msra.mxu0 %v3156_v41  ;;  %v3243_v41 = vld [vmem:[%s4661_s1 + $0x6e8] ss:$16 sps:$4 sm:$0xff]  }
  0x8c   :  { %1849 = vmatpush1.bf16.msra.mxu1 %v3159_v42  ;;  %1809 = vmatprep.subr.bf16.mxu0 %v3164_v44  ;;  %v3248_v42 = vld [vmem:[%s4661_s1 + $0x4cc] ss:$16 sps:$4 sm:$0xff]  }
  0x8d   :  { %1850 = vmatprep.subr.bf16.mxu1 %v3167_v62  ;;  %v3251_v44 = vld [vmem:[%s4661_s1 + $0x6cc] ss:$16 sps:$4 sm:$0xff]   ;;  %v3246_v62 = vld [vmem:[%s4661_s1 + $0x4c8] ss:$16 sps:$4 sm:$0xff]  }
  0x8f   :  { %1810 = vmatpush1.bf16.msra.mxu0 %v3162_v3  ;;  %v3249_v3 = vld [vmem:[%s4661_s1 + $0x6c8] ss:$16 sps:$4 sm:$0xff]  }
  0x90   :  { %1851 = vmatpush1.bf16.msra.mxu1 %v3165_v45  ;;  %1811 = vmatprep.subr.bf16.mxu0 %v3170_v46  ;;  %v3254_v45 = vld [vmem:[%s4661_s1 + $0x4ac] ss:$16 sps:$4 sm:$0xff]  }
  0x91   :  { %1852 = vmatprep.subr.bf16.mxu1 %v3173_v47  ;;  %v3257_v46 = vld [vmem:[%s4661_s1 + $0x6ac] ss:$16 sps:$4 sm:$0xff]   ;;  %v3252_v47 = vld [vmem:[%s4661_s1 + $0x4a8] ss:$16 sps:$4 sm:$0xff]  }
  0x93   :  { %1812 = vmatpush1.bf16.msra.mxu0 %v3168_v48  ;;  %v3263_v48 = vld [vmem:[%s4661_s1 + $0x68c] ss:$16 sps:$4 sm:$0xff]  }
  0x94   :  { %1853 = vmatpush1.bf16.msra.mxu1 %v3171_v50  ;;  %1813 = vmatprep.subr.bf16.mxu0 %v3176_v51 }
  0x95   :  { %1854 = vmatprep.subr.bf16.mxu1 %v3179_v52 }
  0x97   :  { %1814 = vmatpush1.bf16.msra.mxu0 %v3174_v54 }
  0x98   :  { %1855 = vmatpush1.bf16.msra.mxu1 %v3177_v49  ;;  %1815 = vmatprep.subr.bf16.mxu0 %v3182_v55 }
  0x99   :  { %1856 = vmatprep.subr.bf16.mxu1 %v3185_v57 }
  0x9b   :  { %1816 = vmatpush1.bf16.msra.mxu0 %v3180_v58 }
  0x9c   :  { %1857 = vmatpush1.bf16.msra.mxu1 %v3183_v59  ;;  %1817 = vmatprep.subr.bf16.mxu0 %v3188_v60 }
  0x9d   :  { %1858 = vmatprep.subr.bf16.mxu1 %v3191_v61 }
  0x9f   :  { %1818 = vmatpush1.bf16.msra.mxu0 %v3186_v63 }
  0xa0   :  { %1859 = vmatpush1.bf16.msra.mxu1 %v3189_v0  ;;  %1819 = vmatprep.subr.bf16.mxu0 %v3194_v1 }
  0xa1   :  { %1860 = vmatprep.subr.bf16.mxu1 %v3197_v2 }
  0xa3   :  { %1820 = vmatpush2.bf16.msra.mxu0 %v3192_v4 }
  0xa4   :  { %1861 = vmatpush2.bf16.msra.mxu1 %v3195_v5  ;;  %1821 = vmatprep.subr.bf16.mxu0 %v3200_v6 }
  0xa5   :  { %1862 = vmatprep.subr.bf16.mxu1 %v3203_v7 }
  0xa7   :  { %1822 = vmatpush2.bf16.msra.mxu0 %v3198_v8 }
  0xa8   :  { %1863 = vmatpush2.bf16.msra.mxu1 %v3201_v9  ;;  %1823 = vmatprep.subr.bf16.mxu0 %v3206_v10 }
  0xa9   :  { %1864 = vmatprep.subr.bf16.mxu1 %v3209_v11 }
  0xab   :  { %1824 = vmatpush2.bf16.msra.mxu0 %v3204_v12 }
  0xac   :  { %1865 = vmatpush2.bf16.msra.mxu1 %v3207_v13  ;;  %1825 = vmatprep.subr.bf16.mxu0 %v3212_v14 }
  0xad   :  { %1866 = vmatprep.subr.bf16.mxu1 %v3215_v15 }
  0xaf   :  { %1826 = vmatpush2.bf16.msra.mxu0 %v3210_v18 }
  0xb0   :  { %1867 = vmatpush2.bf16.msra.mxu1 %v3213_v19  ;;  %1827 = vmatprep.subr.bf16.mxu0 %v3218_v20 }
  0xb1   :  { %1868 = vmatprep.subr.bf16.mxu1 %v3221_v21 }
  0xb3   :  { %1828 = vmatpush2.bf16.msra.mxu0 %v3216_v22 }
  0xb4   :  { %1869 = vmatpush2.bf16.msra.mxu1 %v3219_v23  ;;  %1829 = vmatprep.subr.bf16.mxu0 %v3224_v24 }
  0xb5   :  { %1870 = vmatprep.subr.bf16.mxu1 %v3227_v25 }
  0xb7   :  { %1830 = vmatpush2.bf16.msra.mxu0 %v3222_v26 }
  0xb8   :  { %1871 = vmatpush2.bf16.msra.mxu1 %v3225_v27  ;;  %1831 = vmatprep.subr.bf16.mxu0 %v3230_v28 }
  0xb9   :  { %1872 = vmatprep.subr.bf16.mxu1 %v3233_v29 }
  0xbb   :  { %1832 = vmatpush2.bf16.msra.mxu0 %v3228_v30 }
  0xbc   :  { %1873 = vmatpush2.bf16.msra.mxu1 %v3231_v33  ;;  %1833 = vmatprep.subr.bf16.mxu0 %v3236_v34 }
  0xbd   :  { %1874 = vmatprep.subr.bf16.mxu1 %v3239_v35 }
  0xbf   :  { %1834 = vmatpush2.bf16.msra.mxu0 %v3234_v36 }
  0xc0   :  { %1875 = vmatpush2.bf16.msra.mxu1 %v3237_v37  ;;  %1885 = vmatprep.subr.bf16.mxu0 %v3242_v38 }
  0xc1   :  { %1926 = vmatprep.subr.bf16.mxu1 %v3245_v39 }
  0xc2   :  { %1836 = vmatmul.mubr.bf16.vlgmr.msra.gmra.mxu0 %v3714_v16  ;;  %v3255_v16 = vld [vmem:[%s4661_s1 + $0x6a8] ss:$16 sps:$4 sm:$0xff]  }
  0xc3   :  { %1877 = vmatmul.mubr.bf16.vlgmr.msra.gmra.mxu1 %v3716_v17  ;;  %1886 = vmatpush1.bf16.msra.mxu0 %v3240_v40  ;;  %v3260_v17 = vld [vmem:[%s4661_s1 + $0x48c] ss:$16 sps:$4 sm:$0xff]  }
  0xc4   :  { %1927 = vmatpush1.bf16.msra.mxu1 %v3243_v41  ;;  %1887 = vmatprep.subr.bf16.mxu0 %v3248_v42 }
  0xc5   :  { %1928 = vmatprep.subr.bf16.mxu1 %v3251_v44  ;;  %1917 = vmatprep.mubr.bf16.mxu0 %v3815_v53 }
  0xc6   :  { %1958 = vmatprep.mubr.bf16.mxu1 %v3825_v56 }
  0xc7   :  { %1888 = vmatpush1.bf16.msra.mxu0 %v3246_v62 }
  0xc8   :  { %1929 = vmatpush1.bf16.msra.mxu1 %v3249_v3  ;;  %1889 = vmatprep.subr.bf16.mxu0 %v3254_v45 }
  0xc9   :  { %1930 = vmatprep.subr.bf16.mxu1 %v3257_v46 }
  0xca   :  { %12 = vsyncpa [#allocation3], 0  ;;  %v3258_v53 = vld [vmem:[%s4661_s1 + $0x488] ss:$16 sps:$4 sm:$0xff]   ;;  %v3266_v50 = vld [vmem:[%s4661_s1 + $0x46c] ss:$16 sps:$4 sm:$0xff]  }
  0xcb   :  { %1890 = vmatpush1.bf16.msra.mxu0 %v3252_v47  ;;  %v3261_v56 = vld [vmem:[%s4661_s1 + $0x688] ss:$16 sps:$4 sm:$0xff]   ;;  %v3269_v51 = vld [vmem:[%s4661_s1 + $0x66c] ss:$16 sps:$4 sm:$0xff]   ;;  %vm2564_vm0 = vcmask 9216   ;;  %s3459_s10 = smov [#allocation2]  }
  0xcc   :  { %1931 = vmatpush1.bf16.msra.mxu1 %v3255_v16  ;;  %1891 = vmatprep.subr.bf16.mxu0 %v3260_v17  ;;  %v3264_v52 = vld [vmem:[%s4661_s1 + $0x468] ss:$16 sps:$4 sm:$0xff]   ;;  %v3272_v49 = vld [vmem:[%s4661_s1 + $0x44c] ss:$16 sps:$4 sm:$0xff]  }
  0xcd   :  { %1932 = vmatprep.subr.bf16.mxu1 %v3263_v48  ;;  %v3267_v54 = vld [vmem:[%s4661_s1 + $0x668] ss:$16 sps:$4 sm:$0xff]   ;;  %v3275_v55 = vld [vmem:[%s4661_s1 + $0x64c] ss:$16 sps:$4 sm:$0xff]  }
  0xce   :  { %v3270_v57 = vld [vmem:[%s4661_s1 + $0x448] ss:$16 sps:$4 sm:$0xff]   ;;  %v3278_v59 = vld [vmem:[%s4661_s1 + $0x42c] ss:$16 sps:$4 sm:$0xff]  }
  0xcf   :  { %1892 = vmatpush1.bf16.msra.mxu0 %v3258_v53  ;;  %v3273_v58 = vld [vmem:[%s4661_s1 + $0x648] ss:$16 sps:$4 sm:$0xff]   ;;  %v3281_v60 = vld [vmem:[%s4661_s1 + $0x62c] ss:$16 sps:$4 sm:$0xff]  }
  0xd0   :  { %1933 = vmatpush1.bf16.msra.mxu1 %v3261_v56  ;;  %1893 = vmatprep.subr.bf16.mxu0 %v3266_v50  ;;  %v3276_v61 = vld [vmem:[%s4661_s1 + $0x428] ss:$16 sps:$4 sm:$0xff]   ;;  %v3284_v0 = vld [vmem:[%s4661_s1 + $0x40c] ss:$16 sps:$4 sm:$0xff]  }
  0xd1   :  { %1934 = vmatprep.subr.bf16.mxu1 %v3269_v51  ;;  %v3279_v63 = vld [vmem:[%s4661_s1 + $0x628] ss:$16 sps:$4 sm:$0xff]   ;;  %v3287_v1 = vld [vmem:[%s4661_s1 + $0x60c] ss:$16 sps:$4 sm:$0xff]  }
  0xd2   :  { %v3282_v2 = vld [vmem:[%s4661_s1 + $0x408] ss:$16 sps:$4 sm:$0xff]   ;;  %v3290_v5 = vld [vmem:[%s4661_s1 + $0x5ec] ss:$16 sps:$4 sm:$0xff]  }
  0xd3   :  { %1894 = vmatpush1.bf16.msra.mxu0 %v3264_v52  ;;  %v3285_v4 = vld [vmem:[%s4661_s1 + $0x608] ss:$16 sps:$4 sm:$0xff]   ;;  %v3293_v6 = vld [vmem:[%s4661_s1 + $0x7ec] ss:$16 sps:$4 sm:$0xff]  }
  0xd4   :  { %1935 = vmatpush1.bf16.msra.mxu1 %v3267_v54  ;;  %1895 = vmatprep.subr.bf16.mxu0 %v3272_v49  ;;  %v3288_v7 = vld [vmem:[%s4661_s1 + $0x5e8] ss:$16 sps:$4 sm:$0xff]   ;;  %v3296_v9 = vld [vmem:[%s4661_s1 + $0x5cc] ss:$16 sps:$4 sm:$0xff]  }
  0xd5   :  { %1936 = vmatprep.subr.bf16.mxu1 %v3275_v55  ;;  %v3291_v8 = vld [vmem:[%s4661_s1 + $0x7e8] ss:$16 sps:$4 sm:$0xff]   ;;  %v3299_v10 = vld [vmem:[%s4661_s1 + $0x7cc] ss:$16 sps:$4 sm:$0xff]  }
  0xd6   :  { %v3294_v11 = vld [vmem:[%s4661_s1 + $0x5c8] ss:$16 sps:$4 sm:$0xff]   ;;  %v3302_v13 = vld [vmem:[%s4661_s1 + $0x5ac] ss:$16 sps:$4 sm:$0xff]  }
  0xd7   :  { %1896 = vmatpush1.bf16.msra.mxu0 %v3270_v57  ;;  %v3297_v12 = vld [vmem:[%s4661_s1 + $0x7c8] ss:$16 sps:$4 sm:$0xff]   ;;  %v3305_v14 = vld [vmem:[%s4661_s1 + $0x7ac] ss:$16 sps:$4 sm:$0xff]  }
  0xd8   :  { %1937 = vmatpush1.bf16.msra.mxu1 %v3273_v58  ;;  %1897 = vmatprep.subr.bf16.mxu0 %v3278_v59  ;;  %v3300_v15 = vld [vmem:[%s4661_s1 + $0x5a8] ss:$16 sps:$4 sm:$0xff]   ;;  %v3308_v19 = vld [vmem:[%s4661_s1 + $0x58c] ss:$16 sps:$4 sm:$0xff]  }
  0xd9   :  { %1938 = vmatprep.subr.bf16.mxu1 %v3281_v60  ;;  %v3303_v18 = vld [vmem:[%s4661_s1 + $0x7a8] ss:$16 sps:$4 sm:$0xff]   ;;  %v3311_v20 = vld [vmem:[%s4661_s1 + $0x78c] ss:$16 sps:$4 sm:$0xff]  }
  0xda   :  { %v3306_v21 = vld [vmem:[%s4661_s1 + $0x588] ss:$16 sps:$4 sm:$0xff]   ;;  %v3314_v23 = vld [vmem:[%s4661_s1 + $0x56c] ss:$16 sps:$4 sm:$0xff]  }
  0xdb   :  { %1898 = vmatpush1.bf16.msra.mxu0 %v3276_v61  ;;  %v3309_v22 = vld [vmem:[%s4661_s1 + $0x788] ss:$16 sps:$4 sm:$0xff]   ;;  %v3317_v24 = vld [vmem:[%s4661_s1 + $0x76c] ss:$16 sps:$4 sm:$0xff]  }
  0xdc   :  { %1939 = vmatpush1.bf16.msra.mxu1 %v3279_v63  ;;  %1899 = vmatprep.subr.bf16.mxu0 %v3284_v0  ;;  %v3312_v25 = vld [vmem:[%s4661_s1 + $0x568] ss:$16 sps:$4 sm:$0xff]   ;;  %v3320_v27 = vld [vmem:[%s4661_s1 + $0x54c] ss:$16 sps:$4 sm:$0xff]  }
  0xdd   :  { %1940 = vmatprep.subr.bf16.mxu1 %v3287_v1  ;;  %v3315_v26 = vld [vmem:[%s4661_s1 + $0x768] ss:$16 sps:$4 sm:$0xff]   ;;  %v3323_v28 = vld [vmem:[%s4661_s1 + $0x74c] ss:$16 sps:$4 sm:$0xff]  }
  0xde   :  { %v3318_v29 = vld [vmem:[%s4661_s1 + $0x548] ss:$16 sps:$4 sm:$0xff]   ;;  %v3326_v33 = vld [vmem:[%s4661_s1 + $0x52c] ss:$16 sps:$4 sm:$0xff]  }
  0xdf   :  { %1900 = vmatpush1.bf16.msra.mxu0 %v3282_v2  ;;  %v3321_v30 = vld [vmem:[%s4661_s1 + $0x748] ss:$16 sps:$4 sm:$0xff]   ;;  %v3329_v34 = vld [vmem:[%s4661_s1 + $0x72c] ss:$16 sps:$4 sm:$0xff]  }
  0xe0   :  { %1941 = vmatpush1.bf16.msra.mxu1 %v3285_v4  ;;  %1901 = vmatprep.subr.bf16.mxu0 %v3290_v5  ;;  %v3324_v35 = vld [vmem:[%s4661_s1 + $0x528] ss:$16 sps:$4 sm:$0xff]   ;;  %v3332_v37 = vld [vmem:[%s4661_s1 + $0x50c] ss:$16 sps:$4 sm:$0xff]  }
  0xe1   :  { %1942 = vmatprep.subr.bf16.mxu1 %v3293_v6  ;;  %v3327_v36 = vld [vmem:[%s4661_s1 + $0x728] ss:$16 sps:$4 sm:$0xff]   ;;  %v3335_v38 = vld [vmem:[%s4661_s1 + $0x70c] ss:$16 sps:$4 sm:$0xff]  }
  0xe2   :  { %v3330_v39 = vld [vmem:[%s4661_s1 + $0x508] ss:$16 sps:$4 sm:$0xff]   ;;  %v3338_v41 = vld [vmem:[%s4663_s3 + $0x74] ss:$8 sps:$4 sm:$0xff]   ;;  %v3341_v44 = vld [vmem:[%s4663_s3 + $0x64] ss:$8 sps:$4 sm:$0xff]  }
  0xe3   :  { %1902 = vmatpush2.bf16.msra.mxu0 %v3288_v7  ;;  %v3333_v40 = vld [vmem:[%s4661_s1 + $0x708] ss:$16 sps:$4 sm:$0xff]   ;;  %v3344_v16 = vld [vmem:[%s4663_s3 + $0x54] ss:$8 sps:$4 sm:$0xff]   ;;  %v3347_v56 = vld [vmem:[%s4663_s3 + $0x44] ss:$8 sps:$4 sm:$0xff]  }
  0xe4   :  { %1943 = vmatpush2.bf16.msra.mxu1 %v3291_v8  ;;  %1903 = vmatprep.subr.bf16.mxu0 %v3296_v9  ;;  %v3336_v42 = vld [vmem:[%s4663_s3 + $0x70] ss:$8 sps:$4 sm:$0xff]   ;;  %v3339_v45 = vld [vmem:[%s4663_s3 + $0x60] ss:$8 sps:$4 sm:$0xff]   ;;  %v3386_v51 = vld [vmem:[%s4663_s3 + $0x174] ss:$8 sps:$4 sm:$0xff]  }
  0xe5   :  { %1944 = vmatprep.subr.bf16.mxu1 %v3299_v10  ;;  %v3384_v50 = vld [vmem:[%s4663_s3 + $0x170] ss:$8 sps:$4 sm:$0xff]   ;;  %v3389_v52 = vld [vmem:[%s4663_s3 + $0x164] ss:$8 sps:$4 sm:$0xff]   ;;  %v3345_v54 = vld [vmem:[%s4663_s3 + $0x40] ss:$8 sps:$4 sm:$0xff]  }
  0xe6   :  { %v3387_v49 = vld [vmem:[%s4663_s3 + $0x160] ss:$8 sps:$4 sm:$0xff]   ;;  %v3350_v55 = vld [vmem:[%s4663_s3 + $0x34] ss:$8 sps:$4 sm:$0xff]   ;;  %v3348_v58 = vld [vmem:[%s4663_s3 + $0x30] ss:$8 sps:$4 sm:$0xff]  }
  0xe7   :  { %1904 = vmatpush2.bf16.msra.mxu0 %v3294_v11  ;;  %v3392_v57 = vld [vmem:[%s4663_s3 + $0x154] ss:$8 sps:$4 sm:$0xff]   ;;  %v3390_v59 = vld [vmem:[%s4663_s3 + $0x150] ss:$8 sps:$4 sm:$0xff]   ;;  %v3353_v60 = vld [vmem:[%s4663_s3 + $0x24] ss:$8 sps:$4 sm:$0xff]  }
  0xe8   :  { %1945 = vmatpush2.bf16.msra.mxu1 %v3297_v12  ;;  %1905 = vmatprep.subr.bf16.mxu0 %v3302_v13  ;;  %v3395_v61 = vld [vmem:[%s4663_s3 + $0x144] ss:$8 sps:$4 sm:$0xff]   ;;  %v3351_v63 = vld [vmem:[%s4663_s3 + $0x20] ss:$8 sps:$4 sm:$0xff]   ;;  %v3356_v1 = vld [vmem:[%s4663_s3 + $0x14] ss:$8 sps:$4 sm:$0xff]  }
  0xe9   :  { %1946 = vmatprep.subr.bf16.mxu1 %v3305_v14  ;;  %v3393_v0 = vld [vmem:[%s4663_s3 + $0x140] ss:$8 sps:$4 sm:$0xff]   ;;  %v3398_v2 = vld [vmem:[%s4663_s3 + $0x134] ss:$8 sps:$4 sm:$0xff]   ;;  %v3354_v4 = vld [vmem:[%s4663_s3 + $0x10] ss:$8 sps:$4 sm:$0xff]  }
  0xea   :  { %v3396_v5 = vld [vmem:[%s4663_s3 + $0x130] ss:$8 sps:$4 sm:$0xff]   ;;  %v3359_v6 = vld [vmem:[%s4663_s3 + $0x4] ss:$8 sps:$4 sm:$0xff]   ;;  %v3357_v8 = vld [vmem:[%s4663_s3] ss:$8 sps:$4 sm:$0xff]  }
  0xeb   :  { %1906 = vmatpush2.bf16.msra.mxu0 %v3300_v15  ;;  %v3401_v7 = vld [vmem:[%s4663_s3 + $0x124] ss:$8 sps:$4 sm:$0xff]   ;;  %v3399_v9 = vld [vmem:[%s4663_s3 + $0x120] ss:$8 sps:$4 sm:$0xff]   ;;  %v3362_v10 = vld [vmem:[%s4663_s3 + $0xf4] ss:$8 sps:$4 sm:$0xff]  }
  0xec   :  { %1947 = vmatpush2.bf16.msra.mxu1 %v3303_v18  ;;  %1907 = vmatprep.subr.bf16.mxu0 %v3308_v19  ;;  %v3404_v11 = vld [vmem:[%s4663_s3 + $0x114] ss:$8 sps:$4 sm:$0xff]   ;;  %v3360_v12 = vld [vmem:[%s4663_s3 + $0xf0] ss:$8 sps:$4 sm:$0xff]   ;;  %v3365_v14 = vld [vmem:[%s4663_s3 + $0xe4] ss:$8 sps:$4 sm:$0xff]  }
  0xed   :  { %1948 = vmatprep.subr.bf16.mxu1 %v3311_v20  ;;  %v3402_v13 = vld [vmem:[%s4663_s3 + $0x110] ss:$8 sps:$4 sm:$0xff]   ;;  %v3407_v15 = vld [vmem:[%s4663_s3 + $0x104] ss:$8 sps:$4 sm:$0xff]   ;;  %v3363_v18 = vld [vmem:[%s4663_s3 + $0xe0] ss:$8 sps:$4 sm:$0xff]  }
  0xee   :  { %v3405_v19 = vld [vmem:[%s4663_s3 + $0x100] ss:$8 sps:$4 sm:$0xff]   ;;  %v3368_v20 = vld [vmem:[%s4663_s3 + $0xd4] ss:$8 sps:$4 sm:$0xff]  }
  0xef   :  { %1908 = vmatpush2.bf16.msra.mxu0 %v3306_v21  ;;  %v3410_v21 = vld [vmem:[%s4663_s3 + $0x1f4] ss:$8 sps:$4 sm:$0xff]  }
  0xf0   :  { %1949 = vmatpush2.bf16.msra.mxu1 %v3309_v22  ;;  %1909 = vmatprep.subr.bf16.mxu0 %v3314_v23  ;;  %v3366_v22 = vld [vmem:[%s4663_s3 + $0xd0] ss:$8 sps:$4 sm:$0xff]  }
  0xf1   :  { %1950 = vmatprep.subr.bf16.mxu1 %v3317_v24  ;;  %v3408_v23 = vld [vmem:[%s4663_s3 + $0x1f0] ss:$8 sps:$4 sm:$0xff]   ;;  %v3371_v24 = vld [vmem:[%s4663_s3 + $0xc4] ss:$8 sps:$4 sm:$0xff]  }
  0xf3   :  { %1910 = vmatpush2.bf16.msra.mxu0 %v3312_v25  ;;  %v3413_v25 = vld [vmem:[%s4663_s3 + $0x1e4] ss:$8 sps:$4 sm:$0xff]  }
  0xf4   :  { %1951 = vmatpush2.bf16.msra.mxu1 %v3315_v26  ;;  %1911 = vmatprep.subr.bf16.mxu0 %v3320_v27  ;;  %v3369_v26 = vld [vmem:[%s4663_s3 + $0xc0] ss:$8 sps:$4 sm:$0xff]  }
  0xf5   :  { %1952 = vmatprep.subr.bf16.mxu1 %v3323_v28  ;;  %v3411_v27 = vld [vmem:[%s4663_s3 + $0x1e0] ss:$8 sps:$4 sm:$0xff]   ;;  %v3374_v28 = vld [vmem:[%s4663_s3 + $0xb4] ss:$8 sps:$4 sm:$0xff]  }
  0xf7   :  { %1912 = vmatpush2.bf16.msra.mxu0 %v3318_v29  ;;  %v3416_v29 = vld [vmem:[%s4663_s3 + $0x1d4] ss:$8 sps:$4 sm:$0xff]  }
  0xf8   :  { %1953 = vmatpush2.bf16.msra.mxu1 %v3321_v30  ;;  %1913 = vmatprep.subr.bf16.mxu0 %v3326_v33  ;;  %v3372_v30 = vld [vmem:[%s4663_s3 + $0xb0] ss:$8 sps:$4 sm:$0xff]  }
  0xf9   :  { %1954 = vmatprep.subr.bf16.mxu1 %v3329_v34  ;;  %v3414_v33 = vld [vmem:[%s4663_s3 + $0x1d0] ss:$8 sps:$4 sm:$0xff]   ;;  %v3377_v34 = vld [vmem:[%s4663_s3 + $0xa4] ss:$8 sps:$4 sm:$0xff]  }
  0xfb   :  { %1914 = vmatpush2.bf16.msra.mxu0 %v3324_v35  ;;  %v3419_v35 = vld [vmem:[%s4663_s3 + $0x1c4] ss:$8 sps:$4 sm:$0xff]  }
  0xfc   :  { %1955 = vmatpush2.bf16.msra.mxu1 %v3327_v36  ;;  %1915 = vmatprep.subr.bf16.mxu0 %v3332_v37  ;;  %v3375_v36 = vld [vmem:[%s4663_s3 + $0xa0] ss:$8 sps:$4 sm:$0xff]  }
  0xfd   :  { %1956 = vmatprep.subr.bf16.mxu1 %v3335_v38  ;;  %v3417_v37 = vld [vmem:[%s4663_s3 + $0x1c0] ss:$8 sps:$4 sm:$0xff]   ;;  %v3380_v38 = vld [vmem:[%s4663_s3 + $0x94] ss:$8 sps:$4 sm:$0xff]  }
  0xff   :  { %1916 = vmatpush2.bf16.msra.mxu0 %v3330_v39  ;;  %v3422_v39 = vld [vmem:[%s4663_s3 + $0x1b4] ss:$8 sps:$4 sm:$0xff]  }
 0x100   :  { %1957 = vmatpush2.bf16.msra.mxu1 %v3333_v40  ;;  %2371 = vmatprep.subr.bf16.mxu0 %v3338_v41  ;;  %v341_v40 = vsub.s32 0, %v3617_v43  ;;  %v4501_v41 = vld [vmem:[%s4662_s2] sm:$0xf]  ;;  %s2584_s2 = sshll.u32 %s3459_s10, 4  ;;  %s2585_s2 = int_to_ptr.vmem [resolvable:$true] %s2584_s2 }
 0x101   :  { %2412 = vmatprep.subr.bf16.mxu1 %v3386_v51  ;;  %v3423_v51 = vld [vmem:[%s4663_s3 + $0x1a0] ss:$8 sps:$4 sm:$0xff]   ;;  %p3441_p1 = scmp.lt.s32.totalorder %s2585_s2, %s2585_s2 }
 0x102   :  { %v4334_v62 = vpop.f32.mrf.mxu0  ;;  %1918 = vmatmul.mubr.bf16.vlgmr.msra.gmra.mxu0 %v3933_v31  ;;  %v3342_v31 = vld [vmem:[%s4663_s3 + $0x50] ss:$8 sps:$4 sm:$0xff]  }
 0x103   :  { %v4336_v3 = vpop.f32.mrf.mxu1  ;;  %1959 = vmatmul.mubr.bf16.vlgmr.msra.gmra.mxu1 %v3937_v32  ;;  %2372 = vmatpush1.bf16.msra.mxu0 %v3336_v42  ;;  %v345_v42 = vsub.s32 1, %v3617_v43 }
 0x104   :  { %v4343_v46 = vpop.f32.mrf.mxu0  ;;  %2373 = vmatprep.subr.bf16.mxu0 %v3341_v44  ;;  %2413 = vmatpush1.bf16.msra.mxu1 %v3384_v50  ;;  %v3378_v44 = vld [vmem:[%s4663_s3 + $0x90] ss:$8 sps:$4 sm:$0xff]  }
 0x105   :  { %v4345_v47 = vpop.f32.mrf.mxu1  ;;  %2414 = vmatprep.subr.bf16.mxu1 %v3389_v52 }
 0x106   :  { %v1677_v17 = vpop.f32.mrf.mxu0 }
 0x107   :  { %v1718_v48 = vpop.f32.mrf.mxu1  ;;  %2374 = vmatpush1.bf16.msra.mxu0 %v3339_v45  ;;  %v3420_v45 = vld [vmem:[%s4663_s3 + $0x1b0] ss:$8 sps:$4 sm:$0xff]   ;;  %v342_v17 = vrot.slane %v4501_v41, %v341_v40 }
 0x108   :  { %v1678_v32 = vpop.f32.mrf.mxu0  ;;  %2375 = vmatprep.subr.bf16.mxu0 %v3344_v16  ;;  %2415 = vmatpush1.bf16.msra.mxu1 %v3387_v49  ;;  %v3383_v16 = vld [vmem:[%s4663_s3 + $0x84] ss:$8 sps:$4 sm:$0xff]   ;;  %v346_v48 = vrot.slane %v4501_v41, %v345_v42 }
 0x109   :  { %v1719_v53 = vpop.f32.mrf.mxu1  ;;  %2416 = vmatprep.subr.bf16.mxu1 %v3392_v57  ;;  %v1674_v32 = vadd.f32 %v4334_v62, %v342_v17  ;;  %v3428_v57 = vld [vmem:[%s4663_s3 + $0x194] ss:$8 sps:$4 sm:$0xff]   ;;  %v2459_v17 = vld [vmem:[%s4665_s5 + $0x20] sm:$0xff] }
 0x10a   :  { %v1676_v53 = vadd.f32 %v4343_v46, %v346_v48  ;;  %v349_v48 = vsub.s32 2, %v3617_v43 }
 0x10b   :  { %2376 = vmatpush1.bf16.msra.mxu0 %v3342_v31  ;;  %v3381_v31 = vld [vmem:[%s4663_s3 + $0x80] ss:$8 sps:$4 sm:$0xff]   ;;  %v1715_v50 = vadd.f32 %v4336_v3, %v1674_v32  ;;  %v3426_v3 = vld [vmem:[%s4663_s3 + $0x190] ss:$8 sps:$4 sm:$0xff]  }
 0x10c   :  { %2377 = vmatprep.subr.bf16.mxu0 %v3347_v56  ;;  %2417 = vmatpush1.bf16.msra.mxu1 %v3390_v59  ;;  %v3425_v56 = vld [vmem:[%s4663_s3 + $0x1a4] ss:$8 sps:$4 sm:$0xff]   ;;  %v1717_v49 = vadd.f32 %v4345_v47, %v1676_v53  ;;  %v350_v32 = vrot.slane %v4501_v41, %v349_v48 }
 0x10d   :  { %2418 = vmatprep.subr.bf16.mxu1 %v3395_v61 }
 0x10f   :  { %2378 = vmatpush1.bf16.msra.mxu0 %v3345_v54 }
 0x110   :  { %2379 = vmatprep.subr.bf16.mxu0 %v3350_v55  ;;  %2419 = vmatpush1.bf16.msra.mxu1 %v3393_v0 }
 0x111   :  { %2420 = vmatprep.subr.bf16.mxu1 %v3398_v2  ;;  %v3431_v2 = vld [vmem:[%s4663_s3 + $0x184] ss:$8 sps:$4 sm:$0xff]  }
 0x113   :  { %2380 = vmatpush1.bf16.msra.mxu0 %v3348_v58 }
 0x114   :  { %2381 = vmatprep.subr.bf16.mxu0 %v3353_v60  ;;  %2421 = vmatpush1.bf16.msra.mxu1 %v3396_v5  ;;  %v3429_v5 = vld [vmem:[%s4663_s3 + $0x180] ss:$8 sps:$4 sm:$0xff]  }
 0x115   :  { %2422 = vmatprep.subr.bf16.mxu1 %v3401_v7 }
 0x117   :  { %2382 = vmatpush1.bf16.msra.mxu0 %v3351_v63 }
 0x118   :  { %2383 = vmatprep.subr.bf16.mxu0 %v3356_v1  ;;  %2423 = vmatpush1.bf16.msra.mxu1 %v3399_v9 }
 0x119   :  { %2424 = vmatprep.subr.bf16.mxu1 %v3404_v11 }
 0x11b   :  { %2384 = vmatpush1.bf16.msra.mxu0 %v3354_v4 }
 0x11c   :  { %2385 = vmatprep.subr.bf16.mxu0 %v3359_v6  ;;  %2425 = vmatpush1.bf16.msra.mxu1 %v3402_v13 }
 0x11d   :  { %2426 = vmatprep.subr.bf16.mxu1 %v3407_v15 }
 0x11f   :  { %2386 = vmatpush1.bf16.msra.mxu0 %v3357_v8 }
 0x120   :  { %2387 = vmatprep.subr.bf16.mxu0 %v3362_v10  ;;  %2427 = vmatpush1.bf16.msra.mxu1 %v3405_v19  ;;  %v2470_v19 = vld [vmem:[%s4665_s5 + $0x78] sm:$0xff] }
 0x121   :  { %2428 = vmatprep.subr.bf16.mxu1 %v3410_v21  ;;  %v2469_v21 = vld [vmem:[%s4665_s5 + $0x70] sm:$0xff] }
 0x123   :  { %2388 = vmatpush2.bf16.msra.mxu0 %v3360_v12 }
 0x124   :  { %2389 = vmatprep.subr.bf16.mxu0 %v3365_v14  ;;  %2429 = vmatpush2.bf16.msra.mxu1 %v3408_v23  ;;  %v2468_v23 = vld [vmem:[%s4665_s5 + $0x68] sm:$0xff] }
 0x125   :  { %2430 = vmatprep.subr.bf16.mxu1 %v3413_v25  ;;  %v2467_v25 = vld [vmem:[%s4665_s5 + $0x60] sm:$0xff] }
 0x127   :  { %2390 = vmatpush2.bf16.msra.mxu0 %v3363_v18  ;;  %v2486_v18 = vld [vmem:[%s4665_s5 + $0xf8] sm:$0xff] }
 0x128   :  { %2391 = vmatprep.subr.bf16.mxu0 %v3368_v20  ;;  %2431 = vmatpush2.bf16.msra.mxu1 %v3411_v27  ;;  %v2485_v20 = vld [vmem:[%s4665_s5 + $0xf0] sm:$0xff]  ;;  %v2466_v27 = vld [vmem:[%s4665_s5 + $0x58] sm:$0xff] }
 0x129   :  { %2432 = vmatprep.subr.bf16.mxu1 %v3416_v29  ;;  %v2465_v29 = vld [vmem:[%s4665_s5 + $0x50] sm:$0xff] }
 0x12b   :  { %2392 = vmatpush2.bf16.msra.mxu0 %v3366_v22  ;;  %v2484_v22 = vld [vmem:[%s4665_s5 + $0xe8] sm:$0xff] }
 0x12c   :  { %2393 = vmatprep.subr.bf16.mxu0 %v3371_v24  ;;  %2433 = vmatpush2.bf16.msra.mxu1 %v3414_v33  ;;  %v2483_v24 = vld [vmem:[%s4665_s5 + $0xe0] sm:$0xff]  ;;  %v2464_v33 = vld [vmem:[%s4665_s5 + $0x48] sm:$0xff] }
 0x12d   :  { %2434 = vmatprep.subr.bf16.mxu1 %v3419_v35  ;;  %v2463_v35 = vld [vmem:[%s4665_s5 + $0x40] sm:$0xff] }
 0x12f   :  { %2394 = vmatpush2.bf16.msra.mxu0 %v3369_v26  ;;  %v2482_v26 = vld [vmem:[%s4665_s5 + $0xd8] sm:$0xff] }
 0x130   :  { %2395 = vmatprep.subr.bf16.mxu0 %v3374_v28  ;;  %2435 = vmatpush2.bf16.msra.mxu1 %v3417_v37  ;;  %v2481_v28 = vld [vmem:[%s4665_s5 + $0xd0] sm:$0xff]  ;;  %v2462_v37 = vld [vmem:[%s4665_s5 + $0x38] sm:$0xff] }
 0x131   :  { %2436 = vmatprep.subr.bf16.mxu1 %v3422_v39  ;;  %v2461_v39 = vld [vmem:[%s4665_s5 + $0x30] sm:$0xff] }
 0x133   :  { %2396 = vmatpush2.bf16.msra.mxu0 %v3372_v30  ;;  %v2480_v30 = vld [vmem:[%s4665_s5 + $0xc8] sm:$0xff] }
 0x134   :  { %2397 = vmatprep.subr.bf16.mxu0 %v3377_v34  ;;  %2437 = vmatpush2.bf16.msra.mxu1 %v3420_v45  ;;  %v2479_v34 = vld [vmem:[%s4665_s5 + $0xc0] sm:$0xff]  ;;  %v2460_v45 = vld [vmem:[%s4665_s5 + $0x28] sm:$0xff] }
 0x135   :  { %2438 = vmatprep.subr.bf16.mxu1 %v3425_v56 }
 0x137   :  { %2398 = vmatpush2.bf16.msra.mxu0 %v3375_v36  ;;  %v2478_v36 = vld [vmem:[%s4665_s5 + $0xb8] sm:$0xff] }
 0x138   :  { %2399 = vmatprep.subr.bf16.mxu0 %v3380_v38  ;;  %2439 = vmatpush2.bf16.msra.mxu1 %v3423_v51  ;;  %v2477_v38 = vld [vmem:[%s4665_s5 + $0xb0] sm:$0xff] }
 0x139   :  { %2440 = vmatprep.subr.bf16.mxu1 %v3428_v57 }
 0x13b   :  { %2400 = vmatpush2.bf16.msra.mxu0 %v3378_v44  ;;  %v2476_v44 = vld [vmem:[%s4665_s5 + $0xa8] sm:$0xff] }
 0x13c   :  { %2401 = vmatprep.subr.bf16.mxu0 %v3383_v16  ;;  %2441 = vmatpush2.bf16.msra.mxu1 %v3426_v3  ;;  %v2475_v16 = vld [vmem:[%s4665_s5 + $0xa0] sm:$0xff] }
 0x13d   :  { %2442 = vmatprep.subr.bf16.mxu1 %v3431_v2  ;;  %v2474_v2 = vld [vmem:[%s4665_s5 + $0x98] sm:$0xff] }
 0x13f   :  { %2402 = vmatpush2.bf16.msra.mxu0 %v3381_v31  ;;  %v353_v31 = vsub.s32 3, %v3617_v43 }
 0x140   :  { %2443 = vmatpush2.bf16.msra.mxu1 %v3429_v5  ;;  %2913 = vmatprep.subr.mxu0 %v2486_v18  ;;  %v2458_v5 = vld [vmem:[%s4665_s5 + $0x18] sm:$0xff] }
 0x141   :  { %v354_v53 = vrot.slane %v4501_v41, %v353_v31 }
 0x142   :  { %v1755_v52 = vpop.f32.mrf.mxu0 }
 0x143   :  { %v1796_v54 = vpop.f32.mrf.mxu1  ;;  %v1756_v55 = vadd.f32 %v1755_v52, %v1715_v50 }
 0x144   :  { %v1757_v62 = vpop.f32.mrf.mxu0 }
 0x145   :  { %v1798_v46 = vpop.f32.mrf.mxu1  ;;  %v1797_v58 = vadd.f32 %v1796_v54, %v1756_v55  ;;  %v1758_v59 = vadd.f32 %v1757_v62, %v1717_v49 }
 0x146   :  { %v1759_v60 = vpop.f32.mrf.mxu0 }
 0x147   :  { %v1800_v61 = vpop.f32.mrf.mxu1  ;;  %v1799_v63 = vadd.f32 %v1798_v46, %v1758_v59  ;;  %v1967_v47 = vmax.f32 %v1797_v58, 0.0 }
 0x148   :  { %v1760_v0 = vpop.f32.mrf.mxu0 }
 0x149   :  { %v1801_v1 = vpop.f32.mrf.mxu1  ;;  %v1968_v4 = vmax.f32 %v1799_v63, 0.0  ;;  %v1971_v7 = vpack.c.bf16 %v1967_v47, %v1967_v47 }
 0x14b   :  { %v1972_v6 = vpack.c.bf16 %v1968_v4, %v1968_v4 }
 0x14d   :  { %2403 = vmatprep.mubr.bf16.mxu0 %v1972_v6  ;;  %v2473_v6 = vld [vmem:[%s4665_s5 + $0x90] sm:$0xff] }
 0x14e   :  { %2404 = vmatmul.mubr.bf16.vlgmr.msra.gmra.mxu0 %v1971_v7 }
 0x14f   :  { %2914 = vmatpush3.msra.mxu0 %v2470_v19 }
 0x150   :  { %2915 = vmatprep.subr.mxu0 %v2485_v20 }
 0x151   :  { %2916 = vmatpush3.msra.mxu0 %v2469_v21 }
 0x152   :  { %2917 = vmatprep.subr.mxu0 %v2484_v22 }
 0x153   :  { %2918 = vmatpush3.msra.mxu0 %v2468_v23 }
 0x154   :  { %2919 = vmatprep.subr.mxu0 %v2483_v24 }
 0x155   :  { %2920 = vmatpush3.msra.mxu0 %v2467_v25 }
 0x156   :  { %2921 = vmatprep.subr.mxu0 %v2482_v26 }
 0x157   :  { %2922 = vmatpush3.msra.mxu0 %v2466_v27 }
 0x158   :  { %2923 = vmatprep.subr.mxu0 %v2481_v28 }
 0x159   :  { %2924 = vmatpush3.msra.mxu0 %v2465_v29 }
 0x15a   :  { %2925 = vmatprep.subr.mxu0 %v2480_v30 }
 0x15b   :  { %2926 = vmatpush3.msra.mxu0 %v2464_v33 }
 0x15c   :  { %2927 = vmatprep.subr.mxu0 %v2479_v34 }
 0x15d   :  { %2928 = vmatpush3.msra.mxu0 %v2463_v35 }
 0x15e   :  { %2929 = vmatprep.subr.mxu0 %v2478_v36 }
 0x15f   :  { %2930 = vmatpush3.msra.mxu0 %v2462_v37 }
 0x160   :  { %2931 = vmatprep.subr.mxu0 %v2477_v38 }
 0x161   :  { %2932 = vmatpush3.msra.mxu0 %v2461_v39 }
 0x162   :  { %2933 = vmatprep.subr.mxu0 %v2476_v44 }
 0x163   :  { %2934 = vmatpush3.msra.mxu0 %v2460_v45 }
 0x164   :  { %2935 = vmatprep.subr.mxu0 %v2475_v16 }
 0x165   :  { %2936 = vmatpush3.msra.mxu0 %v2459_v17 }
 0x166   :  { %2937 = vmatprep.subr.mxu0 %v2474_v2 }
 0x167   :  { %2938 = vmatpush3.msra.mxu0 %v2458_v5 }
 0x168   :  { %2939 = vmatprep.subr.mxu0 %v2473_v6 }
 0x182   :  { %v1837_v8 = vpop.f32.mrf.mxu0 }
 0x183   :  { %v1878_v9 = vpop.f32.mrf.mxu1  ;;  %v1838_v56 = vadd.f32 %v1837_v8, %v350_v32  ;;  %v2457_v8 = vld [vmem:[%s4665_s5 + $0x10] sm:$0xff] }
 0x184   :  { %v1839_v10 = vpop.f32.mrf.mxu0  ;;  %2940 = vmatpush3.msra.mxu0 %v2457_v8 }
 0x185   :  { %v1880_v11 = vpop.f32.mrf.mxu1  ;;  %v1840_v50 = vadd.f32 %v1839_v10, %v354_v53  ;;  %v1879_v51 = vadd.f32 %v1878_v9, %v1838_v56  ;;  %v2472_v9 = vld [vmem:[%s4665_s5 + $0x88] sm:$0xff] }
 0x186   :  { %v1841_v12 = vpop.f32.mrf.mxu0  ;;  %2941 = vmatprep.subr.mxu0 %v2472_v9 }
 0x187   :  { %v1882_v13 = vpop.f32.mrf.mxu1  ;;  %v1881_v49 = vadd.f32 %v1880_v11, %v1840_v50  ;;  %v2456_v11 = vld [vmem:[%s4665_s5 + $0x8] sm:$0xff]  ;;  %v2471_v12 = vld [vmem:[%s4665_s5 + $0x80] sm:$0xff] }
 0x188   :  { %v1842_v14 = vpop.f32.mrf.mxu0  ;;  %2942 = vmatpush3.msra.mxu0 %v2456_v11 }
 0x189   :  { %v1883_v15 = vpop.f32.mrf.mxu1  ;;  %2943 = vmatprep.subr.mxu0 %v2471_v12  ;;  %v2455_v14 = vld [vmem:[%s4665_s5] sm:$0xff] }
 0x18a   :  { %2944 = vmatpush3.msra.mxu0 %v2455_v14  ;;  %v2039_v15 = vld [vmem:[%s4664_s4] sm:$0x3] }
 0x18b   :  { %v2044_v18 = vrot.slane %v2039_v15, %v341_v40  ;;  %v2048_v19 = vrot.slane %v2039_v15, %v345_v42  ;;  %v2912_v40 = vld [vmem:[%s4666_s6] ss:$0 sm:$0xff]  ;;  %s3436_s6 = scalar_lea.vmem %s2585_s2, 32 }
 0x18c   :  { %p3437_p0 = scmp.ne.s32.totalorder %s2585_s2, %s3436_s6  ;;  %p3442_p2 = scmp.lt.s32.totalorder %s3436_s6, %s3436_s6 }
 0x18e   :  { %p3443_p3 = por %p3442_p2, %p3441_p1 }
 0x190   :  { %p3444_p4 = pnand %p3443_p3, %p3437_p0 }
 0x1c2   :  { %v1919_v52 = vpop.f32.mrf.mxu0 }
 0x1c3   :  { %v1960_v54 = vpop.f32.mrf.mxu1  ;;  %v1920_v55 = vadd.f32 %v1919_v52, %v1879_v51 }
 0x1c4   :  { %v1921_v62 = vpop.f32.mrf.mxu0 }
 0x1c5   :  { %v1962_v46 = vpop.f32.mrf.mxu1  ;;  %v1961_v57 = vadd.f32 %v1960_v54, %v1920_v55  ;;  %v1922_v58 = vadd.f32 %v1921_v62, %v1881_v49 }
 0x1c6   :  { %v1923_v59 = vpop.f32.mrf.mxu0 }
 0x1c7   :  { %v1964_v3 = vpop.f32.mrf.mxu1  ;;  %v1963_v60 = vadd.f32 %v1962_v46, %v1922_v58  ;;  %v1969_v61 = vmax.f32 %v1961_v57, 0.0 }
 0x1c8   :  { %v1924_v63 = vpop.f32.mrf.mxu0 }
 0x1c9   :  { %v1965_v47 = vpop.f32.mrf.mxu1  ;;  %v1970_v0 = vmax.f32 %v1963_v60, 0.0  ;;  %v1973_v41 = vpack.c.bf16 %v1969_v61, %v1969_v61 }
 0x1cb   :  { %v1974_v1 = vpack.c.bf16 %v1970_v0, %v1970_v0 }
 0x1cd   :  { %2444 = vmatprep.mubr.bf16.mxu1 %v1974_v1 }
 0x1ce   :  { %2445 = vmatmul.mubr.bf16.vlgmr.msra.gmra.mxu1 %v1973_v41 }
 0x20e   :  { %v2405_v4 = vpop.f32.mrf.mxu0 }
 0x20f   :  { %v2406_v20 = vadd.f32 %v2405_v4, %v2044_v18 }
 0x210   :  { %v2407_v7 = vpop.f32.mrf.mxu0 }
 0x211   :  { %v2408_v22 = vadd.f32 %v2407_v7, %v2048_v19 }
 0x212   :  { %v2409_v10 = vpop.f32.mrf.mxu0 }
 0x214   :  { %v2410_v13 = vpop.f32.mrf.mxu0 }
 0x28e   :  { %v2446_v21 = vpop.f32.mrf.mxu1 }
 0x28f   :  { %v2447_v23 = vadd.f32 %v2446_v21, %v2406_v20 }
 0x290   :  { %v2448_v24 = vpop.f32.mrf.mxu1 }
 0x291   :  { %v2449_v25 = vadd.f32 %v2448_v24, %v2408_v22  ;;  %v2453_v28 = vmax.f32 %v2447_v23, 0.0 }
 0x292   :  { %v2450_v26 = vpop.f32.mrf.mxu1 }
 0x293   :  { %v2454_v27 = vmax.f32 %v2449_v25, 0.0 }
 0x294   :  { %v2451_v29 = vpop.f32.mrf.mxu1 }
 0x295   :  { %2558 = vmatprep.mubr.f32.mxu0 %v2454_v27 }
 0x296   :  { %2559 = vmatmul.mubr.f32.vlgmr.msra.gmra.mxu0 %v2453_v28 }
 0x356   :  { %v2945_v30 = vpop.f32.mrf.mxu0 }
 0x358   :  { %v2946_v33 = vpop.f32.mrf.mxu0 }
 0x359   :  { %v2947_v43 = vadd.f32 %v2946_v33, %v2945_v30 }
 0x35b   :  { %v2561_v42 = vadd.f32 %v2947_v43, %v2912_v40 }
 0x35d   :  { %v2565_v34 = vsel %vm2564_vm0, %v2561_v42, -inf }
 0x35e   :  { %2566 = vmax.xlane.f32.xlu0 %v2565_v34 }
 0x3e7   :  { %v2567_v35 = vpop.xlane.xlu0 %2566 }
 0x3e8   :  { %v2568_v36 = vsub.f32 %v2561_v42, %v2567_v35 }
 0x3ea   :  { %v2569_v37 = vmul.f32 1.442695, %v2568_v36 }
 0x3ec   :  { %3432 = vpow2.f32 %v2569_v37 }
 0x3f9   :  { %v3433_v38 = vpop.eup %3432 }
 0x3fa   :  { %v2571_v39 = vsel %vm2564_vm0, %v3433_v38, 0.0 }
 0x3fb   :  { %2572 = vadd.xlane.f32.xlu0 %v2571_v39 }
 0x484   :  { %v2573_v44 = vpop.xlane.xlu0 %2572 }
 0x485   :  { %3434 = vlog2.f32 %v2573_v44 }
 0x492   :  { %v3435_v45 = vpop.eup %3434 }
 0x493   :  { %v2575_v16 = vmul.f32 0.6931472, %v3435_v45 }
 0x495   :  { %v2576_v17 = vsub.f32 %v2568_v36, %v2575_v16 }
 0x497   :  { %2577 = vst.msk [vmem:[#allocation2] sm:$0x3] %vm2564_vm0, %v2576_v17 }
 0x498   :  { %3447 = shalt.err (!%p3444_p4)
}
 0x499   :  { %2587 = dma.vmem_to_hbm [thread:$0]  %s2585_s2, 32, %s4667_s7, [#allocation3]  }
 0x49a   :  { %3456 = dma.done.wait [#allocation3], 32  }
 0x49b   :  { %3457 = vsyncadd [#allocation3], 4294967264 }
 0x49c   :  { %2591 = vsyncpa [#allocation3], 1 }

</bundles_post_ra>
